<compile_context>
chip_gen: v7x
topology: tpu7x:2x2x1
jax: 0.10.0
libtpu: 0.0.40
codegen_flags: <defaults>
</compile_context>

<pallas_src>
import functools

import jax
import jax.numpy as jnp
from jax.experimental import pallas as pl
from jax.experimental.pallas import tpu as pltpu


def _round_up(x: int, m: int) -> int:
    return ((x + m - 1) // m) * m


# ---------------------------------------------------------------------------
# Fused kernel (single K block, BN scale pre-folded into W):
#     Y = act( X @ W + bias [+ residual] )
# Optional fused epilogue: global average pool over the tile's tm rows
# (used for the last conv, where one M tile == one sample's H*W positions).
# ---------------------------------------------------------------------------
def _make_kernel(relu: bool, has_residual: bool, pool_inv=None):
    def kernel(*refs):
        if has_residual:
            x_ref, w_ref, b_ref, r_ref, o_ref = refs
        else:
            x_ref, w_ref, b_ref, o_ref = refs
            r_ref = None
        # bf16 x bf16 -> f32 accumulate on the MXU.
        y = jnp.dot(x_ref[...], w_ref[...], preferred_element_type=jnp.float32)
        y = y + b_ref[...]
        if has_residual:
            y = y + r_ref[...].astype(jnp.float32)
        if relu:
            y = jnp.maximum(y, 0.0)
        if pool_inv is None:
            o_ref[...] = y.astype(o_ref.dtype)
        else:
            pooled = jnp.sum(y, axis=0, keepdims=True) * pool_inv      # (1, tn)
            o_ref[...] = jnp.broadcast_to(pooled, o_ref.shape).astype(o_ref.dtype)

    return kernel


def _matmul_bn_act(x, w, bias, residual=None, relu=False, pool_hw=None,
                   out_dtype=jnp.bfloat16, tm=256, tn=128):
    """x:(M,K) bf16 patches, w:(K,N) bf16 (BN scale folded in), bias:(N,) f32."""
    m, k = x.shape
    _, n = w.shape

    if pool_hw is not None:
        # One M tile == one sample's spatial positions -> pool in the epilogue.
        assert m % pool_hw == 0 and pool_hw % 8 == 0
        tm = pool_hw
    else:
        tm = min(tm, _round_up(m, 8))

    mp, kp, np_ = _round_up(m, tm), _round_up(k, 128), _round_up(n, tn)

    # Zero-padded K columns contribute nothing; padded M/N rows are sliced off.
    x_p = jnp.pad(x, ((0, mp - m), (0, kp - k)))
    w_p = jnp.pad(w, ((0, kp - k), (0, np_ - n)))
    b_p = jnp.pad(bias.reshape(1, n).astype(jnp.float32), ((0, 0), (0, np_ - n)))

    operands = [x_p, w_p, b_p]
    in_specs = [
        pl.BlockSpec((tm, kp), lambda i, j: (i, 0)),      # full K in one block
        pl.BlockSpec((kp, tn), lambda i, j: (0, j)),
        pl.BlockSpec((1, tn), lambda i, j: (0, j)),
    ]
    if residual is not None:
        r_p = jnp.pad(residual, ((0, mp - m), (0, np_ - n)))
        operands.append(r_p)
        in_specs.append(pl.BlockSpec((tm, tn), lambda i, j: (i, j)))

    grid = (mp // tm, np_ // tn)
    flops = 2 * mp * kp * np_
    bytes_acc = 2 * (x_p.size + w_p.size) + 4 * mp * np_
    if residual is not None:
        bytes_acc += 2 * mp * np_

    if pool_hw is None:
        out_shape = jax.ShapeDtypeStruct((mp, np_), out_dtype)
        out_specs = pl.BlockSpec((tm, tn), lambda i, j: (i, j))
    else:
        n_samples = mp // tm
        # Pooled row replicated into 8 sublanes to keep the block (8,128)-legal.
        out_shape = jax.ShapeDtypeStruct((n_samples, 8, np_), jnp.float32)
        out_specs = pl.BlockSpec((1, 8, tn), lambda i, j: (i, 0, j))

    out = pl.pallas_call(
        _make_kernel(relu, residual is not None,
                     None if pool_hw is None else 1.0 / float(pool_hw)),
        out_shape=out_shape,
        grid=grid,
        in_specs=in_specs,
        out_specs=out_specs,
        compiler_params=pltpu.CompilerParams(
            dimension_semantics=("parallel", "parallel")),
        cost_estimate=pl.CostEstimate(
            flops=flops, transcendentals=0, bytes_accessed=bytes_acc),
    )(*operands)

    if pool_hw is None:
        return out[:m, :n]
    return out[:, 0, :n]                                   # (n_samples, n) f32


def _conv3x3_bn_act(x_nhwc, w, scale, bias, *, relu, residual=None, pool=False):
    """3x3 conv (stride 1, pad 1) + folded BN + optional residual + ReLU.
    If pool=True the global average pool over H*W is fused into the epilogue."""
    n, h, wd, cin = x_nhwc.shape
    cout = w.shape[-1]

    x_bf = x_nhwc.astype(jnp.bfloat16)                     # cast BEFORE im2col
    xp = jnp.pad(x_bf, ((0, 0), (1, 1), (1, 1), (0, 0)))
    # im2col: layout plumbing only; all FLOPs stay inside the Pallas matmul.
    patches = jnp.concatenate(
        [xp[:, dy:dy + h, dx:dx + wd, :]
         for dy in range(3) for dx in range(3)], axis=-1)
    x2d = patches.reshape(n * h * wd, 9 * cin)

    # Fold BN scale into the weights (per output channel), keep only the bias.
    w2d = (w.reshape(9 * cin, cout) * scale[None, :]).astype(jnp.bfloat16)
    r2d = (None if residual is None
           else residual.reshape(n * h * wd, cout).astype(jnp.bfloat16))

    if pool:
        return _matmul_bn_act(x2d, w2d, bias, residual=r2d, relu=relu,
                              pool_hw=h * wd)              # (n, cout) f32
    y2d = _matmul_bn_act(x2d, w2d, bias, residual=r2d, relu=relu)
    return y2d.reshape(n, h, wd, cout)


# ---------------------------------------------------------------------------
# Fallback AdaptiveAvgPool2d((1,1)) + squeeze (only if pool fusion not legal):
# no batch padding, single grid step.
# ---------------------------------------------------------------------------
def _avgpool_kernel(x_ref, o_ref, *, inv_hw):
    o_ref[...] = (jnp.sum(x_ref[...].astype(jnp.float32), axis=1) * inv_hw
                  ).astype(o_ref.dtype)


def _global_avg_pool(feat_nhwc):
    n, h, wd, c = feat_nhwc.shape
    hw = h * wd
    x = feat_nhwc.reshape(n, hw, c)
    hw_p, c_p = _round_up(hw, 8), _round_up(c, 128)
    x_p = jnp.pad(x, ((0, 0), (0, hw_p - hw), (0, c_p - c)))
    out = pl.pallas_call(
        functools.partial(_avgpool_kernel, inv_hw=1.0 / float(hw)),
        out_shape=jax.ShapeDtypeStruct((n, c_p), jnp.float32),
        grid=(1,),
        in_specs=[pl.BlockSpec((n, hw_p, c_p), lambda i: (0, 0, 0))],
        out_specs=pl.BlockSpec((n, c_p), lambda i: (0, 0)),
        cost_estimate=pl.CostEstimate(
            flops=n * hw_p * c_p, transcendentals=0,
            bytes_accessed=2 * x_p.size + 4 * n * c_p),
    )(x_p)
    return out[:, :c]


# ---------------------------------------------------------------------------
# Model: backbone features -> avgpool(1,1) -> squeeze  (== resnet_model.forward)
# ---------------------------------------------------------------------------
@jax.jit
def _resnet_forward(params, x_nchw):
    stem, blocks = params
    x = jnp.transpose(x_nchw, (0, 2, 3, 1))           # NCHW -> NHWC (lane-dense C)
    _, h, wd, _ = x.shape
    hw = h * wd
    fuse_pool = (hw % 8 == 0) and (hw <= 2048)        # one sample per M tile fits

    w, s, b = stem
    stem_is_last = len(blocks) == 0
    hcur = _conv3x3_bn_act(x, w, s, b, relu=True,
                           pool=fuse_pool and stem_is_last)
    if stem_is_last:
        return hcur if fuse_pool else _global_avg_pool(hcur)

    for bi, (wa, sa, ba, wb, sb, bb) in enumerate(blocks):
        last = bi == len(blocks) - 1
        y = _conv3x3_bn_act(hcur, wa, sa, ba, relu=True)
        hcur = _conv3x3_bn_act(y, wb, sb, bb, relu=True, residual=hcur,
                               pool=fuse_pool and last)
    return hcur if fuse_pool else _global_avg_pool(hcur)   # (N, in_features)


class resnet_model:
    """JAX/Pallas port of the PyTorch `resnet_model`: ResNet-style feature
    extractor followed by AdaptiveAvgPool2d((1,1)) + squeeze -> (N, in_features)."""

    def __init__(self, width: int = 128, in_channels: int = 3, num_blocks: int = 2):
        # TODO(synk): the PyTorch module wraps an externally supplied *pretrained*
        # torchvision ResNet (nn.Module arg); pretrained weights cannot be loaded in
        # a self-contained script, so a small deterministic ResNet-style backbone
        # (conv3x3 + folded-BN + ReLU stem, residual basic blocks) stands in,
        # seeded to mirror torch.manual_seed(12345).
        key = jax.random.PRNGKey(12345)

        def conv_params(key, cin, cout):
            kw, ks, kb, knext = jax.random.split(key, 4)
            w = jax.random.normal(kw, (3, 3, cin, cout), jnp.float32) * (2.0 / (9 * cin)) ** 0.5
            scale = 1.0 + 0.1 * jax.random.normal(ks, (cout,), jnp.float32)  # folded BN scale
            bias = 0.1 * jax.random.normal(kb, (cout,), jnp.float32)         # folded BN bias
            return (w, scale, bias), knext

        stem, key = conv_params(key, in_channels, width)
        blocks = []
        for _ in range(num_blocks):
            (wa, sa, ba), key = conv_params(key, width, width)
            (wb, sb, bb), key = conv_params(key, width, width)
            blocks.append((wa, sa, ba, wb, sb, bb))

        self.in_features = width            # mirrors pretrained_model.fc.in_features
        self.params = (stem, tuple(blocks))

    def forward(self, x):
        return _resnet_forward(self.params, x)


# Pure-JAX f32 reference (XLA conv) used only to validate the Pallas path.
def _forward_reference(params, x_nchw):
    stem, blocks = params

    def conv(x, w, s, b, relu, res=None):
        y = jax.lax.conv_general_dilated(
            x, w, window_strides=(1, 1), padding="SAME",
            dimension_numbers=("NHWC", "HWIO", "NHWC"))
        y = y * s + b
        if res is not None:
            y = y + res
        return jnp.maximum(y, 0.0) if relu else y

    x = jnp.transpose(x_nchw, (0, 2, 3, 1))
    w, s, b = stem
    h = conv(x, w, s, b, True)
    for (wa, sa, ba, wb, sb, bb) in blocks:
        y = conv(h, wa, sa, ba, True)
        h = conv(y, wb, sb, bb, True, res=h)
    return jnp.mean(h, axis=(1, 2))


if __name__ == "__main__":
    key = jax.random.PRNGKey(0)
    # Small NCHW image batch consistent with a ResNet feature extractor.
    x = jax.random.normal(key, (2, 3, 16, 16), dtype=jnp.float32)

    model = resnet_model(width=128, in_channels=3, num_blocks=2)
    out = jax.block_until_ready(model.forward(x))

    assert out.shape == (2, model.in_features), out.shape
    assert bool(jnp.all(jnp.isfinite(out)))

    ref = _forward_reference(model.params, x)
    # bf16 MXU inputs -> slightly looser tolerance than the all-f32 reference.
    assert bool(jnp.allclose(out, ref, rtol=1e-1, atol=5e-2)), \
        float(jnp.max(jnp.abs(out - ref)))

    print("KERNEL_OK")
</pallas_src>

<mosaic_0001>
module attributes {stable_mosaic.version = 11 : i64} {
  func.func @kernel(%arg0: i32, %arg1: i32, %arg2: memref<256x128xbf16, #tpu.memory_space<vmem>>, %arg3: memref<128x128xbf16, #tpu.memory_space<vmem>>, %arg4: memref<1x128xf32, #tpu.memory_space<vmem>>, %arg5: memref<256x128xbf16, #tpu.memory_space<vmem>>) attributes {dimension_semantics = [#tpu.dimension_semantics<parallel>, #tpu.dimension_semantics<parallel>], iteration_bounds = array<i64: 2, 1>, scalar_prefetch = 0 : i64, scratch_operands = 0 : i64, tpu.core_type = #tpu.core_type<tc>, window_params = [{transform_indices = @transform_0, window_bounds = array<i64: 256, 128>}, {transform_indices = @transform_1, window_bounds = array<i64: 128, 128>}, {transform_indices = @transform_2, window_bounds = array<i64: 1, 128>}, {transform_indices = @transform_3, window_bounds = array<i64: 256, 128>}]} {
    %c0 = arith.constant 0 : index
    %c0_0 = arith.constant 0 : index
    %0 = vector.load %arg2[%c0, %c0_0] : memref<256x128xbf16, #tpu.memory_space<vmem>>, vector<256x128xbf16>
    %c0_1 = arith.constant 0 : index
    %c0_2 = arith.constant 0 : index
    %1 = vector.load %arg3[%c0_1, %c0_2] : memref<128x128xbf16, #tpu.memory_space<vmem>>, vector<128x128xbf16>
    %cst = arith.constant dense<0.000000e+00> : vector<256x128xf32>
    %2 = tpu.matmul %0, %1, %cst {dimension_numbers = #tpu.dot_dimension_numbers<[1], [0], [0], [1], [0, 0, 1, 1], [], []>} : vector<256x128xbf16>, vector<128x128xbf16>, vector<256x128xf32> -> vector<256x128xf32>
    %c0_3 = arith.constant 0 : index
    %c0_4 = arith.constant 0 : index
    %3 = vector.load %arg4[%c0_3, %c0_4] : memref<1x128xf32, #tpu.memory_space<vmem>>, vector<1x128xf32>
    %4 = vector.broadcast %3 : vector<1x128xf32> to vector<256x128xf32>
    %5 = arith.addf %2, %4 : vector<256x128xf32>
    %cst_5 = arith.constant 0.000000e+00 : f32
    %6 = vector.broadcast %cst_5 : f32 to vector<256x128xf32>
    %7 = arith.maximumf %5, %6 : vector<256x128xf32>
    %8 = arith.truncf %7 : vector<256x128xf32> to vector<256x128xbf16>
    %c0_6 = arith.constant 0 : index
    %c0_7 = arith.constant 0 : index
    %9 = vector.load %arg5[%c0_6, %c0_7] : memref<256x128xbf16, #tpu.memory_space<vmem>>, vector<256x128xbf16>
    tpu.vector_store %arg5[%c0_6, %c0_7], %8 {strides = array<i32>} : memref<256x128xbf16, #tpu.memory_space<vmem>>, vector<256x128xbf16>,
    return
  }
  func.func @transform_0(%arg0: i32, %arg1: i32) -> (i32, i32) {
    %c0_i32 = arith.constant 0 : i32
    %c0_i32_0 = arith.constant 0 : i32
    return %arg0, %c0_i32 : i32, i32
  }
  func.func @transform_1(%arg0: i32, %arg1: i32) -> (i32, i32) {
    %c0_i32 = arith.constant 0 : i32
    %c0_i32_0 = arith.constant 0 : i32
    return %c0_i32, %arg1 : i32, i32
  }
  func.func @transform_2(%arg0: i32, %arg1: i32) -> (i32, i32) {
    %c0_i32 = arith.constant 0 : i32
    %c0_i32_0 = arith.constant 0 : i32
    return %c0_i32, %arg1 : i32, i32
  }
  func.func @transform_3(%arg0: i32, %arg1: i32) -> (i32, i32) {
    %c0_i32 = arith.constant 0 : i32
    return %arg0, %arg1 : i32, i32
  }
}

module attributes {stable_mosaic.version = 11 : i64} {
  func.func @kernel(%arg0: i32, %arg1: i32, %arg2: memref<256x1152xbf16, #tpu.memory_space<vmem>>, %arg3: memref<1152x128xbf16, #tpu.memory_space<vmem>>, %arg4: memref<1x128xf32, #tpu.memory_space<vmem>>, %arg5: memref<256x128xbf16, #tpu.memory_space<vmem>>) attributes {dimension_semantics = [#tpu.dimension_semantics<parallel>, #tpu.dimension_semantics<parallel>], iteration_bounds = array<i64: 2, 1>, scalar_prefetch = 0 : i64, scratch_operands = 0 : i64, tpu.core_type = #tpu.core_type<tc>, window_params = [{transform_indices = @transform_0, window_bounds = array<i64: 256, 1152>}, {transform_indices = @transform_1, window_bounds = array<i64: 1152, 128>}, {transform_indices = @transform_2, window_bounds = array<i64: 1, 128>}, {transform_indices = @transform_3, window_bounds = array<i64: 256, 128>}]} {
    %c0 = arith.constant 0 : index
    %c0_0 = arith.constant 0 : index
    %0 = vector.load %arg2[%c0, %c0_0] : memref<256x1152xbf16, #tpu.memory_space<vmem>>, vector<256x1152xbf16>
    %c0_1 = arith.constant 0 : index
    %c0_2 = arith.constant 0 : index
    %1 = vector.load %arg3[%c0_1, %c0_2] : memref<1152x128xbf16, #tpu.memory_space<vmem>>, vector<1152x128xbf16>
    %cst = arith.constant dense<0.000000e+00> : vector<256x128xf32>
    %2 = tpu.matmul %0, %1, %cst {dimension_numbers = #tpu.dot_dimension_numbers<[1], [0], [0], [1], [0, 0, 1, 1], [], []>} : vector<256x1152xbf16>, vector<1152x128xbf16>, vector<256x128xf32> -> vector<256x128xf32>
    %c0_3 = arith.constant 0 : index
    %c0_4 = arith.constant 0 : index
    %3 = vector.load %arg4[%c0_3, %c0_4] : memref<1x128xf32, #tpu.memory_space<vmem>>, vector<1x128xf32>
    %4 = vector.broadcast %3 : vector<1x128xf32> to vector<256x128xf32>
    %5 = arith.addf %2, %4 : vector<256x128xf32>
    %cst_5 = arith.constant 0.000000e+00 : f32
    %6 = vector.broadcast %cst_5 : f32 to vector<256x128xf32>
    %7 = arith.maximumf %5, %6 : vector<256x128xf32>
    %8 = arith.truncf %7 : vector<256x128xf32> to vector<256x128xbf16>
    %c0_6 = arith.constant 0 : index
    %c0_7 = arith.constant 0 : index
    %9 = vector.load %arg5[%c0_6, %c0_7] : memref<256x128xbf16, #tpu.memory_space<vmem>>, vector<256x128xbf16>
    tpu.vector_store %arg5[%c0_6, %c0_7], %8 {strides = array<i32>} : memref<256x128xbf16, #tpu.memory_space<vmem>>, vector<256x128xbf16>,
    return
  }
  func.func @transform_0(%arg0: i32, %arg1: i32) -> (i32, i32) {
    %c0_i32 = arith.constant 0 : i32
    %c0_i32_0 = arith.constant 0 : i32
    return %arg0, %c0_i32 : i32, i32
  }
  func.func @transform_1(%arg0: i32, %arg1: i32) -> (i32, i32) {
    %c0_i32 = arith.constant 0 : i32
    %c0_i32_0 = arith.constant 0 : i32
    return %c0_i32, %arg1 : i32, i32
  }
  func.func @transform_2(%arg0: i32, %arg1: i32) -> (i32, i32) {
    %c0_i32 = arith.constant 0 : i32
    %c0_i32_0 = arith.constant 0 : i32
    return %c0_i32, %arg1 : i32, i32
  }
  func.func @transform_3(%arg0: i32, %arg1: i32) -> (i32, i32) {
    %c0_i32 = arith.constant 0 : i32
    return %arg0, %arg1 : i32, i32
  }
}

module attributes {stable_mosaic.version = 11 : i64} {
  func.func @kernel(%arg0: i32, %arg1: i32, %arg2: memref<256x1152xbf16, #tpu.memory_space<vmem>>, %arg3: memref<1152x128xbf16, #tpu.memory_space<vmem>>, %arg4: memref<1x128xf32, #tpu.memory_space<vmem>>, %arg5: memref<256x128xbf16, #tpu.memory_space<vmem>>, %arg6: memref<256x128xbf16, #tpu.memory_space<vmem>>) attributes {dimension_semantics = [#tpu.dimension_semantics<parallel>, #tpu.dimension_semantics<parallel>], iteration_bounds = array<i64: 2, 1>, scalar_prefetch = 0 : i64, scratch_operands = 0 : i64, tpu.core_type = #tpu.core_type<tc>, window_params = [{transform_indices = @transform_0, window_bounds = array<i64: 256, 1152>}, {transform_indices = @transform_1, window_bounds = array<i64: 1152, 128>}, {transform_indices = @transform_2, window_bounds = array<i64: 1, 128>}, {transform_indices = @transform_3, window_bounds = array<i64: 256, 128>}, {transform_indices = @transform_4, window_bounds = array<i64: 256, 128>}]} {
    %c0 = arith.constant 0 : index
    %c0_0 = arith.constant 0 : index
    %0 = vector.load %arg2[%c0, %c0_0] : memref<256x1152xbf16, #tpu.memory_space<vmem>>, vector<256x1152xbf16>
    %c0_1 = arith.constant 0 : index
    %c0_2 = arith.constant 0 : index
    %1 = vector.load %arg3[%c0_1, %c0_2] : memref<1152x128xbf16, #tpu.memory_space<vmem>>, vector<1152x128xbf16>
    %cst = arith.constant dense<0.000000e+00> : vector<256x128xf32>
    %2 = tpu.matmul %0, %1, %cst {dimension_numbers = #tpu.dot_dimension_numbers<[1], [0], [0], [1], [0, 0, 1, 1], [], []>} : vector<256x1152xbf16>, vector<1152x128xbf16>, vector<256x128xf32> -> vector<256x128xf32>
    %c0_3 = arith.constant 0 : index
    %c0_4 = arith.constant 0 : index
    %3 = vector.load %arg4[%c0_3, %c0_4] : memref<1x128xf32, #tpu.memory_space<vmem>>, vector<1x128xf32>
    %4 = vector.broadcast %3 : vector<1x128xf32> to vector<256x128xf32>
    %5 = arith.addf %2, %4 : vector<256x128xf32>
    %c0_5 = arith.constant 0 : index
    %c0_6 = arith.constant 0 : index
    %6 = vector.load %arg5[%c0_5, %c0_6] : memref<256x128xbf16, #tpu.memory_space<vmem>>, vector<256x128xbf16>
    %7 = arith.extf %6 : vector<256x128xbf16> to vector<256x128xf32>
    %8 = arith.addf %5, %7 : vector<256x128xf32>
    %cst_7 = arith.constant 0.000000e+00 : f32
    %9 = vector.broadcast %cst_7 : f32 to vector<256x128xf32>
    %10 = arith.maximumf %8, %9 : vector<256x128xf32>
    %11 = arith.truncf %10 : vector<256x128xf32> to vector<256x128xbf16>
    %c0_8 = arith.constant 0 : index
    %c0_9 = arith.constant 0 : index
    %12 = vector.load %arg6[%c0_8, %c0_9] : memref<256x128xbf16, #tpu.memory_space<vmem>>, vector<256x128xbf16>
    tpu.vector_store %arg6[%c0_8, %c0_9], %11 {strides = array<i32>} : memref<256x128xbf16, #tpu.memory_space<vmem>>, vector<256x128xbf16>,
    return
  }
  func.func @transform_0(%arg0: i32, %arg1: i32) -> (i32, i32) {
    %c0_i32 = arith.constant 0 : i32
    %c0_i32_0 = arith.constant 0 : i32
    return %arg0, %c0_i32 : i32, i32
  }
  func.func @transform_1(%arg0: i32, %arg1: i32) -> (i32, i32) {
    %c0_i32 = arith.constant 0 : i32
    %c0_i32_0 = arith.constant 0 : i32
    return %c0_i32, %arg1 : i32, i32
  }
  func.func @transform_2(%arg0: i32, %arg1: i32) -> (i32, i32) {
    %c0_i32 = arith.constant 0 : i32
    %c0_i32_0 = arith.constant 0 : i32
    return %c0_i32, %arg1 : i32, i32
  }
  func.func @transform_3(%arg0: i32, %arg1: i32) -> (i32, i32) {
    %c0_i32 = arith.constant 0 : i32
    return %arg0, %arg1 : i32, i32
  }
  func.func @transform_4(%arg0: i32, %arg1: i32) -> (i32, i32) {
    %c0_i32 = arith.constant 0 : i32
    return %arg0, %arg1 : i32, i32
  }
}

module attributes {stable_mosaic.version = 11 : i64} {
  func.func @kernel(%arg0: i32, %arg1: i32, %arg2: memref<256x1152xbf16, #tpu.memory_space<vmem>>, %arg3: memref<1152x128xbf16, #tpu.memory_space<vmem>>, %arg4: memref<1x128xf32, #tpu.memory_space<vmem>>, %arg5: memref<256x128xbf16, #tpu.memory_space<vmem>>, %arg6: memref<1x8x128xf32, #tpu.memory_space<vmem>>) attributes {dimension_semantics = [#tpu.dimension_semantics<parallel>, #tpu.dimension_semantics<parallel>], iteration_bounds = array<i64: 2, 1>, scalar_prefetch = 0 : i64, scratch_operands = 0 : i64, tpu.core_type = #tpu.core_type<tc>, window_params = [{transform_indices = @transform_0, window_bounds = array<i64: 256, 1152>}, {transform_indices = @transform_1, window_bounds = array<i64: 1152, 128>}, {transform_indices = @transform_2, window_bounds = array<i64: 1, 128>}, {transform_indices = @transform_3, window_bounds = array<i64: 256, 128>}, {transform_indices = @transform_4, window_bounds = array<i64: 1, 8, 128>}]} {
    %c0 = arith.constant 0 : index
    %c0_0 = arith.constant 0 : index
    %0 = vector.load %arg2[%c0, %c0_0] : memref<256x1152xbf16, #tpu.memory_space<vmem>>, vector<256x1152xbf16>
    %c0_1 = arith.constant 0 : index
    %c0_2 = arith.constant 0 : index
    %1 = vector.load %arg3[%c0_1, %c0_2] : memref<1152x128xbf16, #tpu.memory_space<vmem>>, vector<1152x128xbf16>
    %cst = arith.constant dense<0.000000e+00> : vector<256x128xf32>
    %2 = tpu.matmul %0, %1, %cst {dimension_numbers = #tpu.dot_dimension_numbers<[1], [0], [0], [1], [0, 0, 1, 1], [], []>} : vector<256x1152xbf16>, vector<1152x128xbf16>, vector<256x128xf32> -> vector<256x128xf32>
    %c0_3 = arith.constant 0 : index
    %c0_4 = arith.constant 0 : index
    %3 = vector.load %arg4[%c0_3, %c0_4] : memref<1x128xf32, #tpu.memory_space<vmem>>, vector<1x128xf32>
    %4 = vector.broadcast %3 : vector<1x128xf32> to vector<256x128xf32>
    %5 = arith.addf %2, %4 : vector<256x128xf32>
    %c0_5 = arith.constant 0 : index
    %c0_6 = arith.constant 0 : index
    %6 = vector.load %arg5[%c0_5, %c0_6] : memref<256x128xbf16, #tpu.memory_space<vmem>>, vector<256x128xbf16>
    %7 = arith.extf %6 : vector<256x128xbf16> to vector<256x128xf32>
    %8 = arith.addf %5, %7 : vector<256x128xf32>
    %cst_7 = arith.constant 0.000000e+00 : f32
    %9 = vector.broadcast %cst_7 : f32 to vector<256x128xf32>
    %10 = arith.maximumf %8, %9 : vector<256x128xf32>
    %cst_8 = arith.constant dense<0.000000e+00> : vector<128xf32>
    %11 = vector.multi_reduction <add>, %10, %cst_8 [0] : vector<256x128xf32> to vector<128xf32>
    %12 = vector.shape_cast %11 : vector<128xf32> to vector<1x128xf32>
    %cst_9 = arith.constant 3.906250e-03 : f32
    %13 = vector.broadcast %cst_9 : f32 to vector<1x128xf32>
    %14 = arith.mulf %12, %13 : vector<1x128xf32>
    %15 = vector.shape_cast %14 : vector<1x128xf32> to vector<1x1x128xf32>
    %16 = vector.broadcast %15 : vector<1x1x128xf32> to vector<1x8x128xf32>
    %c0_10 = arith.constant 0 : index
    %c0_11 = arith.constant 0 : index
    %c0_12 = arith.constant 0 : index
    %17 = vector.load %arg6[%c0_10, %c0_11, %c0_12] : memref<1x8x128xf32, #tpu.memory_space<vmem>>, vector<1x8x128xf32>
    tpu.vector_store %arg6[%c0_10, %c0_11, %c0_12], %16 {strides = array<i32>} : memref<1x8x128xf32, #tpu.memory_space<vmem>>, vector<1x8x128xf32>,
    return
  }
  func.func @transform_0(%arg0: i32, %arg1: i32) -> (i32, i32) {
    %c0_i32 = arith.constant 0 : i32
    %c0_i32_0 = arith.constant 0 : i32
    return %arg0, %c0_i32 : i32, i32
  }
  func.func @transform_1(%arg0: i32, %arg1: i32) -> (i32, i32) {
    %c0_i32 = arith.constant 0 : i32
    %c0_i32_0 = arith.constant 0 : i32
    return %c0_i32, %arg1 : i32, i32
  }
  func.func @transform_2(%arg0: i32, %arg1: i32) -> (i32, i32) {
    %c0_i32 = arith.constant 0 : i32
    %c0_i32_0 = arith.constant 0 : i32
    return %c0_i32, %arg1 : i32, i32
  }
  func.func @transform_3(%arg0: i32, %arg1: i32) -> (i32, i32) {
    %c0_i32 = arith.constant 0 : i32
    return %arg0, %arg1 : i32, i32
  }
  func.func @transform_4(%arg0: i32, %arg1: i32) -> (i32, i32, i32) {
    %c0_i32 = arith.constant 0 : i32
    %c0_i32_0 = arith.constant 0 : i32
    return %arg0, %c0_i32, %arg1 : i32, i32, i32
  }
}

</mosaic_0001>

<bundles_post_ra>
// kernel: _resnet_forward.5
= control target key start
LH: loop header
LB: loop body
LE: loop exit
PB: predicated region body
PF: predicated region fallthrough
CT: control target
= control target key end

     0   :  { %s1257_s12 = smov 0   ;;  %s1259_s13 = smov 0   ;;  %s1394_s0 = inlined_call_operand.vmem [shape: bf16[512,128], index: 0, kind: input, shape index: {}]   ;;  %s1395_s1 = inlined_call_operand.vmem [shape: bf16[128,128], index: 1, kind: input, shape index: {}]   ;;  %s1396_s2 = inlined_call_operand.vmem [shape: f32[1,128], index: 2, kind: input, shape index: {}]   ;;  %s1397_s3 = inlined_call_operand.vmem [shape: bf16[512,128], index: 3, kind: output, shape index: {}]  }
   0x1   :  { %s1261_s14 = smov 0  }
   0x2 LB: > { %s25_s15 = sadd.s32 1, %s1231_s13  ;;  %p886_p0 = scmp.ge.s32.totalorder %s1235_s14, 1  ;;  %s1235_s14 = sphi %s1261_s14, %s13_s14   ;;  %s1231_s13 = sphi %s1259_s13, %s1399_s13   ;;  %s1227_s12 = sphi %s1257_s12, %s1398_s12  }
   0x3   : > { %p27_p1 = scmp.ge.s32.totalorder %s25_s15, 2  ;;  %p169_p2 = scmp.lt.s32.totalorder %s1235_s14, 3 }
   0x5   : > { %s1401_s15 = smov (%p27_p1, %s25_s15), 0  ;;  %p170_p3 = pnand %p886_p0, %p169_p2 }
   0x6   : > { %v1189_v0 = vld [vmem:[%s1395_s1] sm:$0xff] (!%p170_p3)   ;;  %s887_s18 = sshll.u32 (!%p170_p3), %s1227_s12, 5  ;;  %v1190_v1 = vld [vmem:[%s1395_s1 + $0x8] sm:$0xff] (!%p170_p3)   ;;  %v1191_v2 = vld [vmem:[%s1395_s1 + $0x10] sm:$0xff] (!%p170_p3)  }
   0x7   : > { %173 = sbr.rel (%p170_p3) target bundleno = 285 (0x11d), region = 32  ;;  %p204_p4 = scmp.lt.s32.totalorder (!%p170_p3), %s887_s18, 63  ;;  %1101 = vmatprep.subr.bf16.mxu0 (!%p170_p3), %v1189_v0  ;;  %1149 = vmatprep.subr.bf16.mxu1 (!%p170_p3), %v1189_v0  ;;  %v1192_v3 = vld [vmem:[%s1395_s1 + $0x18] sm:$0xff] (!%p170_p3)   ;;  %v1193_v6 = vld [vmem:[%s1395_s1 + $0x20] sm:$0xff] (!%p170_p3)   ;;  %v1194_v7 = vld [vmem:[%s1395_s1 + $0x28] sm:$0xff] (!%p170_p3)  }
   0x8   : > { %1102 = vmatpush3.bf16.msra.mxu0 (!%p170_p3), %v1189_v0  ;;  %1157 = vmatpush3.bf16.msra.mxu1 (!%p170_p3), %v1189_v0  ;;  %v1195_v8 = vld [vmem:[%s1395_s1 + $0x30] sm:$0xff] (!%p170_p3)   ;;  %v1196_v9 = vld [vmem:[%s1395_s1 + $0x38] sm:$0xff] (!%p170_p3)   ;;  %v1328_v24 = vld [vmem:[%s1396_s2] ss:$0 sm:$0xff] (!%p170_p3) }
   0x9   : > { %1103 = vmatprep.subr.bf16.mxu0 (!%p170_p3), %v1190_v1  ;;  %1150 = vmatprep.subr.bf16.mxu1 (!%p170_p3), %v1190_v1 }
   0xc   : > { %1104 = vmatpush3.bf16.msra.mxu0 (!%p170_p3), %v1190_v1  ;;  %1158 = vmatpush3.bf16.msra.mxu1 (!%p170_p3), %v1190_v1 }
   0xd   : > { %1105 = vmatprep.subr.bf16.mxu0 (!%p170_p3), %v1191_v2  ;;  %1151 = vmatprep.subr.bf16.mxu1 (!%p170_p3), %v1191_v2 }
   0xe   : > { %s1403_s18 = smov (!%p204_p4, %s887_s18), 63 }
   0xf   : > { %s888_s23 = sshll.u32 %s1403_s18, 2 }
  0x10   : > { %s1292_s26 = scalar_lea.vmem %s1394_s0, %s888_s23  ;;  %1106 = vmatpush3.bf16.msra.mxu0 %v1191_v2  ;;  %1159 = vmatpush3.bf16.msra.mxu1 %v1191_v2  ;;  %s1343_s17 = scalar_lea.vmem %s1397_s3, %s888_s23 }
  0x11   : > { %v1197_v4 = vld [vmem:[%s1292_s26] sm:$0xff]   ;;  %1107 = vmatprep.subr.bf16.mxu0 %v1192_v3  ;;  %1152 = vmatprep.subr.bf16.mxu1 %v1192_v3  ;;  %v1199_v10 = vld [vmem:[%s1292_s26 + $0x8] sm:$0xff]   ;;  %v1201_v12 = vld [vmem:[%s1292_s26 + $0x10] sm:$0xff]  }
  0x12   : > { %v1198_v5 = vld [vmem:[%s1292_s26 + $0x40] sm:$0xff]   ;;  %1117 = vmatprep.mubr.bf16.mxu0 %v1197_v4  ;;  %v1200_v11 = vld [vmem:[%s1292_s26 + $0x48] sm:$0xff]   ;;  %v1202_v13 = vld [vmem:[%s1292_s26 + $0x50] sm:$0xff]  }
  0x13   : > { %1133 = vmatprep.mubr.bf16.mxu1 %v1198_v5  ;;  %v1203_v14 = vld [vmem:[%s1292_s26 + $0x18] sm:$0xff]   ;;  %v1205_v16 = vld [vmem:[%s1292_s26 + $0x20] sm:$0xff]   ;;  %v1207_v18 = vld [vmem:[%s1292_s26 + $0x28] sm:$0xff]  }
  0x14   : > { %1108 = vmatpush3.bf16.msra.mxu0 %v1192_v3  ;;  %1160 = vmatpush3.bf16.msra.mxu1 %v1192_v3  ;;  %v1204_v15 = vld [vmem:[%s1292_s26 + $0x58] sm:$0xff]   ;;  %v1206_v17 = vld [vmem:[%s1292_s26 + $0x60] sm:$0xff]   ;;  %v1208_v19 = vld [vmem:[%s1292_s26 + $0x68] sm:$0xff]  }
  0x15   : > { %1109 = vmatprep.subr.bf16.mxu0 %v1193_v6  ;;  %1153 = vmatprep.subr.bf16.mxu1 %v1193_v6  ;;  %v1209_v20 = vld [vmem:[%s1292_s26 + $0x30] sm:$0xff]   ;;  %v1211_v22 = vld [vmem:[%s1292_s26 + $0x38] sm:$0xff]  }
  0x16   : > { %v1210_v21 = vld [vmem:[%s1292_s26 + $0x70] sm:$0xff]   ;;  %v1212_v23 = vld [vmem:[%s1292_s26 + $0x78] sm:$0xff]  }
  0x18   : > { %1110 = vmatpush3.bf16.msra.mxu0 %v1193_v6  ;;  %1161 = vmatpush3.bf16.msra.mxu1 %v1193_v6 }
  0x19   : > { %1111 = vmatprep.subr.bf16.mxu0 %v1194_v7  ;;  %1154 = vmatprep.subr.bf16.mxu1 %v1194_v7 }
  0x1c   : > { %1112 = vmatpush3.bf16.msra.mxu0 %v1194_v7  ;;  %1162 = vmatpush3.bf16.msra.mxu1 %v1194_v7 }
  0x1d   : > { %1113 = vmatprep.subr.bf16.mxu0 %v1195_v8  ;;  %1155 = vmatprep.subr.bf16.mxu1 %v1195_v8 }
  0x20   : > { %1114 = vmatpush3.bf16.msra.mxu0 %v1195_v8  ;;  %1163 = vmatpush3.bf16.msra.mxu1 %v1195_v8 }
  0x21   : > { %1115 = vmatprep.subr.bf16.mxu0 %v1196_v9  ;;  %1156 = vmatprep.subr.bf16.mxu1 %v1196_v9 }
  0x24   : > { %1116 = vmatpush3.bf16.msra.mxu0 %v1196_v9  ;;  %1164 = vmatpush3.bf16.msra.mxu1 %v1196_v9 }
  0x27   : > { %1118 = vmatmul.mubr.bf16.vlgmr.msra.gmra.mrb[0].mxu0 %v1199_v10  ;;  %1134 = vmatmul.mubr.bf16.vlgmr.msra.gmra.mrb[0].mxu1 %v1200_v11 }
  0x28   : > { %1121 = vmatprep.mubr.bf16.mxu0 %v1201_v12  ;;  %1137 = vmatprep.mubr.bf16.mxu1 %v1202_v13 }
  0x2f   : > { %1122 = vmatmul.mubr.bf16.gmra.mrb[4].mxu0 %v1203_v14  ;;  %1138 = vmatmul.mubr.bf16.gmra.mrb[4].mxu1 %v1204_v15 }
  0x30   : > { %1125 = vmatprep.mubr.bf16.mxu0 %v1205_v16  ;;  %1141 = vmatprep.mubr.bf16.mxu1 %v1206_v17 }
  0x37   : > { %1126 = vmatmul.mubr.bf16.gmra.mrb[8].mxu0 %v1207_v18  ;;  %1142 = vmatmul.mubr.bf16.gmra.mrb[8].mxu1 %v1208_v19 }
  0x38   : > { %1129 = vmatprep.mubr.bf16.mxu0 %v1209_v20  ;;  %1145 = vmatprep.mubr.bf16.mxu1 %v1210_v21 }
  0x3f   : > { %1130 = vmatmul.mubr.bf16.gmra.mrb[12].mxu0 %v1211_v22  ;;  %1146 = vmatmul.mubr.bf16.gmra.mrb[12].mxu1 %v1212_v23 }
  0xfa   : > { %v1119_v25 = vpop.f32.mrb[0].mxu0  ;;  %v1135_v26 = vpop.f32.mrb[0].mxu1 }
  0xfb   : > { %v468_v27 = vadd.f32 %v1119_v25, %v1328_v24  ;;  %v532_v28 = vadd.f32 %v1135_v26, %v1328_v24  ;;  %v459_v29 = vpop.f32.mrb[1].mxu0  ;;  %v523_v30 = vpop.f32.mrb[1].mxu1 }
  0xfc   : > { %v460_v31 = vadd.f32 %v1328_v24, %v459_v29  ;;  %v524_v32 = vadd.f32 %v1328_v24, %v523_v30  ;;  %v1120_v33 = vpop.f32.mrb[2].mxu0  ;;  %v1136_v34 = vpop.f32.mrb[2].mxu1 }
  0xfd   : > { %v471_v35 = vadd.f32 %v1120_v33, %v1328_v24  ;;  %v535_v36 = vadd.f32 %v1136_v34, %v1328_v24  ;;  %v462_v37 = vpop.f32.mrb[3].mxu0  ;;  %v526_v38 = vpop.f32.mrb[3].mxu1  ;;  %v588_v41 = vmax.f32 %v468_v27, 0.0  ;;  %v604_v42 = vmax.f32 %v532_v28, 0.0 }
  0xfe   : > { %v463_v39 = vadd.f32 %v1328_v24, %v462_v37  ;;  %v527_v40 = vadd.f32 %v1328_v24, %v526_v38  ;;  %v586_v45 = vmax.f32 %v460_v31, 0.0  ;;  %v602_v46 = vmax.f32 %v524_v32, 0.0 }
  0xff   : > { %v589_v43 = vmax.f32 %v471_v35, 0.0  ;;  %v605_v44 = vmax.f32 %v535_v36, 0.0 }
 0x100   : > { %v587_v47 = vmax.f32 %v463_v39, 0.0  ;;  %v603_v48 = vmax.f32 %v527_v40, 0.0 }
 0x101   : > { %v990_v49 = vpack.c.bf16 %v589_v43, %v588_v41  ;;  %v1030_v50 = vpack.c.bf16 %v605_v44, %v604_v42 }
 0x102   : > { %v985_v51 = vpack.c.bf16 %v587_v47, %v586_v45  ;;  %v1025_v52 = vpack.c.bf16 %v603_v48, %v602_v46  ;;  %v1123_v53 = vpop.f32.mrb[4].mxu0  ;;  %v1139_v54 = vpop.f32.mrb[4].mxu1 }
 0x103   : > { %1062 = vst [vmem:[%s1343_s17 + $0x8] sm:$0xff] %v990_v49   ;;  %1070 = vst [vmem:[%s1343_s17 + $0x48] sm:$0xff] %v1030_v50   ;;  %v484_v55 = vadd.f32 %v1123_v53, %v1328_v24  ;;  %v548_v56 = vadd.f32 %v1139_v54, %v1328_v24  ;;  %v475_v57 = vpop.f32.mrb[5].mxu0  ;;  %v539_v58 = vpop.f32.mrb[5].mxu1 }
 0x104   : > { %986 = vst [vmem:[%s1343_s17] sm:$0xff] %v985_v51   ;;  %1069 = vst [vmem:[%s1343_s17 + $0x40] sm:$0xff] %v1025_v52   ;;  %v476_v59 = vadd.f32 %v1328_v24, %v475_v57  ;;  %v540_v60 = vadd.f32 %v1328_v24, %v539_v58  ;;  %v1124_v61 = vpop.f32.mrb[6].mxu0  ;;  %v1140_v62 = vpop.f32.mrb[6].mxu1 }
 0x105   : > { %v487_v63 = vadd.f32 %v1124_v61, %v1328_v24  ;;  %v551_v0 = vadd.f32 %v1140_v62, %v1328_v24  ;;  %v478_v1 = vpop.f32.mrb[7].mxu0  ;;  %v542_v2 = vpop.f32.mrb[7].mxu1  ;;  %v592_v5 = vmax.f32 %v484_v55, 0.0  ;;  %v608_v6 = vmax.f32 %v548_v56, 0.0 }
 0x106   : > { %v479_v3 = vadd.f32 %v1328_v24, %v478_v1  ;;  %v543_v4 = vadd.f32 %v1328_v24, %v542_v2  ;;  %v590_v9 = vmax.f32 %v476_v59, 0.0  ;;  %v606_v10 = vmax.f32 %v540_v60, 0.0 }
 0x107   : > { %v593_v7 = vmax.f32 %v487_v63, 0.0  ;;  %v609_v8 = vmax.f32 %v551_v0, 0.0 }
 0x108   : > { %v591_v11 = vmax.f32 %v479_v3, 0.0  ;;  %v607_v12 = vmax.f32 %v543_v4, 0.0 }
 0x109   : > { %v1000_v13 = vpack.c.bf16 %v593_v7, %v592_v5  ;;  %v1040_v14 = vpack.c.bf16 %v609_v8, %v608_v6 }
 0x10a   : > { %v995_v15 = vpack.c.bf16 %v591_v11, %v590_v9  ;;  %v1035_v16 = vpack.c.bf16 %v607_v12, %v606_v10  ;;  %v1127_v17 = vpop.f32.mrb[8].mxu0  ;;  %v1143_v18 = vpop.f32.mrb[8].mxu1 }
 0x10b   : > { %1064 = vst [vmem:[%s1343_s17 + $0x18] sm:$0xff] %v1000_v13   ;;  %1072 = vst [vmem:[%s1343_s17 + $0x58] sm:$0xff] %v1040_v14   ;;  %v500_v19 = vadd.f32 %v1127_v17, %v1328_v24  ;;  %v564_v20 = vadd.f32 %v1143_v18, %v1328_v24  ;;  %v491_v21 = vpop.f32.mrb[9].mxu0  ;;  %v555_v22 = vpop.f32.mrb[9].mxu1 }
 0x10c   : > { %1063 = vst [vmem:[%s1343_s17 + $0x10] sm:$0xff] %v995_v15   ;;  %1071 = vst [vmem:[%s1343_s17 + $0x50] sm:$0xff] %v1035_v16   ;;  %v492_v23 = vadd.f32 %v1328_v24, %v491_v21  ;;  %v556_v25 = vadd.f32 %v1328_v24, %v555_v22  ;;  %v1128_v26 = vpop.f32.mrb[10].mxu0  ;;  %v1144_v27 = vpop.f32.mrb[10].mxu1 }
 0x10d   : > { %v503_v28 = vadd.f32 %v1128_v26, %v1328_v24  ;;  %v567_v29 = vadd.f32 %v1144_v27, %v1328_v24  ;;  %v494_v30 = vpop.f32.mrb[11].mxu0  ;;  %v558_v31 = vpop.f32.mrb[11].mxu1  ;;  %v596_v34 = vmax.f32 %v500_v19, 0.0  ;;  %v612_v35 = vmax.f32 %v564_v20, 0.0 }
 0x10e   : > { %v495_v32 = vadd.f32 %v1328_v24, %v494_v30  ;;  %v559_v33 = vadd.f32 %v1328_v24, %v558_v31  ;;  %v594_v38 = vmax.f32 %v492_v23, 0.0  ;;  %v610_v39 = vmax.f32 %v556_v25, 0.0 }
 0x10f   : > { %v597_v36 = vmax.f32 %v503_v28, 0.0  ;;  %v613_v37 = vmax.f32 %v567_v29, 0.0 }
 0x110   : > { %v595_v40 = vmax.f32 %v495_v32, 0.0  ;;  %v611_v41 = vmax.f32 %v559_v33, 0.0 }
 0x111   : > { %v1010_v42 = vpack.c.bf16 %v597_v36, %v596_v34  ;;  %v1050_v43 = vpack.c.bf16 %v613_v37, %v612_v35 }
 0x112   : > { %v1005_v44 = vpack.c.bf16 %v595_v40, %v594_v38  ;;  %v1045_v45 = vpack.c.bf16 %v611_v41, %v610_v39  ;;  %v1131_v46 = vpop.f32.mrb[12].mxu0  ;;  %v1147_v47 = vpop.f32.mrb[12].mxu1 }
 0x113   : > { %1066 = vst [vmem:[%s1343_s17 + $0x28] sm:$0xff] %v1010_v42   ;;  %1074 = vst [vmem:[%s1343_s17 + $0x68] sm:$0xff] %v1050_v43   ;;  %v516_v48 = vadd.f32 %v1131_v46, %v1328_v24  ;;  %v580_v49 = vadd.f32 %v1147_v47, %v1328_v24  ;;  %v507_v50 = vpop.f32.mrb[13].mxu0  ;;  %v571_v51 = vpop.f32.mrb[13].mxu1 }
 0x114   : > { %1065 = vst [vmem:[%s1343_s17 + $0x20] sm:$0xff] %v1005_v44   ;;  %1073 = vst [vmem:[%s1343_s17 + $0x60] sm:$0xff] %v1045_v45   ;;  %v508_v52 = vadd.f32 %v1328_v24, %v507_v50  ;;  %v572_v53 = vadd.f32 %v1328_v24, %v571_v51  ;;  %v1132_v54 = vpop.f32.mrb[14].mxu0  ;;  %v1148_v55 = vpop.f32.mrb[14].mxu1 }
 0x115   : > { %v519_v56 = vadd.f32 %v1132_v54, %v1328_v24  ;;  %v583_v57 = vadd.f32 %v1148_v55, %v1328_v24  ;;  %v510_v58 = vpop.f32.mrb[15].mxu0  ;;  %v574_v59 = vpop.f32.mrb[15].mxu1  ;;  %v600_v62 = vmax.f32 %v516_v48, 0.0  ;;  %v616_v63 = vmax.f32 %v580_v49, 0.0 }
 0x116   : > { %v511_v60 = vadd.f32 %v1328_v24, %v510_v58  ;;  %v575_v61 = vadd.f32 %v1328_v24, %v574_v59  ;;  %v598_v2 = vmax.f32 %v508_v52, 0.0  ;;  %v614_v3 = vmax.f32 %v572_v53, 0.0 }
 0x117   : > { %v601_v0 = vmax.f32 %v519_v56, 0.0  ;;  %v617_v1 = vmax.f32 %v583_v57, 0.0 }
 0x118   : > { %v599_v4 = vmax.f32 %v511_v60, 0.0  ;;  %v615_v5 = vmax.f32 %v575_v61, 0.0 }
 0x119   : > { %v1020_v6 = vpack.c.bf16 %v601_v0, %v600_v62  ;;  %v1060_v7 = vpack.c.bf16 %v617_v1, %v616_v63 }
 0x11a   : > { %v1015_v8 = vpack.c.bf16 %v599_v4, %v598_v2  ;;  %v1055_v9 = vpack.c.bf16 %v615_v5, %v614_v3 }
 0x11b   : > { %1068 = vst [vmem:[%s1343_s17 + $0x38] sm:$0xff] %v1020_v6   ;;  %1076 = vst [vmem:[%s1343_s17 + $0x78] sm:$0xff] %v1060_v7  }
 0x11c   : > { %1067 = vst [vmem:[%s1343_s17 + $0x30] sm:$0xff] %v1015_v8   ;;  %1075 = vst [vmem:[%s1343_s17 + $0x70] sm:$0xff] %v1055_v9  }
 0x11d PF: > { %s13_s14 = sadd.s32 1, %s1235_s14   ;;  %s1398_s12 = smov %s1231_s13 }
 0x11e   : > { %p10_p5 = scmp.ge.s32.totalorder %s13_s14, 4   ;;  %s1399_s13 = smov %s1401_s15 }
 0x120   :  { %12 = sbr.rel (!%p10_p5) target bundleno = 2 (0x2), region = 68 }

// kernel: _resnet_forward.6
= control target key start
LH: loop header
LB: loop body
LE: loop exit
PB: predicated region body
PF: predicated region fallthrough
CT: control target
= control target key end

     0   :  { %s4081_s12 = smov 0   ;;  %s4083_s13 = smov 0   ;;  %s4877_s0 = inlined_call_operand.vmem [shape: bf16[512,1152], index: 0, kind: input, shape index: {}]   ;;  %s4878_s1 = inlined_call_operand.vmem [shape: bf16[1152,128], index: 1, kind: input, shape index: {}]   ;;  %s4879_s2 = inlined_call_operand.vmem [shape: f32[1,128], index: 2, kind: input, shape index: {}]   ;;  %s4880_s3 = inlined_call_operand.vmem [shape: bf16[512,128], index: 3, kind: output, shape index: {}]  }
   0x1   :  { %s4085_s14 = smov 0  }
   0x2 LB: > { %s25_s15 = sadd.s32 1, %s4055_s13  ;;  %p2813_p0 = scmp.ge.s32.totalorder %s4059_s14, 1  ;;  %s4059_s14 = sphi %s4085_s14, %s13_s14   ;;  %s4055_s13 = sphi %s4083_s13, %s4882_s13   ;;  %s4051_s12 = sphi %s4081_s12, %s4881_s12  }
   0x3   : > { %p27_p1 = scmp.ge.s32.totalorder %s25_s15, 2  ;;  %p170_p2 = scmp.lt.s32.totalorder %s4059_s14, 3 }
   0x5   : > { %s4884_s15 = smov (%p27_p1, %s25_s15), 0  ;;  %p171_p3 = pnand %p2813_p0, %p170_p2 }
   0x6   : > { %v3757_v0 = vld [vmem:[%s4878_s1 + $0x40] sm:$0xff] (!%p171_p3)   ;;  %s2814_s18 = sshll.u32 (!%p171_p3), %s4051_s12, 5  ;;  %v3759_v2 = vld [vmem:[%s4878_s1 + $0x48] sm:$0xff] (!%p171_p3)   ;;  %v3761_v4 = vld [vmem:[%s4878_s1 + $0x50] sm:$0xff] (!%p171_p3)  }
   0x7   : > { %174 = sbr.rel (%p171_p3) target bundleno = 545 (0x221), region = 32  ;;  %v3758_v1 = vld [vmem:[%s4878_s1] sm:$0xff] (!%p171_p3)   ;;  %3196 = vmatprep.subr.bf16.mxu0 (!%p171_p3), %v3757_v0  ;;  %3716 = vmatprep.subr.bf16.mxu1 (!%p171_p3), %v3757_v0  ;;  %p206_p4 = scmp.lt.s32.totalorder (!%p171_p3), %s2814_s18, 63  ;;  %v3760_v3 = vld [vmem:[%s4878_s1 + $0x8] sm:$0xff] (!%p171_p3)   ;;  %v3762_v5 = vld [vmem:[%s4878_s1 + $0x10] sm:$0xff] (!%p171_p3)  }
   0x8   : > { %3197 = vmatpush3.bf16.msra.mxu0 (!%p171_p3), %v3758_v1  ;;  %3724 = vmatpush3.bf16.msra.mxu1 (!%p171_p3), %v3758_v1  ;;  %v3763_v6 = vld [vmem:[%s4878_s1 + $0x58] sm:$0xff] (!%p171_p3)   ;;  %v3765_v8 = vld [vmem:[%s4878_s1 + $0x60] sm:$0xff] (!%p171_p3)   ;;  %v3767_v10 = vld [vmem:[%s4878_s1 + $0x68] sm:$0xff] (!%p171_p3)  }
   0x9   : > { %3198 = vmatprep.subr.bf16.mxu0 (!%p171_p3), %v3759_v2  ;;  %3717 = vmatprep.subr.bf16.mxu1 (!%p171_p3), %v3759_v2  ;;  %v3764_v7 = vld [vmem:[%s4878_s1 + $0x18] sm:$0xff] (!%p171_p3)   ;;  %v3766_v9 = vld [vmem:[%s4878_s1 + $0x20] sm:$0xff] (!%p171_p3)   ;;  %v3768_v13 = vld [vmem:[%s4878_s1 + $0x28] sm:$0xff] (!%p171_p3)  }
   0xa   : > { %v3769_v14 = vld [vmem:[%s4878_s1 + $0x70] sm:$0xff] (!%p171_p3)   ;;  %v3771_v16 = vld [vmem:[%s4878_s1 + $0x78] sm:$0xff] (!%p171_p3)   ;;  %v3779_v18 = vld [vmem:[%s4878_s1 + $0xc0] sm:$0xff] (!%p171_p3)  }
   0xb   : > { %v3770_v15 = vld [vmem:[%s4878_s1 + $0x30] sm:$0xff] (!%p171_p3)   ;;  %v3772_v17 = vld [vmem:[%s4878_s1 + $0x38] sm:$0xff] (!%p171_p3)   ;;  %v3782_v21 = vld [vmem:[%s4878_s1 + $0x140] sm:$0xff] (!%p171_p3)  }
   0xc   : > { %3199 = vmatpush3.bf16.msra.mxu0 (!%p171_p3), %v3760_v3  ;;  %3725 = vmatpush3.bf16.msra.mxu1 (!%p171_p3), %v3760_v3  ;;  %v3780_v22 = vld [vmem:[%s4878_s1 + $0x80] sm:$0xff] (!%p171_p3)   ;;  %v3781_v23 = vld [vmem:[%s4878_s1 + $0xc8] sm:$0xff] (!%p171_p3)   ;;  %v3791_v31 = vld [vmem:[%s4878_s1 + $0xd0] sm:$0xff] (!%p171_p3)  }
   0xd   : > { %3200 = vmatprep.subr.bf16.mxu0 (!%p171_p3), %v3761_v4  ;;  %3718 = vmatprep.subr.bf16.mxu1 (!%p171_p3), %v3761_v4  ;;  %v3784_v24 = vld [vmem:[%s4878_s1 + $0x100] sm:$0xff] (!%p171_p3)   ;;  %v3783_v27 = vld [vmem:[%s4878_s1 + $0x88] sm:$0xff] (!%p171_p3)   ;;  %v3792_v32 = vld [vmem:[%s4878_s1 + $0x90] sm:$0xff] (!%p171_p3)  }
   0xe   : > { %s4886_s18 = smov (!%p206_p4, %s2814_s18), 63  ;;  %v3802_v28 = vld [vmem:[%s4878_s1 + $0x148] sm:$0xff]   ;;  %v3793_v34 = vld [vmem:[%s4878_s1 + $0xd8] sm:$0xff]   ;;  %v3801_v40 = vld [vmem:[%s4878_s1 + $0xe0] sm:$0xff]  }
   0xf   : > { %s3732_s4 = smul.u32 36, %s4886_s18  ;;  %v3804_v33 = vld [vmem:[%s4878_s1 + $0x108] sm:$0xff]   ;;  %v3794_v37 = vld [vmem:[%s4878_s1 + $0x98] sm:$0xff]   ;;  %v3803_v41 = vld [vmem:[%s4878_s1 + $0xa0] sm:$0xff]  }
  0x10   : > { %3201 = vmatpush3.bf16.msra.mxu0 %v3762_v5  ;;  %3726 = vmatpush3.bf16.msra.mxu1 %v3762_v5  ;;  %v3805_v42 = vld [vmem:[%s4878_s1 + $0xe8] sm:$0xff]   ;;  %v3816_v43 = vld [vmem:[%s4878_s1 + $0x150] sm:$0xff]   ;;  %v3815_v52 = vld [vmem:[%s4878_s1 + $0xf8] sm:$0xff]  }
  0x11   : > { %3202 = vmatprep.subr.bf16.mxu0 %v3763_v6  ;;  %3719 = vmatprep.subr.bf16.mxu1 %v3763_v6  ;;  %s4132_s11 = scalar_lea.vmem %s4877_s0, %s3732_s4  ;;  %v3818_v46 = vld [vmem:[%s4878_s1 + $0x110] sm:$0xff]   ;;  %v3806_v47 = vld [vmem:[%s4878_s1 + $0xa8] sm:$0xff]   ;;  %v3833_v55 = vld [vmem:[%s4878_s1 + $0x158] sm:$0xff]  }
  0x12   : > { %v3775_v11 = vld [vmem:[%s4132_s11 + $0x4] ss:$36 sps:$4 sm:$0xff]   ;;  %v3785_v25 = vld [vmem:[%s4132_s11 + $0x4c] ss:$36 sps:$4 sm:$0xff]   ;;  %v3795_v35 = vld [vmem:[%s4132_s11 + $0x94] ss:$36 sps:$4 sm:$0xff]  }
  0x13   : > { %v3778_v12 = vld [vmem:[%s4132_s11 + $0x364] ss:$36 sps:$4 sm:$0xff]   ;;  %1740 = vmatprep.mubr.bf16.mxu0 %v3775_v11  ;;  %v3787_v26 = vld [vmem:[%s4132_s11 + $0x3ac] ss:$36 sps:$4 sm:$0xff]   ;;  %v3797_v36 = vld [vmem:[%s4132_s11 + $0x3f4] ss:$36 sps:$4 sm:$0xff]  }
  0x14   : > { %3203 = vmatpush3.bf16.msra.mxu0 %v3764_v7  ;;  %3727 = vmatpush3.bf16.msra.mxu1 %v3764_v7  ;;  %v3773_v19 = vld [vmem:[%s4132_s11] ss:$36 sps:$4 sm:$0xff]   ;;  %v3789_v29 = vld [vmem:[%s4132_s11 + $0x48] ss:$36 sps:$4 sm:$0xff]   ;;  %v3799_v38 = vld [vmem:[%s4132_s11 + $0x90] ss:$36 sps:$4 sm:$0xff]  }
  0x15   : > { %3204 = vmatprep.subr.bf16.mxu0 %v3765_v8  ;;  %3720 = vmatprep.subr.bf16.mxu1 %v3765_v8  ;;  %v3776_v20 = vld [vmem:[%s4132_s11 + $0x360] ss:$36 sps:$4 sm:$0xff]   ;;  %v3790_v30 = vld [vmem:[%s4132_s11 + $0x3a8] ss:$36 sps:$4 sm:$0xff]   ;;  %v3800_v39 = vld [vmem:[%s4132_s11 + $0x3f0] ss:$36 sps:$4 sm:$0xff]  }
  0x16   : > { %1836 = vmatprep.mubr.bf16.mxu1 %v3778_v12  ;;  %v3807_v44 = vld [vmem:[%s4132_s11 + $0xdc] ss:$36 sps:$4 sm:$0xff]   ;;  %v3813_v48 = vld [vmem:[%s4878_s1 + $0xf0] sm:$0xff]   ;;  %v3819_v53 = vld [vmem:[%s4132_s11 + $0x124] ss:$36 sps:$4 sm:$0xff]  }
  0x17   : > { %v3809_v45 = vld [vmem:[%s4132_s11 + $0x43c] ss:$36 sps:$4 sm:$0xff]   ;;  %v3814_v51 = vld [vmem:[%s4878_s1 + $0xb0] sm:$0xff]   ;;  %v3821_v58 = vld [vmem:[%s4132_s11 + $0x8] ss:$36 sps:$4 sm:$0xff]  }
  0x18   : > { %3205 = vmatpush3.bf16.msra.mxu0 %v3766_v9  ;;  %3728 = vmatpush3.bf16.msra.mxu1 %v3766_v9  ;;  %v3811_v49 = vld [vmem:[%s4132_s11 + $0xd8] ss:$36 sps:$4 sm:$0xff]   ;;  %v3823_v54 = vld [vmem:[%s4132_s11 + $0xc] ss:$36 sps:$4 sm:$0xff]   ;;  %v3824_v59 = vld [vmem:[%s4132_s11 + $0x120] ss:$36 sps:$4 sm:$0xff]  }
  0x19   : > { %3206 = vmatprep.subr.bf16.mxu0 %v3767_v10  ;;  %3721 = vmatprep.subr.bf16.mxu1 %v3767_v10  ;;  %v3812_v50 = vld [vmem:[%s4132_s11 + $0x438] ss:$36 sps:$4 sm:$0xff]   ;;  %v3825_v60 = vld [vmem:[%s4878_s1 + $0x1c0] sm:$0xff]   ;;  %v3827_v62 = vld [vmem:[%s4132_s11 + $0x16c] ss:$36 sps:$4 sm:$0xff]  }
  0x1a   : > { %v3834_v56 = vld [vmem:[%s4878_s1 + $0x118] sm:$0xff]   ;;  %v3826_v61 = vld [vmem:[%s4878_s1 + $0x180] sm:$0xff]   ;;  %v3841_v1 = vld [vmem:[%s4878_s1 + $0x1c8] sm:$0xff]  }
  0x1b   : > { %v3817_v57 = vld [vmem:[%s4878_s1 + $0xb8] sm:$0xff]   ;;  %v3843_v0 = vld [vmem:[%s4878_s1 + $0x160] sm:$0xff]   ;;  %v3842_v3 = vld [vmem:[%s4878_s1 + $0x188] sm:$0xff]  }
  0x1c   : > { %3207 = vmatpush3.bf16.msra.mxu0 %v3768_v13  ;;  %3729 = vmatpush3.bf16.msra.mxu1 %v3768_v13  ;;  %v3829_v63 = vld [vmem:[%s4132_s11 + $0x54] ss:$36 sps:$4 sm:$0xff]   ;;  %v3844_v2 = vld [vmem:[%s4878_s1 + $0x120] sm:$0xff]   ;;  %v3831_v4 = vld [vmem:[%s4132_s11 + $0x168] ss:$36 sps:$4 sm:$0xff]  }
  0x1d   : > { %3208 = vmatprep.subr.bf16.mxu0 %v3769_v14  ;;  %3722 = vmatprep.subr.bf16.mxu1 %v3769_v14  ;;  %v3832_v5 = vld [vmem:[%s4132_s11 + $0x50] ss:$36 sps:$4 sm:$0xff]   ;;  %v3837_v7 = vld [vmem:[%s4132_s11 + $0x9c] ss:$36 sps:$4 sm:$0xff]   ;;  %v3857_v8 = vld [vmem:[%s4878_s1 + $0x168] sm:$0xff]  }
  0x1e   : > { %v3835_v6 = vld [vmem:[%s4132_s11 + $0x1b4] ss:$36 sps:$4 sm:$0xff]   ;;  %v3859_v10 = vld [vmem:[%s4878_s1 + $0x128] sm:$0xff]   ;;  %v3845_v14 = vld [vmem:[%s4132_s11 + $0x1fc] ss:$36 sps:$4 sm:$0xff]  }
  0x1f   : > { %v3858_v9 = vld [vmem:[%s4878_s1 + $0x1d0] sm:$0xff]   ;;  %v3840_v13 = vld [vmem:[%s4132_s11 + $0x98] ss:$36 sps:$4 sm:$0xff]  }
  0x20   : > { %3209 = vmatpush3.bf16.msra.mxu0 %v3770_v15  ;;  %3730 = vmatpush3.bf16.msra.mxu1 %v3770_v15  ;;  %v3860_v11 = vld [vmem:[%s4878_s1 + $0x190] sm:$0xff]  }
  0x21   : > { %3210 = vmatprep.subr.bf16.mxu0 %v3771_v16  ;;  %3723 = vmatprep.subr.bf16.mxu1 %v3771_v16  ;;  %v3839_v12 = vld [vmem:[%s4132_s11 + $0x1b0] ss:$36 sps:$4 sm:$0xff]  }
  0x22   : > { %v3867_v15 = vld [vmem:[%s4878_s1 + $0x170] sm:$0xff]  }
  0x23   : > { %v3868_v16 = vld [vmem:[%s4878_s1 + $0x130] sm:$0xff]  }
  0x24   : > { %3211 = vmatpush3.bf16.msra.mxu0 %v3772_v17  ;;  %3731 = vmatpush3.bf16.msra.mxu1 %v3772_v17  ;;  %v3847_v17 = vld [vmem:[%s4132_s11 + $0xe4] ss:$36 sps:$4 sm:$0xff]  }
  0x25   : > { %3308 = vmatprep.subr.bf16.mxu1 %v3779_v18  ;;  %3420 = vmatprep.subr.bf16.mxu0 %v3782_v21  ;;  %v3875_v18 = vld [vmem:[%s4878_s1 + $0x1d8] sm:$0xff]   ;;  %v3850_v21 = vld [vmem:[%s4132_s11 + $0xe0] ss:$36 sps:$4 sm:$0xff]  }
  0x27   : > { %1741 = vmatmul.mubr.bf16.vlgmr.msra.gmra.mrb[0].mxu0 %v3773_v19  ;;  %1837 = vmatmul.mubr.bf16.vlgmr.msra.gmra.mrb[0].mxu1 %v3776_v20  ;;  %v3876_v19 = vld [vmem:[%s4878_s1 + $0x198] sm:$0xff]  }
  0x28   : > { %3309 = vmatpush3.bf16.msra.mxu1 %v3780_v22  ;;  %3421 = vmatpush3.bf16.msra.mxu0 %v3784_v24  ;;  %v3849_v20 = vld [vmem:[%s4132_s11 + $0x1f8] ss:$36 sps:$4 sm:$0xff]   ;;  %v3851_v22 = vld [vmem:[%s4132_s11 + $0x244] ss:$36 sps:$4 sm:$0xff]  }
  0x29   : > { %3310 = vmatprep.subr.bf16.mxu1 %v3781_v23  ;;  %1748 = vmatprep.mubr.bf16.mxu0 %v3785_v25  ;;  %v3853_v23 = vld [vmem:[%s4132_s11 + $0x12c] ss:$36 sps:$4 sm:$0xff]   ;;  %v3883_v24 = vld [vmem:[%s4878_s1 + $0x178] sm:$0xff]  }
  0x2a   : > { %1844 = vmatprep.mubr.bf16.mxu1 %v3787_v26  ;;  %3422 = vmatprep.subr.bf16.mxu0 %v3802_v28  ;;  %v3884_v25 = vld [vmem:[%s4878_s1 + $0x138] sm:$0xff]   ;;  %v3891_v26 = vld [vmem:[%s4878_s1 + $0x1e0] sm:$0xff]  }
  0x2b   : > { %v3892_v28 = vld [vmem:[%s4878_s1 + $0x1a0] sm:$0xff]  }
  0x2c   : > { %3311 = vmatpush3.bf16.msra.mxu1 %v3783_v27  ;;  %3423 = vmatpush3.bf16.msra.mxu0 %v3804_v33  ;;  %v3855_v27 = vld [vmem:[%s4132_s11 + $0x240] ss:$36 sps:$4 sm:$0xff]   ;;  %v3906_v33 = vld [vmem:[%s4878_s1 + $0x1e8] sm:$0xff]  }
  0x2d   : > { %3312 = vmatprep.subr.bf16.mxu1 %v3791_v31  ;;  %3424 = vmatprep.subr.bf16.mxu0 %v3816_v43  ;;  %v3861_v31 = vld [vmem:[%s4132_s11 + $0x28c] ss:$36 sps:$4 sm:$0xff]   ;;  %v3877_v43 = vld [vmem:[%s4132_s11 + $0x31c] ss:$36 sps:$4 sm:$0xff]  }
  0x2f   : > { %1749 = vmatmul.mubr.bf16.gmra.mrb[4].mxu0 %v3789_v29  ;;  %1845 = vmatmul.mubr.bf16.gmra.mrb[4].mxu1 %v3790_v30  ;;  %v3893_v29 = vld [vmem:[%s4878_s1 + $0x200] sm:$0xff]   ;;  %v3856_v30 = vld [vmem:[%s4132_s11 + $0x128] ss:$36 sps:$4 sm:$0xff]  }
  0x30   : > { %3313 = vmatpush3.bf16.msra.mxu1 %v3792_v32  ;;  %1756 = vmatprep.mubr.bf16.mxu0 %v3795_v35  ;;  %v3863_v32 = vld [vmem:[%s4132_s11 + $0x174] ss:$36 sps:$4 sm:$0xff]   ;;  %v3907_v35 = vld [vmem:[%s4878_s1 + $0x1a8] sm:$0xff]  }
  0x31   : > { %3314 = vmatprep.subr.bf16.mxu1 %v3793_v34  ;;  %1852 = vmatprep.mubr.bf16.mxu1 %v3797_v36  ;;  %v3865_v34 = vld [vmem:[%s4132_s11 + $0x288] ss:$36 sps:$4 sm:$0xff]   ;;  %v3866_v36 = vld [vmem:[%s4132_s11 + $0x170] ss:$36 sps:$4 sm:$0xff]  }
  0x32   : > { %3425 = vmatpush3.bf16.msra.mxu0 %v3818_v46  ;;  %v3882_v46 = vld [vmem:[%s4132_s11 + $0x200] ss:$36 sps:$4 sm:$0xff]  }
  0x33   : > { %3426 = vmatprep.subr.bf16.mxu0 %v3833_v55  ;;  %v3908_v55 = vld [vmem:[%s4878_s1 + $0x208] sm:$0xff]  }
  0x34   : > { %3315 = vmatpush3.bf16.msra.mxu1 %v3794_v37  ;;  %v3869_v37 = vld [vmem:[%s4132_s11 + $0x2d4] ss:$36 sps:$4 sm:$0xff]  }
  0x35   : > { %3316 = vmatprep.subr.bf16.mxu1 %v3801_v40  ;;  %v3874_v40 = vld [vmem:[%s4132_s11 + $0x1b8] ss:$36 sps:$4 sm:$0xff]  }
  0x36   : > { %3427 = vmatpush3.bf16.msra.mxu0 %v3834_v56  ;;  %v3923_v56 = vld [vmem:[%s4878_s1 + $0x210] sm:$0xff]  }
  0x37   : > { %1757 = vmatmul.mubr.bf16.gmra.mrb[8].mxu0 %v3799_v38  ;;  %1853 = vmatmul.mubr.bf16.gmra.mrb[8].mxu1 %v3800_v39  ;;  %v3871_v38 = vld [vmem:[%s4132_s11 + $0x1bc] ss:$36 sps:$4 sm:$0xff]   ;;  %v3873_v39 = vld [vmem:[%s4132_s11 + $0x2d0] ss:$36 sps:$4 sm:$0xff]  }
  0x38   : > { %3317 = vmatpush3.bf16.msra.mxu1 %v3803_v41  ;;  %1764 = vmatprep.mubr.bf16.mxu0 %v3807_v44  ;;  %v3921_v41 = vld [vmem:[%s4878_s1 + $0x1f0] sm:$0xff]   ;;  %v3879_v44 = vld [vmem:[%s4132_s11 + $0x204] ss:$36 sps:$4 sm:$0xff]  }
  0x39   : > { %3318 = vmatprep.subr.bf16.mxu1 %v3805_v42  ;;  %1860 = vmatprep.mubr.bf16.mxu1 %v3809_v45  ;;  %v3922_v42 = vld [vmem:[%s4878_s1 + $0x1b0] sm:$0xff]   ;;  %v3881_v45 = vld [vmem:[%s4132_s11 + $0x318] ss:$36 sps:$4 sm:$0xff]  }
  0x3a   : > { %3428 = vmatprep.subr.bf16.mxu0 %v3843_v0  ;;  %v3905_v0 = vld [vmem:[%s4132_s11 + $0xa0] ss:$36 sps:$4 sm:$0xff]  }
  0x3b   : > { %3429 = vmatpush3.bf16.msra.mxu0 %v3844_v2  ;;  %v3911_v2 = vld [vmem:[%s4132_s11 + $0xec] ss:$36 sps:$4 sm:$0xff]  }
  0x3c   : > { %3319 = vmatpush3.bf16.msra.mxu1 %v3806_v47  ;;  %3430 = vmatprep.subr.bf16.mxu0 %v3857_v8  ;;  %v3936_v47 = vld [vmem:[%s4878_s1 + $0x1f8] sm:$0xff]  }
  0x3d   : > { %3320 = vmatprep.subr.bf16.mxu1 %v3813_v48  ;;  %v3937_v48 = vld [vmem:[%s4878_s1 + $0x1b8] sm:$0xff]  }
  0x3e   : > { %v3917_v8 = vld [vmem:[%s4132_s11 + $0x134] ss:$36 sps:$4 sm:$0xff]  }
  0x3f   : > { %1765 = vmatmul.mubr.bf16.gmra.mrb[12].mxu0 %v3811_v49  ;;  %1861 = vmatmul.mubr.bf16.gmra.mrb[12].mxu1 %v3812_v50  ;;  %v3885_v49 = vld [vmem:[%s4132_s11 + $0x24c] ss:$36 sps:$4 sm:$0xff]   ;;  %v3889_v50 = vld [vmem:[%s4132_s11 + $0x14] ss:$36 sps:$4 sm:$0xff]  }
  0x40   : > { %3321 = vmatpush3.bf16.msra.mxu1 %v3814_v51  ;;  %1772 = vmatprep.mubr.bf16.mxu0 %v3819_v53  ;;  %v3887_v51 = vld [vmem:[%s4132_s11 + $0x10] ss:$36 sps:$4 sm:$0xff]  }
  0x41   : > { %3322 = vmatprep.subr.bf16.mxu1 %v3815_v52  ;;  %1901 = vmatprep.mubr.bf16.mxu1 %v3823_v54  ;;  %v3890_v52 = vld [vmem:[%s4132_s11 + $0x248] ss:$36 sps:$4 sm:$0xff]   ;;  %v3894_v53 = vld [vmem:[%s4132_s11 + $0x294] ss:$36 sps:$4 sm:$0xff]   ;;  %v3896_v54 = vld [vmem:[%s4132_s11 + $0x5c] ss:$36 sps:$4 sm:$0xff]  }
  0x42   : > { %3431 = vmatpush3.bf16.msra.mxu0 %v3859_v10  ;;  %v3919_v10 = vld [vmem:[%s4132_s11 + $0x368] ss:$36 sps:$4 sm:$0xff]  }
  0x43   : > { %3432 = vmatprep.subr.bf16.mxu0 %v3867_v15  ;;  %v3929_v15 = vld [vmem:[%s4132_s11 + $0x178] ss:$36 sps:$4 sm:$0xff]  }
  0x44   : > { %3323 = vmatpush3.bf16.msra.mxu1 %v3817_v57  ;;  %v3898_v57 = vld [vmem:[%s4132_s11 + $0x290] ss:$36 sps:$4 sm:$0xff]  }
  0x45   : > { %3532 = vmatprep.subr.bf16.mxu1 %v3825_v60  ;;  %v3902_v60 = vld [vmem:[%s4132_s11 + $0xa4] ss:$36 sps:$4 sm:$0xff]  }
  0x46   : > { %3433 = vmatpush3.bf16.msra.mxu0 %v3868_v16  ;;  %v3930_v16 = vld [vmem:[%s4132_s11 + $0x3fc] ss:$36 sps:$4 sm:$0xff]  }
  0x47   : > { %1773 = vmatmul.mubr.bf16.gmra.mrb[16].mxu0 %v3824_v59  ;;  %1902 = vmatmul.mubr.bf16.vlgmr.msra.gmra.mrb[16].mxu1 %v3821_v58  ;;  %v3899_v58 = vld [vmem:[%s4132_s11 + $0x58] ss:$36 sps:$4 sm:$0xff]  }
  0x48   : > { %3533 = vmatpush3.bf16.msra.mxu1 %v3826_v61  ;;  %1780 = vmatprep.mubr.bf16.mxu0 %v3827_v62  ;;  %v3900_v59 = vld [vmem:[%s4132_s11 + $0x2dc] ss:$36 sps:$4 sm:$0xff]  }
  0x49   : > { %1909 = vmatprep.mubr.bf16.mxu1 %v3829_v63  ;;  %3534 = vmatprep.subr.bf16.mxu1 %v3841_v1  ;;  %v3938_v61 = vld [vmem:[%s4878_s1 + $0x218] sm:$0xff]   ;;  %v3951_v62 = vld [vmem:[%s4878_s1 + $0x220] sm:$0xff]  }
  0x4a   : > { %3434 = vmatprep.subr.bf16.mxu0 %v3883_v24  ;;  %v3904_v63 = vld [vmem:[%s4132_s11 + $0x2d8] ss:$36 sps:$4 sm:$0xff]   ;;  %v3909_v1 = vld [vmem:[%s4132_s11 + $0x324] ss:$36 sps:$4 sm:$0xff]  }
  0x4b   : > { %3435 = vmatpush3.bf16.msra.mxu0 %v3884_v25  ;;  %v3945_v24 = vld [vmem:[%s4132_s11 + $0x254] ss:$36 sps:$4 sm:$0xff]   ;;  %v3949_v25 = vld [vmem:[%s4132_s11 + $0x1c] ss:$36 sps:$4 sm:$0xff]  }
  0x4c   : > { %3535 = vmatpush3.bf16.msra.mxu1 %v3842_v3  ;;  %3668 = vmatprep.subr.bf16.mxu0 %v3893_v29  ;;  %v3964_v3 = vld [vmem:[%s4878_s1 + $0x228] sm:$0xff]  }
  0x4d   : > { %3536 = vmatprep.subr.bf16.mxu1 %v3858_v9  ;;  %v3990_v9 = vld [vmem:[%s4878_s1 + $0x238] sm:$0xff]  }
  0x4f   : > { %1781 = vmatmul.mubr.bf16.gmra.mrb[20].mxu0 %v3831_v4  ;;  %1910 = vmatmul.mubr.bf16.gmra.mrb[20].mxu1 %v3832_v5  ;;  %v3913_v4 = vld [vmem:[%s4132_s11 + $0x320] ss:$36 sps:$4 sm:$0xff]   ;;  %v3914_v5 = vld [vmem:[%s4132_s11 + $0xe8] ss:$36 sps:$4 sm:$0xff]  }
  0x50   : > { %1788 = vmatprep.mubr.bf16.mxu0 %v3835_v6  ;;  %1917 = vmatprep.mubr.bf16.mxu1 %v3837_v7  ;;  %v3977_v6 = vld [vmem:[%s4878_s1 + $0x230] sm:$0xff]  }
  0x51   : > { %3537 = vmatpush3.bf16.msra.mxu1 %v3860_v11  ;;  %v3915_v7 = vld [vmem:[%s4132_s11 + $0x36c] ss:$36 sps:$4 sm:$0xff]  }
  0x52   : > { %3538 = vmatprep.subr.bf16.mxu1 %v3875_v18  ;;  %v3920_v11 = vld [vmem:[%s4132_s11 + $0x130] ss:$36 sps:$4 sm:$0xff]   ;;  %v3934_v18 = vld [vmem:[%s4132_s11 + $0x3f8] ss:$36 sps:$4 sm:$0xff]  }
  0x55   : > { %3539 = vmatpush3.bf16.msra.mxu1 %v3876_v19  ;;  %v3935_v19 = vld [vmem:[%s4132_s11 + $0x1c0] ss:$36 sps:$4 sm:$0xff]  }
  0x56   : > { %3540 = vmatprep.subr.bf16.mxu1 %v3891_v26  ;;  %v3947_v26 = vld [vmem:[%s4132_s11 + $0x18] ss:$36 sps:$4 sm:$0xff]  }
  0x57   : > { %1789 = vmatmul.mubr.bf16.gmra.mrb[24].mxu0 %v3839_v12  ;;  %1918 = vmatmul.mubr.bf16.gmra.mrb[24].mxu1 %v3840_v13  ;;  %v3924_v12 = vld [vmem:[%s4132_s11 + $0x3b4] ss:$36 sps:$4 sm:$0xff]   ;;  %v3926_v13 = vld [vmem:[%s4132_s11 + $0x17c] ss:$36 sps:$4 sm:$0xff]  }
  0x58   : > { %1796 = vmatprep.mubr.bf16.mxu0 %v3845_v14  ;;  %1925 = vmatprep.mubr.bf16.mxu1 %v3847_v17  ;;  %v3928_v14 = vld [vmem:[%s4132_s11 + $0x3b0] ss:$36 sps:$4 sm:$0xff]   ;;  %v3932_v17 = vld [vmem:[%s4132_s11 + $0x1c4] ss:$36 sps:$4 sm:$0xff]  }
  0x59   : > { %3541 = vmatpush3.bf16.msra.mxu1 %v3892_v28  ;;  %v3952_v28 = vld [vmem:[%s4132_s11 + $0x29c] ss:$36 sps:$4 sm:$0xff]  }
  0x5a   : > { %3542 = vmatprep.subr.bf16.mxu1 %v3906_v33  ;;  %v3960_v33 = vld [vmem:[%s4132_s11 + $0xac] ss:$36 sps:$4 sm:$0xff]  }
  0x5d   : > { %3543 = vmatpush3.bf16.msra.mxu1 %v3907_v35  ;;  %v3963_v35 = vld [vmem:[%s4132_s11 + $0xa8] ss:$36 sps:$4 sm:$0xff]  }
  0x5e   : > { %3544 = vmatprep.subr.bf16.mxu1 %v3921_v41  ;;  %v3973_v41 = vld [vmem:[%s4132_s11 + $0x13c] ss:$36 sps:$4 sm:$0xff]  }
  0x5f   : > { %1797 = vmatmul.mubr.bf16.gmra.mrb[28].mxu0 %v3849_v20  ;;  %1926 = vmatmul.mubr.bf16.gmra.mrb[28].mxu1 %v3850_v21  ;;  %v3939_v20 = vld [vmem:[%s4132_s11 + $0x444] ss:$36 sps:$4 sm:$0xff]   ;;  %v3941_v21 = vld [vmem:[%s4132_s11 + $0x20c] ss:$36 sps:$4 sm:$0xff]  }
  0x60   : > { %1804 = vmatprep.mubr.bf16.mxu0 %v3851_v22  ;;  %1933 = vmatprep.mubr.bf16.mxu1 %v3853_v23  ;;  %v3943_v22 = vld [vmem:[%s4132_s11 + $0x440] ss:$36 sps:$4 sm:$0xff]   ;;  %v3944_v23 = vld [vmem:[%s4132_s11 + $0x208] ss:$36 sps:$4 sm:$0xff]  }
  0x61   : > { %3545 = vmatpush3.bf16.msra.mxu1 %v3922_v42  ;;  %v3975_v42 = vld [vmem:[%s4132_s11 + $0x370] ss:$36 sps:$4 sm:$0xff]  }
  0x62   : > { %3546 = vmatprep.subr.bf16.mxu1 %v3936_v47  ;;  %v3983_v47 = vld [vmem:[%s4132_s11 + $0x180] ss:$36 sps:$4 sm:$0xff]  }
  0x65   : > { %3547 = vmatpush3.bf16.msra.mxu1 %v3937_v48  ;;  %v3984_v48 = vld [vmem:[%s4132_s11 + $0x404] ss:$36 sps:$4 sm:$0xff]  }
  0x67   : > { %1805 = vmatmul.mubr.bf16.gmra.mrb[32].mxu0 %v3855_v27  ;;  %1934 = vmatmul.mubr.bf16.gmra.mrb[32].mxu1 %v3856_v30  ;;  %v3950_v27 = vld [vmem:[%s4132_s11 + $0x250] ss:$36 sps:$4 sm:$0xff]   ;;  %v3956_v30 = vld [vmem:[%s4132_s11 + $0x298] ss:$36 sps:$4 sm:$0xff]  }
  0x68   : > { %1812 = vmatprep.mubr.bf16.mxu0 %v3861_v31  ;;  %1941 = vmatprep.mubr.bf16.mxu1 %v3863_v32  ;;  %v3957_v31 = vld [vmem:[%s4132_s11 + $0x60] ss:$36 sps:$4 sm:$0xff]  }
  0x69   : > { %v3958_v32 = vld [vmem:[%s4132_s11 + $0x2e4] ss:$36 sps:$4 sm:$0xff]  }
  0x6f   : > { %1813 = vmatmul.mubr.bf16.gmra.mrb[36].mxu0 %v3865_v34  ;;  %1942 = vmatmul.mubr.bf16.gmra.mrb[36].mxu1 %v3866_v36  ;;  %v3962_v34 = vld [vmem:[%s4132_s11 + $0x2e0] ss:$36 sps:$4 sm:$0xff]   ;;  %v3965_v36 = vld [vmem:[%s4132_s11 + $0x32c] ss:$36 sps:$4 sm:$0xff]  }
  0x70   : > { %1820 = vmatprep.mubr.bf16.mxu0 %v3869_v37  ;;  %1949 = vmatprep.mubr.bf16.mxu1 %v3871_v38  ;;  %v3967_v37 = vld [vmem:[%s4132_s11 + $0xf4] ss:$36 sps:$4 sm:$0xff]   ;;  %v3969_v38 = vld [vmem:[%s4132_s11 + $0x328] ss:$36 sps:$4 sm:$0xff]  }
  0x77   : > { %1821 = vmatmul.mubr.bf16.gmra.mrb[40].mxu0 %v3873_v39  ;;  %1950 = vmatmul.mubr.bf16.gmra.mrb[40].mxu1 %v3874_v40  ;;  %v3970_v39 = vld [vmem:[%s4132_s11 + $0xf0] ss:$36 sps:$4 sm:$0xff]  }
  0x78   : > { %1828 = vmatprep.mubr.bf16.mxu0 %v3877_v43  ;;  %1957 = vmatprep.mubr.bf16.mxu1 %v3879_v44  ;;  %v3971_v40 = vld [vmem:[%s4132_s11 + $0x374] ss:$36 sps:$4 sm:$0xff]   ;;  %v3978_v44 = vld [vmem:[%s4132_s11 + $0x3bc] ss:$36 sps:$4 sm:$0xff]  }
  0x79   : > { %v3976_v43 = vld [vmem:[%s4132_s11 + $0x138] ss:$36 sps:$4 sm:$0xff]  }
  0x7f   : > { %1829 = vmatmul.mubr.bf16.gmra.mrb[44].mxu0 %v3881_v45  ;;  %1958 = vmatmul.mubr.bf16.gmra.mrb[44].mxu1 %v3882_v46  ;;  %v3980_v45 = vld [vmem:[%s4132_s11 + $0x184] ss:$36 sps:$4 sm:$0xff]   ;;  %v3982_v46 = vld [vmem:[%s4132_s11 + $0x3b8] ss:$36 sps:$4 sm:$0xff]  }
  0x80   : > { %1965 = vmatprep.mubr.bf16.mxu1 %v3885_v49  ;;  %2062 = vmatprep.mubr.bf16.mxu0 %v3889_v50  ;;  %v3986_v49 = vld [vmem:[%s4132_s11 + $0x1cc] ss:$36 sps:$4 sm:$0xff]   ;;  %v3988_v50 = vld [vmem:[%s4132_s11 + $0x400] ss:$36 sps:$4 sm:$0xff]  }
  0x87   : > { %1966 = vmatmul.mubr.bf16.gmra.mrb[48].mxu1 %v3890_v52  ;;  %2063 = vmatmul.mubr.bf16.vlgmr.msra.gmra.mrb[48].mxu0 %v3887_v51  ;;  %v3989_v51 = vld [vmem:[%s4132_s11 + $0x1c8] ss:$36 sps:$4 sm:$0xff]  }
  0x88   : > { %3669 = vmatpush3.bf16.msra.mxu0 %v3893_v29  ;;  %1973 = vmatprep.mubr.bf16.mxu1 %v3894_v53  ;;  %v3954_v29 = vld [vmem:[%s4132_s11 + $0x64] ss:$36 sps:$4 sm:$0xff]   ;;  %v3991_v52 = vld [vmem:[%s4132_s11 + $0x44c] ss:$36 sps:$4 sm:$0xff]   ;;  %v3993_v53 = vld [vmem:[%s4132_s11 + $0x214] ss:$36 sps:$4 sm:$0xff]  }
  0x89   : > { %2070 = vmatprep.mubr.bf16.mxu0 %v3896_v54  ;;  %3670 = vmatprep.subr.bf16.mxu0 %v3908_v55 }
  0x8c   : > { %3671 = vmatpush3.bf16.msra.mxu0 %v3908_v55 }
  0x8d   : > { %3672 = vmatprep.subr.bf16.mxu0 %v3923_v56 }
  0x8f   : > { %1974 = vmatmul.mubr.bf16.gmra.mrb[52].mxu1 %v3898_v57  ;;  %2071 = vmatmul.mubr.bf16.gmra.mrb[52].mxu0 %v3899_v58  ;;  %v3995_v58 = vld [vmem:[%s4132_s11 + $0x448] ss:$36 sps:$4 sm:$0xff]  }
  0x90   : > { %1981 = vmatprep.mubr.bf16.mxu1 %v3900_v59  ;;  %2078 = vmatprep.mubr.bf16.mxu0 %v3902_v60  ;;  %v3996_v59 = vld [vmem:[%s4132_s11 + $0x210] ss:$36 sps:$4 sm:$0xff]  }
  0x91   : > { %3673 = vmatpush3.bf16.msra.mxu0 %v3923_v56 }
  0x92   : > { %3674 = vmatprep.subr.bf16.mxu0 %v3938_v61 }
  0x95   : > { %3675 = vmatpush3.bf16.msra.mxu0 %v3938_v61 }
  0x96   : > { %3676 = vmatprep.subr.bf16.mxu0 %v3951_v62 }
  0x97   : > { %1982 = vmatmul.mubr.bf16.gmra.mrb[56].mxu1 %v3904_v63  ;;  %2079 = vmatmul.mubr.bf16.gmra.mrb[56].mxu0 %v3905_v0  ;;  %v3997_v0 = vld [vmem:[%s4132_s11 + $0x25c] ss:$36 sps:$4 sm:$0xff]  }
  0x98   : > { %1989 = vmatprep.mubr.bf16.mxu1 %v3909_v1  ;;  %2086 = vmatprep.mubr.bf16.mxu0 %v3911_v2  ;;  %v3999_v1 = vld [vmem:[%s4132_s11 + $0x20] ss:$36 sps:$4 sm:$0xff]  }
  0x99   : > { %3677 = vmatpush3.bf16.msra.mxu0 %v3951_v62 }
  0x9a   : > { %3678 = vmatprep.subr.bf16.mxu0 %v3964_v3 }
  0x9d   : > { %3679 = vmatpush3.bf16.msra.mxu0 %v3964_v3 }
  0x9e   : > { %3680 = vmatprep.subr.bf16.mxu0 %v3977_v6 }
  0x9f   : > { %1990 = vmatmul.mubr.bf16.gmra.mrb[60].mxu1 %v3913_v4  ;;  %2087 = vmatmul.mubr.bf16.gmra.mrb[60].mxu0 %v3914_v5 }
  0xa0   : > { %1997 = vmatprep.mubr.bf16.mxu1 %v3915_v7  ;;  %2094 = vmatprep.mubr.bf16.mxu0 %v3917_v8 }
  0xa1   : > { %3681 = vmatpush3.bf16.msra.mxu0 %v3977_v6 }
  0xa2   : > { %3682 = vmatprep.subr.bf16.mxu0 %v3990_v9 }
  0xa5   : > { %3683 = vmatpush3.bf16.msra.mxu0 %v3990_v9 }
  0xa7   : > { %1998 = vmatmul.mubr.bf16.gmra.mrb[64].mxu1 %v3919_v10  ;;  %2095 = vmatmul.mubr.bf16.gmra.mrb[64].mxu0 %v3920_v11  ;;  %v4000_v10 = vld [vmem:[%s4132_s11 + $0x258] ss:$36 sps:$4 sm:$0xff]   ;;  %v4001_v11 = vld [vmem:[%s4132_s11 + $0x68] ss:$36 sps:$4 sm:$0xff]  }
  0xa8   : > { %2005 = vmatprep.mubr.bf16.mxu1 %v3924_v12  ;;  %2102 = vmatprep.mubr.bf16.mxu0 %v3926_v13 }
  0xaf   : > { %2006 = vmatmul.mubr.bf16.gmra.mrb[68].mxu1 %v3928_v14  ;;  %2103 = vmatmul.mubr.bf16.gmra.mrb[68].mxu0 %v3929_v15 }
  0xb0   : > { %2013 = vmatprep.mubr.bf16.mxu1 %v3930_v16  ;;  %2110 = vmatprep.mubr.bf16.mxu0 %v3932_v17  ;;  %v4002_v16 = vld [vmem:[%s4132_s11 + $0x2a4] ss:$36 sps:$4 sm:$0xff]   ;;  %v4004_v17 = vld [vmem:[%s4132_s11 + $0xb0] ss:$36 sps:$4 sm:$0xff]  }
  0xb7   : > { %2014 = vmatmul.mubr.bf16.gmra.mrb[72].mxu1 %v3934_v18  ;;  %2111 = vmatmul.mubr.bf16.gmra.mrb[72].mxu0 %v3935_v19 }
  0xb8   : > { %2021 = vmatprep.mubr.bf16.mxu1 %v3939_v20  ;;  %2118 = vmatprep.mubr.bf16.mxu0 %v3941_v21 }
  0xbf   : > { %2022 = vmatmul.mubr.bf16.gmra.mrb[76].mxu1 %v3943_v22  ;;  %2119 = vmatmul.mubr.bf16.gmra.mrb[76].mxu0 %v3944_v23 }
  0xc0   : > { %2126 = vmatprep.mubr.bf16.mxu0 %v3945_v24  ;;  %2223 = vmatprep.mubr.bf16.mxu1 %v3949_v25 }
  0xc7   : > { %2127 = vmatmul.mubr.bf16.gmra.mrb[80].mxu0 %v3950_v27  ;;  %2224 = vmatmul.mubr.bf16.vlgmr.msra.gmra.mrb[80].mxu1 %v3947_v26  ;;  %v4005_v26 = vld [vmem:[%s4132_s11 + $0x2a0] ss:$36 sps:$4 sm:$0xff]   ;;  %v4006_v27 = vld [vmem:[%s4132_s11 + $0xf8] ss:$36 sps:$4 sm:$0xff]  }
  0xc8   : > { %2134 = vmatprep.mubr.bf16.mxu0 %v3952_v28  ;;  %2231 = vmatprep.mubr.bf16.mxu1 %v3954_v29 }
  0xcf   : > { %2135 = vmatmul.mubr.bf16.gmra.mrb[84].mxu0 %v3956_v30  ;;  %2232 = vmatmul.mubr.bf16.gmra.mrb[84].mxu1 %v3957_v31 }
  0xd0   : > { %2142 = vmatprep.mubr.bf16.mxu0 %v3958_v32  ;;  %2239 = vmatprep.mubr.bf16.mxu1 %v3960_v33  ;;  %v4007_v32 = vld [vmem:[%s4132_s11 + $0x2ec] ss:$36 sps:$4 sm:$0xff]   ;;  %v4009_v33 = vld [vmem:[%s4132_s11 + $0x140] ss:$36 sps:$4 sm:$0xff]  }
  0xd7   : > { %2143 = vmatmul.mubr.bf16.gmra.mrb[88].mxu0 %v3962_v34  ;;  %2240 = vmatmul.mubr.bf16.gmra.mrb[88].mxu1 %v3963_v35 }
  0xd8   : > { %2150 = vmatprep.mubr.bf16.mxu0 %v3965_v36  ;;  %2247 = vmatprep.mubr.bf16.mxu1 %v3967_v37 }
  0xdf   : > { %2151 = vmatmul.mubr.bf16.gmra.mrb[92].mxu0 %v3969_v38  ;;  %2248 = vmatmul.mubr.bf16.gmra.mrb[92].mxu1 %v3970_v39 }
  0xe0   : > { %2158 = vmatprep.mubr.bf16.mxu0 %v3971_v40  ;;  %2255 = vmatprep.mubr.bf16.mxu1 %v3973_v41 }
  0xe7   : > { %2159 = vmatmul.mubr.bf16.gmra.mrb[96].mxu0 %v3975_v42  ;;  %2256 = vmatmul.mubr.bf16.gmra.mrb[96].mxu1 %v3976_v43  ;;  %v4010_v42 = vld [vmem:[%s4132_s11 + $0x2e8] ss:$36 sps:$4 sm:$0xff]  }
  0xe8   : > { %2166 = vmatprep.mubr.bf16.mxu0 %v3978_v44  ;;  %2263 = vmatprep.mubr.bf16.mxu1 %v3980_v45  ;;  %v4011_v43 = vld [vmem:[%s4132_s11 + $0x188] ss:$36 sps:$4 sm:$0xff]  }
  0xef   : > { %2167 = vmatmul.mubr.bf16.gmra.mrb[100].mxu0 %v3982_v46  ;;  %2264 = vmatmul.mubr.bf16.gmra.mrb[100].mxu1 %v3983_v47 }
  0xf0   : > { %2174 = vmatprep.mubr.bf16.mxu0 %v3984_v48  ;;  %2271 = vmatprep.mubr.bf16.mxu1 %v3986_v49  ;;  %v4012_v48 = vld [vmem:[%s4132_s11 + $0x334] ss:$36 sps:$4 sm:$0xff]  }
  0xf1   : > { %v4014_v49 = vld [vmem:[%s4132_s11 + $0x1d0] ss:$36 sps:$4 sm:$0xff]  }
  0xf7   : > { %2175 = vmatmul.mubr.bf16.gmra.mrb[104].mxu0 %v3988_v50  ;;  %2272 = vmatmul.mubr.bf16.gmra.mrb[104].mxu1 %v3989_v51 }
  0xf8   : > { %2182 = vmatprep.mubr.bf16.mxu0 %v3991_v52  ;;  %2279 = vmatprep.mubr.bf16.mxu1 %v3993_v53 }
  0xfa   : > { %v3284_v54 = vpop.f32.mrb[0].mxu1  ;;  %v3212_v55 = vpop.f32.mrb[0].mxu0 }
  0xfb   : > { %v3285_v56 = vpop.f32.mrb[1].mxu1  ;;  %v3213_v57 = vpop.f32.mrb[1].mxu0 }
  0xfc   : > { %v4435_v60 = vadd.f32 %v3285_v56, %v3284_v54  ;;  %v3287_v61 = vpop.f32.mrb[2].mxu1  ;;  %v4437_v62 = vadd.f32 %v3213_v57, %v3212_v55  ;;  %v3215_v63 = vpop.f32.mrb[2].mxu0  ;;  %v4484_v54 = vld [vmem:[%s4879_s2] ss:$0 sm:$0xff] }
  0xfd   : > { %v3288_v2 = vpop.f32.mrb[3].mxu1  ;;  %v3216_v3 = vpop.f32.mrb[3].mxu0 }
  0xfe   : > { %v4441_v4 = vadd.f32 %v3288_v2, %v3287_v61  ;;  %v4443_v5 = vadd.f32 %v3216_v3, %v3215_v63  ;;  %v4016_v61 = vld [vmem:[%s4132_s11 + $0x218] ss:$36 sps:$4 sm:$0xff]   ;;  %v1743_v63 = vadd.f32 %v4437_v62, %v4484_v54 }
  0xff   : > { %2183 = vmatmul.mubr.bf16.gmra.mrb[108].mxu0 %v3995_v58  ;;  %2280 = vmatmul.mubr.bf16.gmra.mrb[108].mxu1 %v3996_v59  ;;  %v4015_v59 = vld [vmem:[%s4132_s11 + $0x330] ss:$36 sps:$4 sm:$0xff]  }
 0x100   : > { %2287 = vmatprep.mubr.bf16.mxu1 %v3997_v0  ;;  %3684 = vmatprep.mubr.bf16.mxu0 %v3999_v1 }
 0x102   : > { %v3290_v6 = vpop.f32.mrb[4].mxu1  ;;  %v3218_v7 = vpop.f32.mrb[4].mxu0 }
 0x103   : > { %v3291_v8 = vpop.f32.mrb[5].mxu1  ;;  %v3219_v9 = vpop.f32.mrb[5].mxu0 }
 0x104   : > { %v4447_v12 = vadd.f32 %v3291_v8, %v3290_v6  ;;  %v3293_v13 = vpop.f32.mrb[6].mxu1  ;;  %v4449_v14 = vadd.f32 %v3219_v9, %v3218_v7  ;;  %v3221_v15 = vpop.f32.mrb[6].mxu0  ;;  %v4017_v6 = vld [vmem:[%s4132_s11 + $0x37c] ss:$36 sps:$4 sm:$0xff]  }
 0x105   : > { %v3294_v18 = vpop.f32.mrb[7].mxu1  ;;  %v3222_v19 = vpop.f32.mrb[7].mxu0  ;;  %v4019_v7 = vld [vmem:[%s4132_s11 + $0x260] ss:$36 sps:$4 sm:$0xff]  }
 0x106   : > { %v4453_v20 = vadd.f32 %v3294_v18, %v3293_v13  ;;  %v4455_v21 = vadd.f32 %v3222_v19, %v3221_v15 }
 0x107   : > { %2288 = vmatmul.mubr.bf16.gmra.mrb[112].mxu1 %v4000_v10  ;;  %3685 = vmatmul.mubr.bf16.vlgmr.msra.gmra.mrb[112].mxu0 %v4001_v11  ;;  %v1746_v10 = vadd.f32 %v4443_v5, %v4484_v54  ;;  %v1751_v5 = vadd.f32 %v4449_v14, %v4484_v54 }
 0x108   : > { %2295 = vmatprep.mubr.bf16.mxu1 %v4002_v16  ;;  %3688 = vmatprep.mubr.bf16.mxu0 %v4004_v17 }
 0x10a   : > { %v3296_v22 = vpop.f32.mrb[8].mxu1  ;;  %v3224_v23 = vpop.f32.mrb[8].mxu0 }
 0x10b   : > { %v3297_v24 = vpop.f32.mrb[9].mxu1  ;;  %v3225_v25 = vpop.f32.mrb[9].mxu0 }
 0x10c   : > { %v4459_v28 = vadd.f32 %v3297_v24, %v3296_v22  ;;  %v3299_v29 = vpop.f32.mrb[10].mxu1  ;;  %v4461_v30 = vadd.f32 %v3225_v25, %v3224_v23  ;;  %v3227_v31 = vpop.f32.mrb[10].mxu0  ;;  %v4020_v22 = vld [vmem:[%s4132_s11 + $0x378] ss:$36 sps:$4 sm:$0xff]   ;;  %v4021_v23 = vld [vmem:[%s4132_s11 + $0x2a8] ss:$36 sps:$4 sm:$0xff]  }
 0x10d   : > { %v3300_v34 = vpop.f32.mrb[11].mxu1  ;;  %v3228_v35 = vpop.f32.mrb[11].mxu0 }
 0x10e   : > { %v4465_v36 = vadd.f32 %v3300_v34, %v3299_v29  ;;  %v4467_v37 = vadd.f32 %v3228_v35, %v3227_v31  ;;  %v4022_v29 = vld [vmem:[%s4132_s11 + $0x3c4] ss:$36 sps:$4 sm:$0xff]   ;;  %v4024_v31 = vld [vmem:[%s4132_s11 + $0x2f0] ss:$36 sps:$4 sm:$0xff]   ;;  %v1754_v34 = vadd.f32 %v4455_v21, %v4484_v54  ;;  %v1759_v21 = vadd.f32 %v4461_v30, %v4484_v54 }
 0x10f   : > { %2296 = vmatmul.mubr.bf16.gmra.mrb[116].mxu1 %v4005_v26  ;;  %3689 = vmatmul.mubr.bf16.gmra.mrb[116].mxu0 %v4006_v27 }
 0x110   : > { %2303 = vmatprep.mubr.bf16.mxu1 %v4007_v32  ;;  %3692 = vmatprep.mubr.bf16.mxu0 %v4009_v33 }
 0x112   : > { %v3302_v38 = vpop.f32.mrb[12].mxu1  ;;  %v3230_v39 = vpop.f32.mrb[12].mxu0 }
 0x113   : > { %v3303_v40 = vpop.f32.mrb[13].mxu1  ;;  %v3231_v41 = vpop.f32.mrb[13].mxu0 }
 0x114   : > { %v4471_v44 = vadd.f32 %v3303_v40, %v3302_v38  ;;  %v3305_v45 = vpop.f32.mrb[14].mxu1  ;;  %v4473_v46 = vadd.f32 %v3231_v41, %v3230_v39  ;;  %v3233_v47 = vpop.f32.mrb[14].mxu0 }
 0x115   : > { %v3306_v50 = vpop.f32.mrb[15].mxu1  ;;  %v3234_v51 = vpop.f32.mrb[15].mxu0 }
 0x116   : > { %v4477_v52 = vadd.f32 %v3306_v50, %v3305_v45  ;;  %v4479_v53 = vadd.f32 %v3234_v51, %v3233_v47  ;;  %v4025_v45 = vld [vmem:[%s4132_s11 + $0x3c0] ss:$36 sps:$4 sm:$0xff]   ;;  %v4026_v47 = vld [vmem:[%s4132_s11 + $0x338] ss:$36 sps:$4 sm:$0xff]  }
 0x117   : > { %2304 = vmatmul.mubr.bf16.gmra.mrb[120].mxu1 %v4010_v42  ;;  %3693 = vmatmul.mubr.bf16.gmra.mrb[120].mxu0 %v4011_v43 }
 0x118   : > { %2311 = vmatprep.mubr.bf16.mxu1 %v4012_v48  ;;  %3696 = vmatprep.mubr.bf16.mxu0 %v4014_v49 }
 0x11a   : > { %v3324_v55 = vpop.f32.mrb[16].mxu1  ;;  %v3236_v56 = vpop.f32.mrb[16].mxu0 }
 0x11b   : > { %v3325_v57 = vpop.f32.mrb[17].mxu1  ;;  %v3237_v58 = vpop.f32.mrb[17].mxu0 }
 0x11c   : > { %v3326_v0 = vadd.f32 %v3325_v57, %v3324_v55  ;;  %v3327_v1 = vpop.f32.mrb[18].mxu1  ;;  %v4490_v2 = vadd.f32 %v3237_v58, %v3236_v56  ;;  %v3239_v3 = vpop.f32.mrb[18].mxu0  ;;  %v4027_v55 = vld [vmem:[%s4132_s11 + $0x40c] ss:$36 sps:$4 sm:$0xff]   ;;  %v4029_v56 = vld [vmem:[%s4132_s11 + $0x380] ss:$36 sps:$4 sm:$0xff]  }
 0x11d   : > { %v3328_v8 = vpop.f32.mrb[19].mxu1  ;;  %v3240_v9 = vpop.f32.mrb[19].mxu0 }
 0x11e   : > { %v4496_v11 = vadd.f32 %v3326_v0, %v1743_v63  ;;  %v3329_v13 = vadd.f32 %v3328_v8, %v3327_v1  ;;  %v4498_v15 = vadd.f32 %v3240_v9, %v3239_v3  ;;  %v4030_v8 = vld [vmem:[%s4132_s11 + $0x408] ss:$36 sps:$4 sm:$0xff]  }
 0x11f   : > { %2312 = vmatmul.mubr.bf16.gmra.mrb[124].mxu1 %v4015_v59  ;;  %3697 = vmatmul.mubr.bf16.gmra.mrb[124].mxu0 %v4016_v61  ;;  %v1762_v59 = vadd.f32 %v4467_v37, %v4484_v54  ;;  %v4031_v9 = vld [vmem:[%s4132_s11 + $0x3c8] ss:$36 sps:$4 sm:$0xff]   ;;  %v1767_v37 = vadd.f32 %v4473_v46, %v4484_v54 }
 0x120   : > { %v4500_v62 = vadd.f32 %v3329_v13, %v1746_v10  ;;  %2319 = vmatprep.mubr.bf16.mxu1 %v4017_v6  ;;  %3700 = vmatprep.mubr.bf16.mxu0 %v4019_v7 }
 0x122   : > { %v3330_v16 = vpop.f32.mrb[20].mxu1  ;;  %v3242_v17 = vpop.f32.mrb[20].mxu0 }
 0x123   : > { %v3331_v18 = vpop.f32.mrb[21].mxu1  ;;  %v3243_v19 = vpop.f32.mrb[21].mxu0 }
 0x124   : > { %v3332_v24 = vadd.f32 %v3331_v18, %v3330_v16  ;;  %v3333_v25 = vpop.f32.mrb[22].mxu1  ;;  %v4506_v26 = vadd.f32 %v3243_v19, %v3242_v17  ;;  %v3245_v27 = vpop.f32.mrb[22].mxu0  ;;  %v4032_v18 = vld [vmem:[%s4132_s11 + $0x454] ss:$36 sps:$4 sm:$0xff]  }
 0x125   : > { %v3334_v32 = vpop.f32.mrb[23].mxu1  ;;  %v3246_v33 = vpop.f32.mrb[23].mxu0  ;;  %v4034_v19 = vld [vmem:[%s4132_s11 + $0x410] ss:$36 sps:$4 sm:$0xff]  }
 0x126   : > { %v4512_v35 = vadd.f32 %v3332_v24, %v1751_v5  ;;  %v3335_v38 = vadd.f32 %v3334_v32, %v3333_v25  ;;  %v4514_v39 = vadd.f32 %v3246_v33, %v3245_v27  ;;  %v1770_v5 = vadd.f32 %v4479_v53, %v4484_v54 }
 0x127   : > { %2320 = vmatmul.mubr.bf16.gmra.mrb[128].mxu1 %v4020_v22  ;;  %3701 = vmatmul.mubr.bf16.gmra.mrb[128].mxu0 %v4021_v23  ;;  %v1775_v53 = vadd.f32 %v4490_v2, %v4484_v54 }
 0x128   : > { %v4516_v14 = vadd.f32 %v3335_v38, %v1754_v34  ;;  %2327 = vmatprep.mubr.bf16.mxu1 %v4022_v29  ;;  %3704 = vmatprep.mubr.bf16.mxu0 %v4024_v31  ;;  %v4035_v34 = vld [vmem:[%s4132_s11 + $0x450] ss:$36 sps:$4 sm:$0xff]   ;;  %v4036_v38 = vld [vmem:[%s4132_s11 + $0x458] ss:$36 sps:$4 sm:$0xff]   ;;  %s2817_s11 = sshll.u32 %s4886_s18, 2 }
 0x129   : > { %s4813_s9 = scalar_lea.vmem %s4880_s3, %s2817_s11 }
 0x12a   : > { %v3336_v40 = vpop.f32.mrb[24].mxu1  ;;  %v3248_v41 = vpop.f32.mrb[24].mxu0 }
 0x12b   : > { %v3337_v42 = vpop.f32.mrb[25].mxu1  ;;  %v3249_v43 = vpop.f32.mrb[25].mxu0 }
 0x12c   : > { %v3338_v48 = vadd.f32 %v3337_v42, %v3336_v40  ;;  %v3339_v49 = vpop.f32.mrb[26].mxu1  ;;  %v4522_v50 = vadd.f32 %v3249_v43, %v3248_v41  ;;  %v3251_v51 = vpop.f32.mrb[26].mxu0 }
 0x12d   : > { %v3340_v57 = vpop.f32.mrb[27].mxu1  ;;  %v3252_v58 = vpop.f32.mrb[27].mxu0 }
 0x12e   : > { %v4528_v61 = vadd.f32 %v3338_v48, %v1759_v21  ;;  %v3341_v63 = vadd.f32 %v3340_v57, %v3339_v49  ;;  %v4530_v0 = vadd.f32 %v3252_v58, %v3251_v51  ;;  %v1778_v21 = vadd.f32 %v4498_v15, %v4484_v54 }
 0x12f   : > { %2328 = vmatmul.mubr.bf16.gmra.mrb[132].mxu1 %v4025_v45  ;;  %3705 = vmatmul.mubr.bf16.gmra.mrb[132].mxu0 %v4026_v47 }
 0x130   : > { %v4532_v30 = vadd.f32 %v3341_v63, %v1762_v59  ;;  %2335 = vmatprep.mubr.bf16.mxu1 %v4027_v55  ;;  %3708 = vmatprep.mubr.bf16.mxu0 %v4029_v56  ;;  %v1783_v59 = vadd.f32 %v4506_v26, %v4484_v54 }
 0x132   : > { %v3342_v1 = vpop.f32.mrb[28].mxu1  ;;  %v3254_v3 = vpop.f32.mrb[28].mxu0 }
 0x133   : > { %v3343_v6 = vpop.f32.mrb[29].mxu1  ;;  %v3255_v7 = vpop.f32.mrb[29].mxu0 }
 0x134   : > { %v3344_v10 = vadd.f32 %v3343_v6, %v3342_v1  ;;  %v3345_v13 = vpop.f32.mrb[30].mxu1  ;;  %v4538_v16 = vadd.f32 %v3255_v7, %v3254_v3  ;;  %v3257_v17 = vpop.f32.mrb[30].mxu0 }
 0x135   : > { %v3346_v22 = vpop.f32.mrb[31].mxu1  ;;  %v3258_v23 = vpop.f32.mrb[31].mxu0 }
 0x136   : > { %v4544_v24 = vadd.f32 %v3344_v10, %v1767_v37  ;;  %v3347_v25 = vadd.f32 %v3346_v22, %v3345_v13  ;;  %v4546_v27 = vadd.f32 %v3258_v23, %v3257_v17  ;;  %v1791_v22 = vadd.f32 %v4522_v50, %v4484_v54 }
 0x137   : > { %2336 = vmatmul.mubr.bf16.gmra.mrb[136].mxu1 %v4030_v8  ;;  %3709 = vmatmul.mubr.bf16.gmra.mrb[136].mxu0 %v4031_v9  ;;  %v1786_v8 = vadd.f32 %v4514_v39, %v4484_v54 }
 0x138   : > { %v4548_v46 = vadd.f32 %v3347_v25, %v1770_v5  ;;  %2343 = vmatprep.mubr.bf16.mxu1 %v4032_v18  ;;  %3712 = vmatprep.mubr.bf16.mxu0 %v4034_v19 }
 0x13a   : > { %v3348_v29 = vpop.f32.mrb[32].mxu1  ;;  %v3260_v31 = vpop.f32.mrb[32].mxu0 }
 0x13b   : > { %v3349_v32 = vpop.f32.mrb[33].mxu1  ;;  %v3261_v33 = vpop.f32.mrb[33].mxu0 }
 0x13c   : > { %v3350_v40 = vadd.f32 %v3349_v32, %v3348_v29  ;;  %v3351_v41 = vpop.f32.mrb[34].mxu1  ;;  %v4554_v42 = vadd.f32 %v3261_v33, %v3260_v31  ;;  %v3263_v43 = vpop.f32.mrb[34].mxu0  ;;  %v1794_v32 = vadd.f32 %v4530_v0, %v4484_v54 }
 0x13d   : > { %v3352_v45 = vpop.f32.mrb[35].mxu1  ;;  %v3264_v47 = vpop.f32.mrb[35].mxu0 }
 0x13e   : > { %v4558_v48 = vadd.f32 %v3350_v40, %v1775_v53  ;;  %v3353_v49 = vadd.f32 %v3352_v45, %v3351_v41  ;;  %v3265_v51 = vadd.f32 %v3264_v47, %v3263_v43  ;;  %v1799_v45 = vadd.f32 %v4538_v16, %v4484_v54 }
 0x13f   : > { %2344 = vmatmul.mubr.bf16.gmra.mrb[140].mxu1 %v4035_v34  ;;  %3713 = vmatmul.mubr.bf16.gmra.mrb[140].mxu0 %v4036_v38 }
 0x140   : > { %v4560_v55 = vadd.f32 %v3353_v49, %v1778_v21 }
 0x142   : > { %v3354_v56 = vpop.f32.mrb[36].mxu1  ;;  %v3266_v2 = vpop.f32.mrb[36].mxu0 }
 0x143   : > { %v3355_v57 = vpop.f32.mrb[37].mxu1  ;;  %v3267_v58 = vpop.f32.mrb[37].mxu0 }
 0x144   : > { %v3356_v63 = vadd.f32 %v3355_v57, %v3354_v56  ;;  %v3357_v1 = vpop.f32.mrb[38].mxu1  ;;  %v4564_v3 = vadd.f32 %v3267_v58, %v3266_v2  ;;  %v3269_v15 = vpop.f32.mrb[38].mxu0  ;;  %v1802_v57 = vadd.f32 %v4546_v27, %v4484_v54  ;;  %v1810_v27 = vadd.f32 %v3265_v51, %v4484_v54 }
 0x145   : > { %v3358_v6 = vpop.f32.mrb[39].mxu1  ;;  %v3270_v7 = vpop.f32.mrb[39].mxu0 }
 0x146   : > { %v4568_v9 = vadd.f32 %v3356_v63, %v1783_v59  ;;  %v3359_v37 = vadd.f32 %v3358_v6, %v3357_v1  ;;  %v3271_v10 = vadd.f32 %v3270_v7, %v3269_v15  ;;  %v1815_v51 = vadd.f32 %v4564_v3, %v4484_v54 }
 0x148   : > { %v4570_v13 = vadd.f32 %v3359_v37, %v1786_v8  ;;  %v1807_v8 = vadd.f32 %v4554_v42, %v4484_v54 }
 0x14a   : > { %v3360_v17 = vpop.f32.mrb[40].mxu1  ;;  %v3272_v18 = vpop.f32.mrb[40].mxu0 }
 0x14b   : > { %v3361_v19 = vpop.f32.mrb[41].mxu1  ;;  %v3273_v26 = vpop.f32.mrb[41].mxu0 }
 0x14c   : > { %v3362_v23 = vadd.f32 %v3361_v19, %v3360_v17  ;;  %v3363_v5 = vpop.f32.mrb[42].mxu1  ;;  %v4574_v25 = vadd.f32 %v3273_v26, %v3272_v18  ;;  %v3275_v29 = vpop.f32.mrb[42].mxu0 }
 0x14d   : > { %v3364_v31 = vpop.f32.mrb[43].mxu1  ;;  %v3276_v39 = vpop.f32.mrb[43].mxu0 }
 0x14e   : > { %v4578_v33 = vadd.f32 %v3362_v23, %v1791_v22  ;;  %v3365_v34 = vadd.f32 %v3364_v31, %v3363_v5  ;;  %v4580_v38 = vadd.f32 %v3276_v39, %v3275_v29 }
 0x150   : > { %v4582_v53 = vadd.f32 %v3365_v34, %v1794_v32 }
 0x152   : > { %v3366_v40 = vpop.f32.mrb[44].mxu1  ;;  %v3278_v41 = vpop.f32.mrb[44].mxu0 }
 0x153   : > { %v3367_v50 = vpop.f32.mrb[45].mxu1  ;;  %v3279_v43 = vpop.f32.mrb[45].mxu0 }
 0x154   : > { %v3368_v47 = vadd.f32 %v3367_v50, %v3366_v40  ;;  %v3369_v21 = vpop.f32.mrb[46].mxu1  ;;  %v4586_v49 = vadd.f32 %v3279_v43, %v3278_v41  ;;  %v3281_v56 = vpop.f32.mrb[46].mxu0 }
 0x155   : > { %v3370_v0 = vpop.f32.mrb[47].mxu1  ;;  %v3282_v2 = vpop.f32.mrb[47].mxu0 }
 0x156   : > { %v4590_v58 = vadd.f32 %v3368_v47, %v1799_v45  ;;  %v3371_v59 = vadd.f32 %v3370_v0, %v3369_v21  ;;  %v4592_v63 = vadd.f32 %v3282_v2, %v3281_v56 }
 0x158   : > { %v4594_v1 = vadd.f32 %v3371_v59, %v1802_v57 }
 0x15a   : > { %v3372_v15 = vpop.f32.mrb[48].mxu1  ;;  %v3436_v6 = vpop.f32.mrb[48].mxu0 }
 0x15b   : > { %v3373_v16 = vpop.f32.mrb[49].mxu1  ;;  %v3437_v7 = vpop.f32.mrb[49].mxu0 }
 0x15c   : > { %v3374_v37 = vadd.f32 %v3373_v16, %v3372_v15  ;;  %v3438_v17 = vadd.f32 %v3437_v7, %v3436_v6  ;;  %v3375_v18 = vpop.f32.mrb[50].mxu1  ;;  %v3439_v19 = vpop.f32.mrb[50].mxu0 }
 0x15d   : > { %v3376_v26 = vpop.f32.mrb[51].mxu1  ;;  %v3440_v22 = vpop.f32.mrb[51].mxu0 }
 0x15e   : > { %v4599_v23 = vadd.f32 %v3374_v37, %v1807_v8  ;;  %v4602_v5 = vadd.f32 %v3438_v17, %v4496_v11  ;;  %v3377_v29 = vadd.f32 %v3376_v26, %v3375_v18  ;;  %v3441_v31 = vadd.f32 %v3440_v22, %v3439_v19 }
 0x15f   : > { %v1818_v11 = vadd.f32 %v3271_v10, %v4484_v54  ;;  %v1823_v10 = vadd.f32 %v4574_v25, %v4484_v54 }
 0x160   : > { %v4604_v39 = vadd.f32 %v3377_v29, %v1810_v27  ;;  %v4607_v32 = vadd.f32 %v3441_v31, %v4500_v62 }
 0x162   : > { %v3378_v42 = vpop.f32.mrb[52].mxu1  ;;  %v3442_v34 = vpop.f32.mrb[52].mxu0 }
 0x163   : > { %v3379_v40 = vpop.f32.mrb[53].mxu1  ;;  %v3443_v41 = vpop.f32.mrb[53].mxu0 }
 0x164   : > { %v3380_v50 = vadd.f32 %v3379_v40, %v3378_v42  ;;  %v3444_v43 = vadd.f32 %v3443_v41, %v3442_v34  ;;  %v3381_v45 = vpop.f32.mrb[54].mxu1  ;;  %v3445_v47 = vpop.f32.mrb[54].mxu0 }
 0x165   : > { %v3382_v21 = vpop.f32.mrb[55].mxu1  ;;  %v3446_v56 = vpop.f32.mrb[55].mxu0 }
 0x166   : > { %v4612_v0 = vadd.f32 %v3380_v50, %v1815_v51  ;;  %v4615_v62 = vadd.f32 %v3444_v43, %v4512_v35  ;;  %v3383_v2 = vadd.f32 %v3382_v21, %v3381_v45  ;;  %v3447_v57 = vadd.f32 %v3446_v56, %v3445_v47 }
 0x167   : > { %v1826_v35 = vadd.f32 %v4580_v38, %v4484_v54  ;;  %v1831_v38 = vadd.f32 %v4586_v49, %v4484_v54 }
 0x168   : > { %v4617_v59 = vadd.f32 %v3383_v2, %v1818_v11  ;;  %v4620_v15 = vadd.f32 %v3447_v57, %v4516_v14 }
 0x16a   : > { %v3384_v3 = vpop.f32.mrb[56].mxu1  ;;  %v3448_v6 = vpop.f32.mrb[56].mxu0 }
 0x16b   : > { %v3385_v16 = vpop.f32.mrb[57].mxu1  ;;  %v3449_v7 = vpop.f32.mrb[57].mxu0 }
 0x16c   : > { %v3386_v8 = vadd.f32 %v3385_v16, %v3384_v3  ;;  %v3450_v37 = vadd.f32 %v3449_v7, %v3448_v6  ;;  %v3387_v17 = vpop.f32.mrb[58].mxu1  ;;  %v3451_v18 = vpop.f32.mrb[58].mxu0 }
 0x16d   : > { %v3388_v19 = vpop.f32.mrb[59].mxu1  ;;  %v3452_v27 = vpop.f32.mrb[59].mxu0 }
 0x16e   : > { %v4626_v26 = vadd.f32 %v3386_v8, %v1823_v10  ;;  %v4629_v14 = vadd.f32 %v3450_v37, %v4528_v61  ;;  %v3389_v22 = vadd.f32 %v3388_v19, %v3387_v17  ;;  %v3453_v29 = vadd.f32 %v3452_v27, %v3451_v18 }
 0x16f   : > { %v1834_v61 = vadd.f32 %v4592_v63, %v4484_v54  ;;  %v1839_v63 = vadd.f32 %v4435_v60, %v4484_v54 }
 0x170   : > { %v4631_v31 = vadd.f32 %v3389_v22, %v1826_v35  ;;  %v4634_v25 = vadd.f32 %v3453_v29, %v4532_v30 }
 0x172   : > { %v3390_v42 = vpop.f32.mrb[60].mxu1  ;;  %v3454_v34 = vpop.f32.mrb[60].mxu0 }
 0x173   : > { %v3391_v40 = vpop.f32.mrb[61].mxu1  ;;  %v3455_v41 = vpop.f32.mrb[61].mxu0 }
 0x174   : > { %v3392_v51 = vadd.f32 %v3391_v40, %v3390_v42  ;;  %v3456_v50 = vadd.f32 %v3455_v41, %v3454_v34  ;;  %v3393_v43 = vpop.f32.mrb[62].mxu1  ;;  %v3457_v45 = vpop.f32.mrb[62].mxu0 }
 0x175   : > { %v3394_v47 = vpop.f32.mrb[63].mxu1  ;;  %v3458_v11 = vpop.f32.mrb[63].mxu0 }
 0x176   : > { %v4640_v21 = vadd.f32 %v3392_v51, %v1831_v38  ;;  %v4643_v30 = vadd.f32 %v3456_v50, %v4544_v24  ;;  %v3395_v56 = vadd.f32 %v3394_v47, %v3393_v43  ;;  %v3459_v2 = vadd.f32 %v3458_v11, %v3457_v45 }
 0x177   : > { %v1842_v24 = vadd.f32 %v4441_v4, %v4484_v54  ;;  %v1847_v4 = vadd.f32 %v4447_v12, %v4484_v54 }
 0x178   : > { %v4645_v57 = vadd.f32 %v3395_v56, %v1834_v61  ;;  %v4648_v49 = vadd.f32 %v3459_v2, %v4548_v46 }
 0x17a   : > { %v3396_v3 = vpop.f32.mrb[64].mxu1  ;;  %v3460_v6 = vpop.f32.mrb[64].mxu0 }
 0x17b   : > { %v3397_v16 = vpop.f32.mrb[65].mxu1  ;;  %v3461_v7 = vpop.f32.mrb[65].mxu0 }
 0x17c   : > { %v3398_v10 = vadd.f32 %v3397_v16, %v3396_v3  ;;  %v3462_v8 = vadd.f32 %v3461_v7, %v3460_v6  ;;  %v3399_v37 = vpop.f32.mrb[66].mxu1  ;;  %v3463_v17 = vpop.f32.mrb[66].mxu0 }
 0x17d   : > { %v3400_v18 = vpop.f32.mrb[67].mxu1  ;;  %v3464_v35 = vpop.f32.mrb[67].mxu0 }
 0x17e   : > { %v4654_v19 = vadd.f32 %v3398_v10, %v1839_v63  ;;  %v4657_v46 = vadd.f32 %v3462_v8, %v4558_v48  ;;  %v3401_v27 = vadd.f32 %v3400_v18, %v3399_v37  ;;  %v3465_v22 = vadd.f32 %v3464_v35, %v3463_v17 }
 0x17f   : > { %v1850_v48 = vadd.f32 %v4453_v20, %v4484_v54  ;;  %v1855_v20 = vadd.f32 %v4459_v28, %v4484_v54 }
 0x180   : > { %v4659_v29 = vadd.f32 %v3401_v27, %v1842_v24  ;;  %v4662_v60 = vadd.f32 %v3465_v22, %v4560_v55 }
 0x182   : > { %v3402_v42 = vpop.f32.mrb[68].mxu1  ;;  %v3466_v34 = vpop.f32.mrb[68].mxu0 }
 0x183   : > { %v3403_v40 = vpop.f32.mrb[69].mxu1  ;;  %v3467_v41 = vpop.f32.mrb[69].mxu0 }
 0x184   : > { %v3404_v38 = vadd.f32 %v3403_v40, %v3402_v42  ;;  %v3468_v51 = vadd.f32 %v3467_v41, %v3466_v34  ;;  %v3405_v50 = vpop.f32.mrb[70].mxu1  ;;  %v3469_v43 = vpop.f32.mrb[70].mxu0 }
 0x185   : > { %v3406_v45 = vpop.f32.mrb[71].mxu1  ;;  %v3470_v61 = vpop.f32.mrb[71].mxu0 }
 0x186   : > { %v4668_v47 = vadd.f32 %v3404_v38, %v1847_v4  ;;  %v4671_v55 = vadd.f32 %v3468_v51, %v4568_v9  ;;  %v3407_v11 = vadd.f32 %v3406_v45, %v3405_v50  ;;  %v3471_v56 = vadd.f32 %v3470_v61, %v3469_v43 }
 0x187   : > { %v1858_v9 = vadd.f32 %v4465_v36, %v4484_v54  ;;  %v1863_v36 = vadd.f32 %v4471_v44, %v4484_v54 }
 0x188   : > { %v4673_v2 = vadd.f32 %v3407_v11, %v1850_v48  ;;  %v4676_v12 = vadd.f32 %v3471_v56, %v4570_v13 }
 0x18a   : > { %v3408_v3 = vpop.f32.mrb[72].mxu1  ;;  %v3472_v6 = vpop.f32.mrb[72].mxu0 }
 0x18b   : > { %v3409_v16 = vpop.f32.mrb[73].mxu1  ;;  %v3473_v7 = vpop.f32.mrb[73].mxu0 }
 0x18c   : > { %v3410_v63 = vadd.f32 %v3409_v16, %v3408_v3  ;;  %v3474_v10 = vadd.f32 %v3473_v7, %v3472_v6  ;;  %v3411_v8 = vpop.f32.mrb[74].mxu1  ;;  %v3475_v37 = vpop.f32.mrb[74].mxu0 }
 0x18d   : > { %v3412_v17 = vpop.f32.mrb[75].mxu1  ;;  %v3476_v24 = vpop.f32.mrb[75].mxu0 }
 0x18e   : > { %v4682_v18 = vadd.f32 %v3410_v63, %v1855_v20  ;;  %v4685_v13 = vadd.f32 %v3474_v10, %v4578_v33  ;;  %v3413_v35 = vadd.f32 %v3412_v17, %v3411_v8  ;;  %v3477_v27 = vadd.f32 %v3476_v24, %v3475_v37 }
 0x18f   : > { %v1866_v33 = vadd.f32 %v4477_v52, %v4484_v54 }
 0x190   : > { %v4687_v22 = vadd.f32 %v3413_v35, %v1858_v9  ;;  %v4690_v28 = vadd.f32 %v3477_v27, %v4582_v53 }
 0x192   : > { %v3414_v42 = vpop.f32.mrb[76].mxu1  ;;  %v3478_v34 = vpop.f32.mrb[76].mxu0 }
 0x193   : > { %v3415_v40 = vpop.f32.mrb[77].mxu1  ;;  %v3479_v41 = vpop.f32.mrb[77].mxu0 }
 0x194   : > { %v3416_v4 = vadd.f32 %v3415_v40, %v3414_v42  ;;  %v3480_v38 = vadd.f32 %v3479_v41, %v3478_v34  ;;  %v3417_v51 = vpop.f32.mrb[78].mxu1  ;;  %v3481_v50 = vpop.f32.mrb[78].mxu0 }
 0x195   : > { %v3418_v43 = vpop.f32.mrb[79].mxu1  ;;  %v3482_v48 = vpop.f32.mrb[79].mxu0 }
 0x196   : > { %v4696_v45 = vadd.f32 %v3416_v4, %v1863_v36  ;;  %v4699_v53 = vadd.f32 %v3480_v38, %v4590_v58  ;;  %v3419_v61 = vadd.f32 %v3418_v43, %v3417_v51  ;;  %v3483_v11 = vadd.f32 %v3482_v48, %v3481_v50 }
 0x198   : > { %v4701_v56 = vadd.f32 %v3419_v61, %v1866_v33  ;;  %v4704_v44 = vadd.f32 %v3483_v11, %v4594_v1 }
 0x19a   : > { %v3484_v3 = vpop.f32.mrb[80].mxu0  ;;  %v3548_v6 = vpop.f32.mrb[80].mxu1 }
 0x19b   : > { %v3485_v16 = vpop.f32.mrb[81].mxu0  ;;  %v3549_v7 = vpop.f32.mrb[81].mxu1 }
 0x19c   : > { %v3486_v20 = vadd.f32 %v3485_v16, %v3484_v3  ;;  %v3550_v52 = vadd.f32 %v3549_v7, %v3548_v6  ;;  %v3487_v54 = vpop.f32.mrb[82].mxu0  ;;  %v3551_v63 = vpop.f32.mrb[82].mxu1 }
 0x19d   : > { %v3488_v10 = vpop.f32.mrb[83].mxu0  ;;  %v3552_v8 = vpop.f32.mrb[83].mxu1 }
 0x19e   : > { %v4707_v58 = vadd.f32 %v3486_v20, %v4599_v23  ;;  %v3489_v37 = vadd.f32 %v3488_v10, %v3487_v54  ;;  %v3553_v9 = vadd.f32 %v3552_v8, %v3551_v63  ;;  %v4710_v17 = vadd.f32 %v3550_v52, %v4602_v5 }
 0x1a0   : > { %v4713_v1 = vadd.f32 %v3489_v37, %v4604_v39  ;;  %v4716_v24 = vadd.f32 %v3553_v9, %v4607_v32 }
 0x1a2   : > { %v3490_v35 = vpop.f32.mrb[84].mxu0  ;;  %v3554_v27 = vpop.f32.mrb[84].mxu1 }
 0x1a3   : > { %v3491_v42 = vpop.f32.mrb[85].mxu0  ;;  %v3555_v34 = vpop.f32.mrb[85].mxu1 }
 0x1a4   : > { %v3492_v40 = vadd.f32 %v3491_v42, %v3490_v35  ;;  %v3556_v41 = vadd.f32 %v3555_v34, %v3554_v27  ;;  %v3493_v36 = vpop.f32.mrb[86].mxu0  ;;  %v3557_v23 = vpop.f32.mrb[86].mxu1 }
 0x1a5   : > { %v3494_v4 = vpop.f32.mrb[87].mxu0  ;;  %v3558_v38 = vpop.f32.mrb[87].mxu1 }
 0x1a6   : > { %v4719_v51 = vadd.f32 %v3492_v40, %v4612_v0  ;;  %v3495_v5 = vadd.f32 %v3494_v4, %v3493_v36  ;;  %v3559_v50 = vadd.f32 %v3558_v38, %v3557_v23  ;;  %v4722_v39 = vadd.f32 %v3556_v41, %v4615_v62 }
 0x1a8   : > { %v4725_v32 = vadd.f32 %v3495_v5, %v4617_v59  ;;  %v4728_v33 = vadd.f32 %v3559_v50, %v4620_v15 }
 0x1aa   : > { %v3496_v43 = vpop.f32.mrb[88].mxu0  ;;  %v3560_v48 = vpop.f32.mrb[88].mxu1 }
 0x1ab   : > { %v3497_v61 = vpop.f32.mrb[89].mxu0  ;;  %v3561_v11 = vpop.f32.mrb[89].mxu1 }
 0x1ac   : > { %v3498_v3 = vadd.f32 %v3497_v61, %v3496_v43  ;;  %v3562_v6 = vadd.f32 %v3561_v11, %v3560_v48  ;;  %v3499_v16 = vpop.f32.mrb[90].mxu0  ;;  %v3563_v0 = vpop.f32.mrb[90].mxu1 }
 0x1ad   : > { %v3500_v7 = vpop.f32.mrb[91].mxu0  ;;  %v3564_v20 = vpop.f32.mrb[91].mxu1 }
 0x1ae   : > { %v4731_v52 = vadd.f32 %v3498_v3, %v4626_v26  ;;  %v3501_v62 = vadd.f32 %v3500_v7, %v3499_v16  ;;  %v3565_v54 = vadd.f32 %v3564_v20, %v3563_v0  ;;  %v4734_v59 = vadd.f32 %v3562_v6, %v4629_v14 }
 0x1b0   : > { %v4737_v15 = vadd.f32 %v3501_v62, %v4631_v31  ;;  %v4740_v63 = vadd.f32 %v3565_v54, %v4634_v25 }
 0x1b2   : > { %v3502_v10 = vpop.f32.mrb[92].mxu0  ;;  %v3566_v8 = vpop.f32.mrb[92].mxu1 }
 0x1b3   : > { %v3503_v37 = vpop.f32.mrb[93].mxu0  ;;  %v3567_v9 = vpop.f32.mrb[93].mxu1 }
 0x1b4   : > { %v3504_v35 = vadd.f32 %v3503_v37, %v3502_v10  ;;  %v3568_v27 = vadd.f32 %v3567_v9, %v3566_v8  ;;  %v3505_v42 = vpop.f32.mrb[94].mxu0  ;;  %v3569_v26 = vpop.f32.mrb[94].mxu1 }
 0x1b5   : > { %v3506_v34 = vpop.f32.mrb[95].mxu0  ;;  %v3570_v40 = vpop.f32.mrb[95].mxu1 }
 0x1b6   : > { %v4743_v41 = vadd.f32 %v3504_v35, %v4640_v21  ;;  %v3507_v14 = vadd.f32 %v3506_v34, %v3505_v42  ;;  %v3571_v36 = vadd.f32 %v3570_v40, %v3569_v26  ;;  %v4746_v31 = vadd.f32 %v3568_v27, %v4643_v30 }
 0x1b8   : > { %v4749_v25 = vadd.f32 %v3507_v14, %v4645_v57  ;;  %v4752_v23 = vadd.f32 %v3571_v36, %v4648_v49 }
 0x1ba   : > { %v3508_v4 = vpop.f32.mrb[96].mxu0  ;;  %v3572_v38 = vpop.f32.mrb[96].mxu1 }
 0x1bb   : > { %v3509_v5 = vpop.f32.mrb[97].mxu0  ;;  %v3573_v50 = vpop.f32.mrb[97].mxu1 }
 0x1bc   : > { %v3510_v43 = vadd.f32 %v3509_v5, %v3508_v4  ;;  %v3574_v48 = vadd.f32 %v3573_v50, %v3572_v38  ;;  %v3511_v61 = vpop.f32.mrb[98].mxu0  ;;  %v3575_v21 = vpop.f32.mrb[98].mxu1 }
 0x1bd   : > { %v3512_v11 = vpop.f32.mrb[99].mxu0  ;;  %v3576_v3 = vpop.f32.mrb[99].mxu1 }
 0x1be   : > { %v4755_v6 = vadd.f32 %v3510_v43, %v4654_v19  ;;  %v3513_v30 = vadd.f32 %v3512_v11, %v3511_v61  ;;  %v3577_v16 = vadd.f32 %v3576_v3, %v3575_v21  ;;  %v4758_v57 = vadd.f32 %v3574_v48, %v4657_v46 }
 0x1c0   : > { %v4761_v49 = vadd.f32 %v3513_v30, %v4659_v29  ;;  %v4764_v0 = vadd.f32 %v3577_v16, %v4662_v60 }
 0x1c2   : > { %v3514_v7 = vpop.f32.mrb[100].mxu0  ;;  %v3578_v20 = vpop.f32.mrb[100].mxu1 }
 0x1c3   : > { %v3515_v62 = vpop.f32.mrb[101].mxu0  ;;  %v3579_v54 = vpop.f32.mrb[101].mxu1 }
 0x1c4   : > { %v3516_v10 = vadd.f32 %v3515_v62, %v3514_v7  ;;  %v3580_v8 = vadd.f32 %v3579_v54, %v3578_v20  ;;  %v3517_v37 = vpop.f32.mrb[102].mxu0  ;;  %v3581_v19 = vpop.f32.mrb[102].mxu1 }
 0x1c5   : > { %v3518_v9 = vpop.f32.mrb[103].mxu0  ;;  %v3582_v35 = vpop.f32.mrb[103].mxu1 }
 0x1c6   : > { %v4767_v27 = vadd.f32 %v3516_v10, %v4668_v47  ;;  %v3519_v46 = vadd.f32 %v3518_v9, %v3517_v37  ;;  %v3583_v42 = vadd.f32 %v3582_v35, %v3581_v19  ;;  %v4770_v29 = vadd.f32 %v3580_v8, %v4671_v55 }
 0x1c8   : > { %v4773_v60 = vadd.f32 %v3519_v46, %v4673_v2  ;;  %v4776_v26 = vadd.f32 %v3583_v42, %v4676_v12 }
 0x1ca   : > { %v3520_v34 = vpop.f32.mrb[104].mxu0  ;;  %v3584_v40 = vpop.f32.mrb[104].mxu1 }
 0x1cb   : > { %v3521_v14 = vpop.f32.mrb[105].mxu0  ;;  %v3585_v36 = vpop.f32.mrb[105].mxu1 }
 0x1cc   : > { %v3522_v4 = vadd.f32 %v3521_v14, %v3520_v34  ;;  %v3586_v38 = vadd.f32 %v3585_v36, %v3584_v40  ;;  %v3523_v5 = vpop.f32.mrb[106].mxu0  ;;  %v3587_v47 = vpop.f32.mrb[106].mxu1 }
 0x1cd   : > { %v3524_v50 = vpop.f32.mrb[107].mxu0  ;;  %v3588_v43 = vpop.f32.mrb[107].mxu1 }
 0x1ce   : > { %v4779_v48 = vadd.f32 %v3522_v4, %v4682_v18  ;;  %v3525_v55 = vadd.f32 %v3524_v50, %v3523_v5  ;;  %v3589_v61 = vadd.f32 %v3588_v43, %v3587_v47  ;;  %v4782_v2 = vadd.f32 %v3586_v38, %v4685_v13 }
 0x1d0   : > { %v4785_v12 = vadd.f32 %v3525_v55, %v4687_v22  ;;  %v4788_v21 = vadd.f32 %v3589_v61, %v4690_v28 }
 0x1d2   : > { %v3526_v11 = vpop.f32.mrb[108].mxu0  ;;  %v3590_v3 = vpop.f32.mrb[108].mxu1 }
 0x1d3   : > { %v3527_v30 = vpop.f32.mrb[109].mxu0  ;;  %v3591_v16 = vpop.f32.mrb[109].mxu1 }
 0x1d4   : > { %v3528_v7 = vadd.f32 %v3527_v30, %v3526_v11  ;;  %v3592_v20 = vadd.f32 %v3591_v16, %v3590_v3  ;;  %v3529_v62 = vpop.f32.mrb[110].mxu0  ;;  %v3593_v18 = vpop.f32.mrb[110].mxu1 }
 0x1d5   : > { %v3530_v54 = vpop.f32.mrb[111].mxu0  ;;  %v3594_v10 = vpop.f32.mrb[111].mxu1 }
 0x1d6   : > { %v4791_v13 = vadd.f32 %v3528_v7, %v4696_v45  ;;  %v3531_v8 = vadd.f32 %v3530_v54, %v3529_v62  ;;  %v3595_v22 = vadd.f32 %v3594_v10, %v3593_v18  ;;  %v4794_v37 = vadd.f32 %v3592_v20, %v4699_v53 }
 0x1d8   : > { %v4797_v28 = vadd.f32 %v3531_v8, %v4701_v56  ;;  %v4800_v19 = vadd.f32 %v3595_v22, %v4704_v44 }
 0x1da   : > { %v3596_v9 = vpop.f32.mrb[112].mxu1  ;;  %v3686_v35 = vpop.f32.mrb[112].mxu0 }
 0x1db   : > { %v2395_v46 = vadd.f32 %v3686_v35, %v4722_v39  ;;  %v3597_v42 = vpop.f32.mrb[113].mxu1  ;;  %v2386_v34 = vpop.f32.mrb[113].mxu0 }
 0x1dc   : > { %v3598_v40 = vadd.f32 %v3597_v42, %v3596_v9  ;;  %v2387_v45 = vadd.f32 %v2386_v34, %v4710_v17  ;;  %v3599_v14 = vpop.f32.mrb[114].mxu1  ;;  %v3687_v36 = vpop.f32.mrb[114].mxu0 }
 0x1dd   : > { %v2398_v53 = vadd.f32 %v3687_v36, %v4728_v33  ;;  %v3600_v4 = vpop.f32.mrb[115].mxu1  ;;  %v2389_v56 = vpop.f32.mrb[115].mxu0  ;;  %v2515_v47 = vmax.f32 %v2395_v46, 0.0 }
 0x1de   : > { %v3601_v38 = vadd.f32 %v3600_v4, %v3599_v14  ;;  %v2390_v44 = vadd.f32 %v2389_v56, %v4716_v24  ;;  %v4808_v5 = vadd.f32 %v3598_v40, %v4707_v58  ;;  %v2513_v50 = vmax.f32 %v2387_v45, 0.0 }
 0x1df   : > { %v2516_v39 = vmax.f32 %v2398_v53, 0.0 }
 0x1e0   : > { %v2514_v17 = vmax.f32 %v2390_v44, 0.0  ;;  %v4816_v33 = vadd.f32 %v3601_v38, %v4713_v1 }
 0x1e1   : > { %v3109_v43 = vpack.c.bf16 %v2516_v39, %v2515_v47 }
 0x1e2   : > { %v3104_v55 = vpack.c.bf16 %v2514_v17, %v2513_v50  ;;  %v3602_v24 = vpop.f32.mrb[116].mxu1  ;;  %v3690_v61 = vpop.f32.mrb[116].mxu0 }
 0x1e3   : > { %3181 = vst [vmem:[%s4813_s9 + $0x8] sm:$0xff] %v3109_v43   ;;  %v2411_v58 = vadd.f32 %v3690_v61, %v4746_v31  ;;  %v3603_v11 = vpop.f32.mrb[117].mxu1  ;;  %v2402_v3 = vpop.f32.mrb[117].mxu0 }
 0x1e4   : > { %3105 = vst [vmem:[%s4813_s9] sm:$0xff] %v3104_v55   ;;  %v3604_v30 = vadd.f32 %v3603_v11, %v3602_v24  ;;  %v2403_v16 = vadd.f32 %v2402_v3, %v4734_v59  ;;  %v3605_v7 = vpop.f32.mrb[118].mxu1  ;;  %v3691_v20 = vpop.f32.mrb[118].mxu0 }
 0x1e5   : > { %v2414_v62 = vadd.f32 %v3691_v20, %v4752_v23  ;;  %v3606_v1 = vpop.f32.mrb[119].mxu1  ;;  %v2405_v18 = vpop.f32.mrb[119].mxu0  ;;  %v2519_v31 = vmax.f32 %v2411_v58, 0.0 }
 0x1e6   : > { %v3607_v54 = vadd.f32 %v3606_v1, %v3605_v7  ;;  %v2406_v10 = vadd.f32 %v2405_v18, %v4740_v63  ;;  %v2298_v8 = vadd.f32 %v3604_v30, %v4719_v51  ;;  %v2517_v9 = vmax.f32 %v2403_v16, 0.0 }
 0x1e7   : > { %v2520_v22 = vmax.f32 %v2414_v62, 0.0 }
 0x1e8   : > { %v2518_v35 = vmax.f32 %v2406_v10, 0.0  ;;  %v2301_v46 = vadd.f32 %v3607_v54, %v4725_v32 }
 0x1e9   : > { %v3119_v59 = vpack.c.bf16 %v2520_v22, %v2519_v31 }
 0x1ea   : > { %v3114_v42 = vpack.c.bf16 %v2518_v35, %v2517_v9  ;;  %v3608_v34 = vpop.f32.mrb[120].mxu1  ;;  %v3694_v40 = vpop.f32.mrb[120].mxu0 }
 0x1eb   : > { %3183 = vst [vmem:[%s4813_s9 + $0x18] sm:$0xff] %v3119_v59   ;;  %v2427_v23 = vadd.f32 %v3694_v40, %v4770_v29  ;;  %v3609_v45 = vpop.f32.mrb[121].mxu1  ;;  %v2418_v14 = vpop.f32.mrb[121].mxu0 }
 0x1ec   : > { %3182 = vst [vmem:[%s4813_s9 + $0x10] sm:$0xff] %v3114_v42   ;;  %v3610_v36 = vadd.f32 %v3609_v45, %v3608_v34  ;;  %v2419_v63 = vadd.f32 %v2418_v14, %v4758_v57  ;;  %v3611_v51 = vpop.f32.mrb[122].mxu1  ;;  %v3695_v53 = vpop.f32.mrb[122].mxu0 }
 0x1ed   : > { %v2430_v4 = vadd.f32 %v3695_v53, %v4776_v26  ;;  %v3612_v56 = vpop.f32.mrb[123].mxu1  ;;  %v2421_v32 = vpop.f32.mrb[123].mxu0  ;;  %v2523_v29 = vmax.f32 %v2427_v23, 0.0 }
 0x1ee   : > { %v3613_v38 = vadd.f32 %v3612_v56, %v3611_v51  ;;  %v2422_v44 = vadd.f32 %v2421_v32, %v4764_v0  ;;  %v4833_v47 = vadd.f32 %v3610_v36, %v4731_v52  ;;  %v2521_v50 = vmax.f32 %v2419_v63, 0.0 }
 0x1ef   : > { %v2524_v39 = vmax.f32 %v2430_v4, 0.0 }
 0x1f0   : > { %v2522_v17 = vmax.f32 %v2422_v44, 0.0  ;;  %v4836_v57 = vadd.f32 %v3613_v38, %v4737_v15 }
 0x1f1   : > { %v3129_v43 = vpack.c.bf16 %v2524_v39, %v2523_v29 }
 0x1f2   : > { %v3124_v55 = vpack.c.bf16 %v2522_v17, %v2521_v50  ;;  %v3614_v24 = vpop.f32.mrb[124].mxu1  ;;  %v3698_v26 = vpop.f32.mrb[124].mxu0 }
 0x1f3   : > { %3185 = vst [vmem:[%s4813_s9 + $0x28] sm:$0xff] %v3129_v43   ;;  %v2443_v61 = vadd.f32 %v3698_v26, %v4794_v37  ;;  %v3615_v58 = vpop.f32.mrb[125].mxu1  ;;  %v2434_v11 = vpop.f32.mrb[125].mxu0 }
 0x1f4   : > { %3184 = vst [vmem:[%s4813_s9 + $0x20] sm:$0xff] %v3124_v55   ;;  %v3616_v0 = vadd.f32 %v3615_v58, %v3614_v24  ;;  %v2435_v52 = vadd.f32 %v2434_v11, %v4782_v2  ;;  %v3617_v3 = vpop.f32.mrb[126].mxu1  ;;  %v3699_v30 = vpop.f32.mrb[126].mxu0 }
 0x1f5   : > { %v2446_v16 = vadd.f32 %v3699_v30, %v4800_v19  ;;  %v3618_v15 = vpop.f32.mrb[127].mxu1  ;;  %v2437_v7 = vpop.f32.mrb[127].mxu0  ;;  %v2527_v37 = vmax.f32 %v2443_v61, 0.0 }
 0x1f6   : > { %v3619_v20 = vadd.f32 %v3618_v15, %v3617_v3  ;;  %v2438_v62 = vadd.f32 %v2437_v7, %v4788_v21  ;;  %v2314_v1 = vadd.f32 %v3616_v0, %v4743_v41  ;;  %v2525_v54 = vmax.f32 %v2435_v52, 0.0 }
 0x1f7   : > { %v2528_v18 = vmax.f32 %v2446_v16, 0.0 }
 0x1f8   : > { %v2526_v10 = vmax.f32 %v2438_v62, 0.0  ;;  %v2317_v31 = vadd.f32 %v3619_v20, %v4749_v25 }
 0x1f9   : > { %v3139_v2 = vpack.c.bf16 %v2528_v18, %v2527_v37 }
 0x1fa   : > { %v3134_v22 = vpack.c.bf16 %v2526_v10, %v2525_v54  ;;  %v3620_v9 = vpop.f32.mrb[128].mxu1  ;;  %v3702_v35 = vpop.f32.mrb[128].mxu0 }
 0x1fb   : > { %3187 = vst [vmem:[%s4813_s9 + $0x38] sm:$0xff] %v3139_v2   ;;  %v2459_v19 = vadd.f32 %v3702_v35, %v2298_v8  ;;  %v3621_v59 = vpop.f32.mrb[129].mxu1  ;;  %v2450_v42 = vpop.f32.mrb[129].mxu0 }
 0x1fc   : > { %3186 = vst [vmem:[%s4813_s9 + $0x30] sm:$0xff] %v3134_v22   ;;  %v3622_v34 = vadd.f32 %v3621_v59, %v3620_v9  ;;  %v2451_v21 = vadd.f32 %v2450_v42, %v4808_v5  ;;  %v3623_v40 = vpop.f32.mrb[130].mxu1  ;;  %v3703_v41 = vpop.f32.mrb[130].mxu0 }
 0x1fd   : > { %v2462_v23 = vadd.f32 %v3703_v41, %v2301_v46  ;;  %v3624_v45 = vpop.f32.mrb[131].mxu1  ;;  %v2453_v14 = vpop.f32.mrb[131].mxu0  ;;  %v2531_v51 = vmax.f32 %v2459_v19, 0.0 }
 0x1fe   : > { %v3625_v36 = vadd.f32 %v3624_v45, %v3623_v40  ;;  %v2454_v25 = vadd.f32 %v2453_v14, %v4816_v33  ;;  %v2322_v63 = vadd.f32 %v3622_v34, %v4755_v6  ;;  %v2529_v53 = vmax.f32 %v2451_v21, 0.0 }
 0x1ff   : > { %v2532_v8 = vmax.f32 %v2462_v23, 0.0 }
 0x200   : > { %v2530_v4 = vmax.f32 %v2454_v25, 0.0  ;;  %v2325_v56 = vadd.f32 %v3625_v36, %v4761_v49 }
 0x201   : > { %v3149_v32 = vpack.c.bf16 %v2532_v8, %v2531_v51 }
 0x202   : > { %v3144_v5 = vpack.c.bf16 %v2530_v4, %v2529_v53  ;;  %v3626_v38 = vpop.f32.mrb[132].mxu1  ;;  %v3706_v44 = vpop.f32.mrb[132].mxu0 }
 0x203   : > { %3189 = vst [vmem:[%s4813_s9 + $0x48] sm:$0xff] %v3149_v32   ;;  %v2475_v46 = vadd.f32 %v3706_v44, %v2314_v1  ;;  %v3627_v29 = vpop.f32.mrb[133].mxu1  ;;  %v2466_v39 = vpop.f32.mrb[133].mxu0 }
 0x204   : > { %3188 = vst [vmem:[%s4813_s9 + $0x40] sm:$0xff] %v3144_v5   ;;  %v3628_v50 = vadd.f32 %v3627_v29, %v3626_v38  ;;  %v2467_v33 = vadd.f32 %v2466_v39, %v4833_v47  ;;  %v3629_v17 = vpop.f32.mrb[134].mxu1  ;;  %v3707_v6 = vpop.f32.mrb[134].mxu0 }
 0x205   : > { %v2478_v43 = vadd.f32 %v3707_v6, %v2317_v31  ;;  %v3630_v55 = vpop.f32.mrb[135].mxu1  ;;  %v2469_v24 = vpop.f32.mrb[135].mxu0  ;;  %v2535_v58 = vmax.f32 %v2475_v46, 0.0 }
 0x206   : > { %v3631_v26 = vadd.f32 %v3630_v55, %v3629_v17  ;;  %v2470_v49 = vadd.f32 %v2469_v24, %v4836_v57  ;;  %v2330_v61 = vadd.f32 %v3628_v50, %v4767_v27  ;;  %v2533_v0 = vmax.f32 %v2467_v33, 0.0 }
 0x207   : > { %v2536_v11 = vmax.f32 %v2478_v43, 0.0 }
 0x208   : > { %v2534_v52 = vmax.f32 %v2470_v49, 0.0  ;;  %v2333_v3 = vadd.f32 %v3631_v26, %v4773_v60 }
 0x209   : > { %v3159_v30 = vpack.c.bf16 %v2536_v11, %v2535_v58 }
 0x20a   : > { %v3154_v47 = vpack.c.bf16 %v2534_v52, %v2533_v0  ;;  %v3632_v16 = vpop.f32.mrb[136].mxu1  ;;  %v3710_v15 = vpop.f32.mrb[136].mxu0 }
 0x20b   : > { %3191 = vst [vmem:[%s4813_s9 + $0x58] sm:$0xff] %v3159_v30   ;;  %v2491_v7 = vadd.f32 %v3710_v15, %v2330_v61  ;;  %v3633_v20 = vpop.f32.mrb[137].mxu1  ;;  %v2482_v62 = vpop.f32.mrb[137].mxu0 }
 0x20c   : > { %3190 = vst [vmem:[%s4813_s9 + $0x50] sm:$0xff] %v3154_v47   ;;  %v3634_v1 = vadd.f32 %v3633_v20, %v3632_v16  ;;  %v2483_v37 = vadd.f32 %v2482_v62, %v2322_v63  ;;  %v3635_v57 = vpop.f32.mrb[138].mxu1  ;;  %v3711_v18 = vpop.f32.mrb[138].mxu0 }
 0x20d   : > { %v2494_v27 = vadd.f32 %v3711_v18, %v2333_v3  ;;  %v3636_v54 = vpop.f32.mrb[139].mxu1  ;;  %v2485_v10 = vpop.f32.mrb[139].mxu0  ;;  %v2539_v22 = vmax.f32 %v2491_v7, 0.0 }
 0x20e   : > { %v3637_v31 = vadd.f32 %v3636_v54, %v3635_v57  ;;  %v2486_v60 = vadd.f32 %v2485_v10, %v2325_v56  ;;  %v2338_v2 = vadd.f32 %v3634_v1, %v4779_v48  ;;  %v2537_v35 = vmax.f32 %v2483_v37, 0.0 }
 0x20f   : > { %v2540_v9 = vmax.f32 %v2494_v27, 0.0 }
 0x210   : > { %v2538_v19 = vmax.f32 %v2486_v60, 0.0  ;;  %v2341_v59 = vadd.f32 %v3637_v31, %v4785_v12 }
 0x211   : > { %v3169_v42 = vpack.c.bf16 %v2540_v9, %v2539_v22 }
 0x212   : > { %v3164_v34 = vpack.c.bf16 %v2538_v19, %v2537_v35  ;;  %v3638_v21 = vpop.f32.mrb[140].mxu1  ;;  %v3714_v40 = vpop.f32.mrb[140].mxu0 }
 0x213   : > { %3193 = vst [vmem:[%s4813_s9 + $0x68] sm:$0xff] %v3169_v42   ;;  %v3639_v41 = vpop.f32.mrb[141].mxu1  ;;  %v2498_v23 = vpop.f32.mrb[141].mxu0 }
 0x214   : > { %3192 = vst [vmem:[%s4813_s9 + $0x60] sm:$0xff] %v3164_v34   ;;  %v3640_v45 = vadd.f32 %v3639_v41, %v3638_v21  ;;  %v2499_v14 = vadd.f32 %v2498_v23, %v2338_v2  ;;  %v3641_v36 = vpop.f32.mrb[142].mxu1  ;;  %v3715_v25 = vpop.f32.mrb[142].mxu0 }
 0x215   : > { %v3642_v48 = vpop.f32.mrb[143].mxu1  ;;  %v2501_v63 = vpop.f32.mrb[143].mxu0 }
 0x216   : > { %v2346_v51 = vadd.f32 %v3640_v45, %v4791_v13  ;;  %v3643_v8 = vadd.f32 %v3642_v48, %v3641_v36  ;;  %v2502_v12 = vadd.f32 %v2501_v63, %v2341_v59  ;;  %v2541_v4 = vmax.f32 %v2499_v14, 0.0 }
 0x218   : > { %v2507_v53 = vadd.f32 %v3714_v40, %v2346_v51  ;;  %v2349_v56 = vadd.f32 %v3643_v8, %v4797_v28  ;;  %v2542_v32 = vmax.f32 %v2502_v12, 0.0 }
 0x21a   : > { %v2510_v5 = vadd.f32 %v3715_v25, %v2349_v56  ;;  %v3174_v38 = vpack.c.bf16 %v2542_v32, %v2541_v4  ;;  %v2543_v44 = vmax.f32 %v2507_v53, 0.0 }
 0x21c   : > { %v2544_v46 = vmax.f32 %v2510_v5, 0.0  ;;  %3194 = vst [vmem:[%s4813_s9 + $0x70] sm:$0xff] %v3174_v38  }
 0x21e   : > { %v3179_v29 = vpack.c.bf16 %v2544_v46, %v2543_v44 }
 0x220   : > { %3195 = vst [vmem:[%s4813_s9 + $0x78] sm:$0xff] %v3179_v29  }
 0x221 PF: > { %s13_s14 = sadd.s32 1, %s4059_s14   ;;  %s4881_s12 = smov %s4055_s13 }
 0x222   : > { %p10_p5 = scmp.ge.s32.totalorder %s13_s14, 4   ;;  %s4882_s13 = smov %s4884_s15 }
 0x224   :  { %12 = sbr.rel (!%p10_p5) target bundleno = 2 (0x2), region = 68 }

// kernel: _resnet_forward.7
= control target key start
LH: loop header
LB: loop body
LE: loop exit
PB: predicated region body
PF: predicated region fallthrough
CT: control target
= control target key end

     0   :  { %s4338_s15 = smov 0   ;;  %s4340_s16 = smov 0   ;;  %s5165_s0 = inlined_call_operand.vmem [shape: bf16[512,1152], index: 0, kind: input, shape index: {}]   ;;  %s5166_s1 = inlined_call_operand.vmem [shape: bf16[1152,128], index: 1, kind: input, shape index: {}]   ;;  %s5167_s2 = inlined_call_operand.vmem [shape: f32[1,128], index: 2, kind: input, shape index: {}]   ;;  %s5168_s3 = inlined_call_operand.vmem [shape: bf16[512,128], index: 3, kind: input, shape index: {}]   ;;  %s5169_s4 = inlined_call_operand.vmem [shape: bf16[512,128], index: 4, kind: output, shape index: {}]  }
   0x1   :  { %s4342_s17 = smov 0  }
   0x2 LB: > { %s26_s18 = sadd.s32 1, %s4307_s16  ;;  %p2984_p0 = scmp.ge.s32.totalorder %s4311_s17, 1  ;;  %s4311_s17 = sphi %s4342_s17, %s14_s17   ;;  %s4307_s16 = sphi %s4340_s16, %s5171_s16   ;;  %s4303_s15 = sphi %s4338_s15, %s5170_s15  }
   0x3   : > { %p28_p1 = scmp.ge.s32.totalorder %s26_s18, 2  ;;  %p211_p2 = scmp.lt.s32.totalorder %s4311_s17, 3 }
   0x5   : > { %s5173_s18 = smov (%p28_p1, %s26_s18), 0  ;;  %p212_p3 = pnand %p2984_p0, %p211_p2 }
   0x6   : > { %v4009_v0 = vld [vmem:[%s5166_s1 + $0x40] sm:$0xff] (!%p212_p3)   ;;  %s2985_s21 = sshll.u32 (!%p212_p3), %s4303_s15, 5  ;;  %v4011_v2 = vld [vmem:[%s5166_s1 + $0x48] sm:$0xff] (!%p212_p3)   ;;  %v4013_v4 = vld [vmem:[%s5166_s1 + $0x50] sm:$0xff] (!%p212_p3)  }
   0x7   : > { %215 = sbr.rel (%p212_p3) target bundleno = 547 (0x223), region = 36  ;;  %v4010_v1 = vld [vmem:[%s5166_s1] sm:$0xff] (!%p212_p3)   ;;  %3448 = vmatprep.subr.bf16.mxu0 (!%p212_p3), %v4009_v0  ;;  %3968 = vmatprep.subr.bf16.mxu1 (!%p212_p3), %v4009_v0  ;;  %p257_p4 = scmp.lt.s32.totalorder (!%p212_p3), %s2985_s21, 63  ;;  %v4012_v3 = vld [vmem:[%s5166_s1 + $0x8] sm:$0xff] (!%p212_p3)   ;;  %v4014_v5 = vld [vmem:[%s5166_s1 + $0x10] sm:$0xff] (!%p212_p3)  }
   0x8   : > { %3449 = vmatpush3.bf16.msra.mxu0 (!%p212_p3), %v4010_v1  ;;  %3976 = vmatpush3.bf16.msra.mxu1 (!%p212_p3), %v4010_v1  ;;  %v4015_v6 = vld [vmem:[%s5166_s1 + $0x58] sm:$0xff] (!%p212_p3)   ;;  %v4017_v8 = vld [vmem:[%s5166_s1 + $0x60] sm:$0xff] (!%p212_p3)   ;;  %v4019_v10 = vld [vmem:[%s5166_s1 + $0x68] sm:$0xff] (!%p212_p3)  }
   0x9   : > { %3450 = vmatprep.subr.bf16.mxu0 (!%p212_p3), %v4011_v2  ;;  %3969 = vmatprep.subr.bf16.mxu1 (!%p212_p3), %v4011_v2  ;;  %v4016_v7 = vld [vmem:[%s5166_s1 + $0x18] sm:$0xff] (!%p212_p3)   ;;  %v4018_v9 = vld [vmem:[%s5166_s1 + $0x20] sm:$0xff] (!%p212_p3)   ;;  %v4020_v13 = vld [vmem:[%s5166_s1 + $0x28] sm:$0xff] (!%p212_p3)  }
   0xa   : > { %v4021_v14 = vld [vmem:[%s5166_s1 + $0x70] sm:$0xff] (!%p212_p3)   ;;  %v4023_v16 = vld [vmem:[%s5166_s1 + $0x78] sm:$0xff] (!%p212_p3)   ;;  %v4031_v18 = vld [vmem:[%s5166_s1 + $0xc0] sm:$0xff] (!%p212_p3)  }
   0xb   : > { %v4022_v15 = vld [vmem:[%s5166_s1 + $0x30] sm:$0xff] (!%p212_p3)   ;;  %v4024_v17 = vld [vmem:[%s5166_s1 + $0x38] sm:$0xff] (!%p212_p3)   ;;  %v4034_v21 = vld [vmem:[%s5166_s1 + $0x140] sm:$0xff] (!%p212_p3)  }
   0xc   : > { %3451 = vmatpush3.bf16.msra.mxu0 (!%p212_p3), %v4012_v3  ;;  %3977 = vmatpush3.bf16.msra.mxu1 (!%p212_p3), %v4012_v3  ;;  %v4032_v22 = vld [vmem:[%s5166_s1 + $0x80] sm:$0xff] (!%p212_p3)   ;;  %v4033_v23 = vld [vmem:[%s5166_s1 + $0xc8] sm:$0xff] (!%p212_p3)   ;;  %v4043_v31 = vld [vmem:[%s5166_s1 + $0xd0] sm:$0xff] (!%p212_p3)  }
   0xd   : > { %3452 = vmatprep.subr.bf16.mxu0 (!%p212_p3), %v4013_v4  ;;  %3970 = vmatprep.subr.bf16.mxu1 (!%p212_p3), %v4013_v4  ;;  %v4036_v24 = vld [vmem:[%s5166_s1 + $0x100] sm:$0xff] (!%p212_p3)   ;;  %v4035_v27 = vld [vmem:[%s5166_s1 + $0x88] sm:$0xff] (!%p212_p3)   ;;  %v4044_v32 = vld [vmem:[%s5166_s1 + $0x90] sm:$0xff] (!%p212_p3)  }
   0xe   : > { %s5175_s21 = smov (!%p257_p4, %s2985_s21), 63  ;;  %v4054_v28 = vld [vmem:[%s5166_s1 + $0x148] sm:$0xff]   ;;  %v4045_v34 = vld [vmem:[%s5166_s1 + $0xd8] sm:$0xff]   ;;  %v4053_v40 = vld [vmem:[%s5166_s1 + $0xe0] sm:$0xff]  }
   0xf   : > { %s3984_s8 = smul.u32 36, %s5175_s21  ;;  %v4056_v33 = vld [vmem:[%s5166_s1 + $0x108] sm:$0xff]   ;;  %v4046_v37 = vld [vmem:[%s5166_s1 + $0x98] sm:$0xff]   ;;  %v4055_v41 = vld [vmem:[%s5166_s1 + $0xa0] sm:$0xff]  }
  0x10   : > { %3453 = vmatpush3.bf16.msra.mxu0 %v4014_v5  ;;  %3978 = vmatpush3.bf16.msra.mxu1 %v4014_v5  ;;  %v4057_v42 = vld [vmem:[%s5166_s1 + $0xe8] sm:$0xff]   ;;  %v4068_v43 = vld [vmem:[%s5166_s1 + $0x150] sm:$0xff]   ;;  %v4067_v52 = vld [vmem:[%s5166_s1 + $0xf8] sm:$0xff]  }
  0x11   : > { %3454 = vmatprep.subr.bf16.mxu0 %v4015_v6  ;;  %3971 = vmatprep.subr.bf16.mxu1 %v4015_v6  ;;  %s4389_s15 = scalar_lea.vmem %s5165_s0, %s3984_s8  ;;  %v4070_v46 = vld [vmem:[%s5166_s1 + $0x110] sm:$0xff]   ;;  %v4058_v47 = vld [vmem:[%s5166_s1 + $0xa8] sm:$0xff]   ;;  %v4085_v55 = vld [vmem:[%s5166_s1 + $0x158] sm:$0xff]  }
  0x12   : > { %v4027_v11 = vld [vmem:[%s4389_s15 + $0x4] ss:$36 sps:$4 sm:$0xff]   ;;  %v4037_v25 = vld [vmem:[%s4389_s15 + $0x4c] ss:$36 sps:$4 sm:$0xff]   ;;  %v4047_v35 = vld [vmem:[%s4389_s15 + $0x94] ss:$36 sps:$4 sm:$0xff]  }
  0x13   : > { %v4030_v12 = vld [vmem:[%s4389_s15 + $0x364] ss:$36 sps:$4 sm:$0xff]   ;;  %1800 = vmatprep.mubr.bf16.mxu0 %v4027_v11  ;;  %v4039_v26 = vld [vmem:[%s4389_s15 + $0x3ac] ss:$36 sps:$4 sm:$0xff]   ;;  %v4049_v36 = vld [vmem:[%s4389_s15 + $0x3f4] ss:$36 sps:$4 sm:$0xff]  }
  0x14   : > { %3455 = vmatpush3.bf16.msra.mxu0 %v4016_v7  ;;  %3979 = vmatpush3.bf16.msra.mxu1 %v4016_v7  ;;  %v4025_v19 = vld [vmem:[%s4389_s15] ss:$36 sps:$4 sm:$0xff]   ;;  %v4041_v29 = vld [vmem:[%s4389_s15 + $0x48] ss:$36 sps:$4 sm:$0xff]   ;;  %v4051_v38 = vld [vmem:[%s4389_s15 + $0x90] ss:$36 sps:$4 sm:$0xff]  }
  0x15   : > { %3456 = vmatprep.subr.bf16.mxu0 %v4017_v8  ;;  %3972 = vmatprep.subr.bf16.mxu1 %v4017_v8  ;;  %v4028_v20 = vld [vmem:[%s4389_s15 + $0x360] ss:$36 sps:$4 sm:$0xff]   ;;  %v4042_v30 = vld [vmem:[%s4389_s15 + $0x3a8] ss:$36 sps:$4 sm:$0xff]   ;;  %v4052_v39 = vld [vmem:[%s4389_s15 + $0x3f0] ss:$36 sps:$4 sm:$0xff]  }
  0x16   : > { %1896 = vmatprep.mubr.bf16.mxu1 %v4030_v12  ;;  %v4059_v44 = vld [vmem:[%s4389_s15 + $0xdc] ss:$36 sps:$4 sm:$0xff]   ;;  %v4065_v48 = vld [vmem:[%s5166_s1 + $0xf0] sm:$0xff]   ;;  %v4071_v53 = vld [vmem:[%s4389_s15 + $0x124] ss:$36 sps:$4 sm:$0xff]  }
  0x17   : > { %v4061_v45 = vld [vmem:[%s4389_s15 + $0x43c] ss:$36 sps:$4 sm:$0xff]   ;;  %v4066_v51 = vld [vmem:[%s5166_s1 + $0xb0] sm:$0xff]   ;;  %v4073_v58 = vld [vmem:[%s4389_s15 + $0x8] ss:$36 sps:$4 sm:$0xff]  }
  0x18   : > { %3457 = vmatpush3.bf16.msra.mxu0 %v4018_v9  ;;  %3980 = vmatpush3.bf16.msra.mxu1 %v4018_v9  ;;  %v4063_v49 = vld [vmem:[%s4389_s15 + $0xd8] ss:$36 sps:$4 sm:$0xff]   ;;  %v4075_v54 = vld [vmem:[%s4389_s15 + $0xc] ss:$36 sps:$4 sm:$0xff]   ;;  %v4076_v59 = vld [vmem:[%s4389_s15 + $0x120] ss:$36 sps:$4 sm:$0xff]  }
  0x19   : > { %3458 = vmatprep.subr.bf16.mxu0 %v4019_v10  ;;  %3973 = vmatprep.subr.bf16.mxu1 %v4019_v10  ;;  %v4064_v50 = vld [vmem:[%s4389_s15 + $0x438] ss:$36 sps:$4 sm:$0xff]   ;;  %v4077_v60 = vld [vmem:[%s5166_s1 + $0x1c0] sm:$0xff]   ;;  %v4079_v62 = vld [vmem:[%s4389_s15 + $0x16c] ss:$36 sps:$4 sm:$0xff]  }
  0x1a   : > { %v4086_v56 = vld [vmem:[%s5166_s1 + $0x118] sm:$0xff]   ;;  %v4078_v61 = vld [vmem:[%s5166_s1 + $0x180] sm:$0xff]   ;;  %v4093_v1 = vld [vmem:[%s5166_s1 + $0x1c8] sm:$0xff]  }
  0x1b   : > { %v4069_v57 = vld [vmem:[%s5166_s1 + $0xb8] sm:$0xff]   ;;  %v4095_v0 = vld [vmem:[%s5166_s1 + $0x160] sm:$0xff]   ;;  %v4094_v3 = vld [vmem:[%s5166_s1 + $0x188] sm:$0xff]  }
  0x1c   : > { %3459 = vmatpush3.bf16.msra.mxu0 %v4020_v13  ;;  %3981 = vmatpush3.bf16.msra.mxu1 %v4020_v13  ;;  %v4081_v63 = vld [vmem:[%s4389_s15 + $0x54] ss:$36 sps:$4 sm:$0xff]   ;;  %v4096_v2 = vld [vmem:[%s5166_s1 + $0x120] sm:$0xff]   ;;  %v4083_v4 = vld [vmem:[%s4389_s15 + $0x168] ss:$36 sps:$4 sm:$0xff]  }
  0x1d   : > { %3460 = vmatprep.subr.bf16.mxu0 %v4021_v14  ;;  %3974 = vmatprep.subr.bf16.mxu1 %v4021_v14  ;;  %v4084_v5 = vld [vmem:[%s4389_s15 + $0x50] ss:$36 sps:$4 sm:$0xff]   ;;  %v4089_v7 = vld [vmem:[%s4389_s15 + $0x9c] ss:$36 sps:$4 sm:$0xff]   ;;  %v4109_v8 = vld [vmem:[%s5166_s1 + $0x168] sm:$0xff]  }
  0x1e   : > { %v4087_v6 = vld [vmem:[%s4389_s15 + $0x1b4] ss:$36 sps:$4 sm:$0xff]   ;;  %v4111_v10 = vld [vmem:[%s5166_s1 + $0x128] sm:$0xff]   ;;  %v4097_v14 = vld [vmem:[%s4389_s15 + $0x1fc] ss:$36 sps:$4 sm:$0xff]  }
  0x1f   : > { %v4110_v9 = vld [vmem:[%s5166_s1 + $0x1d0] sm:$0xff]   ;;  %v4092_v13 = vld [vmem:[%s4389_s15 + $0x98] ss:$36 sps:$4 sm:$0xff]  }
  0x20   : > { %3461 = vmatpush3.bf16.msra.mxu0 %v4022_v15  ;;  %3982 = vmatpush3.bf16.msra.mxu1 %v4022_v15  ;;  %v4112_v11 = vld [vmem:[%s5166_s1 + $0x190] sm:$0xff]  }
  0x21   : > { %3462 = vmatprep.subr.bf16.mxu0 %v4023_v16  ;;  %3975 = vmatprep.subr.bf16.mxu1 %v4023_v16  ;;  %v4091_v12 = vld [vmem:[%s4389_s15 + $0x1b0] ss:$36 sps:$4 sm:$0xff]  }
  0x22   : > { %v4119_v15 = vld [vmem:[%s5166_s1 + $0x170] sm:$0xff]  }
  0x23   : > { %v4120_v16 = vld [vmem:[%s5166_s1 + $0x130] sm:$0xff]  }
  0x24   : > { %3463 = vmatpush3.bf16.msra.mxu0 %v4024_v17  ;;  %3983 = vmatpush3.bf16.msra.mxu1 %v4024_v17  ;;  %v4099_v17 = vld [vmem:[%s4389_s15 + $0xe4] ss:$36 sps:$4 sm:$0xff]  }
  0x25   : > { %3560 = vmatprep.subr.bf16.mxu1 %v4031_v18  ;;  %3672 = vmatprep.subr.bf16.mxu0 %v4034_v21  ;;  %v4127_v18 = vld [vmem:[%s5166_s1 + $0x1d8] sm:$0xff]   ;;  %v4102_v21 = vld [vmem:[%s4389_s15 + $0xe0] ss:$36 sps:$4 sm:$0xff]  }
  0x27   : > { %1801 = vmatmul.mubr.bf16.vlgmr.msra.gmra.mrb[0].mxu0 %v4025_v19  ;;  %1897 = vmatmul.mubr.bf16.vlgmr.msra.gmra.mrb[0].mxu1 %v4028_v20  ;;  %v4128_v19 = vld [vmem:[%s5166_s1 + $0x198] sm:$0xff]  }
  0x28   : > { %3561 = vmatpush3.bf16.msra.mxu1 %v4032_v22  ;;  %3673 = vmatpush3.bf16.msra.mxu0 %v4036_v24  ;;  %v4101_v20 = vld [vmem:[%s4389_s15 + $0x1f8] ss:$36 sps:$4 sm:$0xff]   ;;  %v4103_v22 = vld [vmem:[%s4389_s15 + $0x244] ss:$36 sps:$4 sm:$0xff]  }
  0x29   : > { %3562 = vmatprep.subr.bf16.mxu1 %v4033_v23  ;;  %1808 = vmatprep.mubr.bf16.mxu0 %v4037_v25  ;;  %v4105_v23 = vld [vmem:[%s4389_s15 + $0x12c] ss:$36 sps:$4 sm:$0xff]   ;;  %v4135_v24 = vld [vmem:[%s5166_s1 + $0x178] sm:$0xff]  }
  0x2a   : > { %1904 = vmatprep.mubr.bf16.mxu1 %v4039_v26  ;;  %3674 = vmatprep.subr.bf16.mxu0 %v4054_v28  ;;  %v4136_v25 = vld [vmem:[%s5166_s1 + $0x138] sm:$0xff]   ;;  %v4143_v26 = vld [vmem:[%s5166_s1 + $0x1e0] sm:$0xff]  }
  0x2b   : > { %v4144_v28 = vld [vmem:[%s5166_s1 + $0x1a0] sm:$0xff]  }
  0x2c   : > { %3563 = vmatpush3.bf16.msra.mxu1 %v4035_v27  ;;  %3675 = vmatpush3.bf16.msra.mxu0 %v4056_v33  ;;  %v4107_v27 = vld [vmem:[%s4389_s15 + $0x240] ss:$36 sps:$4 sm:$0xff]   ;;  %v4158_v33 = vld [vmem:[%s5166_s1 + $0x1e8] sm:$0xff]  }
  0x2d   : > { %3564 = vmatprep.subr.bf16.mxu1 %v4043_v31  ;;  %3676 = vmatprep.subr.bf16.mxu0 %v4068_v43  ;;  %v4113_v31 = vld [vmem:[%s4389_s15 + $0x28c] ss:$36 sps:$4 sm:$0xff]   ;;  %v4129_v43 = vld [vmem:[%s4389_s15 + $0x31c] ss:$36 sps:$4 sm:$0xff]  }
  0x2f   : > { %1809 = vmatmul.mubr.bf16.gmra.mrb[4].mxu0 %v4041_v29  ;;  %1905 = vmatmul.mubr.bf16.gmra.mrb[4].mxu1 %v4042_v30  ;;  %v4145_v29 = vld [vmem:[%s5166_s1 + $0x200] sm:$0xff]   ;;  %v4108_v30 = vld [vmem:[%s4389_s15 + $0x128] ss:$36 sps:$4 sm:$0xff]  }
  0x30   : > { %3565 = vmatpush3.bf16.msra.mxu1 %v4044_v32  ;;  %1816 = vmatprep.mubr.bf16.mxu0 %v4047_v35  ;;  %v4115_v32 = vld [vmem:[%s4389_s15 + $0x174] ss:$36 sps:$4 sm:$0xff]   ;;  %v4159_v35 = vld [vmem:[%s5166_s1 + $0x1a8] sm:$0xff]  }
  0x31   : > { %3566 = vmatprep.subr.bf16.mxu1 %v4045_v34  ;;  %1912 = vmatprep.mubr.bf16.mxu1 %v4049_v36  ;;  %v4117_v34 = vld [vmem:[%s4389_s15 + $0x288] ss:$36 sps:$4 sm:$0xff]   ;;  %v4118_v36 = vld [vmem:[%s4389_s15 + $0x170] ss:$36 sps:$4 sm:$0xff]  }
  0x32   : > { %3677 = vmatpush3.bf16.msra.mxu0 %v4070_v46  ;;  %v4134_v46 = vld [vmem:[%s4389_s15 + $0x200] ss:$36 sps:$4 sm:$0xff]  }
  0x33   : > { %3678 = vmatprep.subr.bf16.mxu0 %v4085_v55  ;;  %v4160_v55 = vld [vmem:[%s5166_s1 + $0x208] sm:$0xff]  }
  0x34   : > { %3567 = vmatpush3.bf16.msra.mxu1 %v4046_v37  ;;  %v4121_v37 = vld [vmem:[%s4389_s15 + $0x2d4] ss:$36 sps:$4 sm:$0xff]  }
  0x35   : > { %3568 = vmatprep.subr.bf16.mxu1 %v4053_v40  ;;  %v4126_v40 = vld [vmem:[%s4389_s15 + $0x1b8] ss:$36 sps:$4 sm:$0xff]  }
  0x36   : > { %3679 = vmatpush3.bf16.msra.mxu0 %v4086_v56  ;;  %v4175_v56 = vld [vmem:[%s5166_s1 + $0x210] sm:$0xff]  }
  0x37   : > { %1817 = vmatmul.mubr.bf16.gmra.mrb[8].mxu0 %v4051_v38  ;;  %1913 = vmatmul.mubr.bf16.gmra.mrb[8].mxu1 %v4052_v39  ;;  %v4123_v38 = vld [vmem:[%s4389_s15 + $0x1bc] ss:$36 sps:$4 sm:$0xff]   ;;  %v4125_v39 = vld [vmem:[%s4389_s15 + $0x2d0] ss:$36 sps:$4 sm:$0xff]  }
  0x38   : > { %3569 = vmatpush3.bf16.msra.mxu1 %v4055_v41  ;;  %1824 = vmatprep.mubr.bf16.mxu0 %v4059_v44  ;;  %v4173_v41 = vld [vmem:[%s5166_s1 + $0x1f0] sm:$0xff]   ;;  %v4131_v44 = vld [vmem:[%s4389_s15 + $0x204] ss:$36 sps:$4 sm:$0xff]  }
  0x39   : > { %3570 = vmatprep.subr.bf16.mxu1 %v4057_v42  ;;  %1920 = vmatprep.mubr.bf16.mxu1 %v4061_v45  ;;  %v4174_v42 = vld [vmem:[%s5166_s1 + $0x1b0] sm:$0xff]   ;;  %v4133_v45 = vld [vmem:[%s4389_s15 + $0x318] ss:$36 sps:$4 sm:$0xff]  }
  0x3a   : > { %3680 = vmatprep.subr.bf16.mxu0 %v4095_v0  ;;  %v4157_v0 = vld [vmem:[%s4389_s15 + $0xa0] ss:$36 sps:$4 sm:$0xff]  }
  0x3b   : > { %3681 = vmatpush3.bf16.msra.mxu0 %v4096_v2  ;;  %v4163_v2 = vld [vmem:[%s4389_s15 + $0xec] ss:$36 sps:$4 sm:$0xff]  }
  0x3c   : > { %3571 = vmatpush3.bf16.msra.mxu1 %v4058_v47  ;;  %3682 = vmatprep.subr.bf16.mxu0 %v4109_v8  ;;  %v4188_v47 = vld [vmem:[%s5166_s1 + $0x1f8] sm:$0xff]  }
  0x3d   : > { %3572 = vmatprep.subr.bf16.mxu1 %v4065_v48  ;;  %v4189_v48 = vld [vmem:[%s5166_s1 + $0x1b8] sm:$0xff]  }
  0x3e   : > { %v4169_v8 = vld [vmem:[%s4389_s15 + $0x134] ss:$36 sps:$4 sm:$0xff]  }
  0x3f   : > { %1825 = vmatmul.mubr.bf16.gmra.mrb[12].mxu0 %v4063_v49  ;;  %1921 = vmatmul.mubr.bf16.gmra.mrb[12].mxu1 %v4064_v50  ;;  %v4137_v49 = vld [vmem:[%s4389_s15 + $0x24c] ss:$36 sps:$4 sm:$0xff]   ;;  %v4141_v50 = vld [vmem:[%s4389_s15 + $0x14] ss:$36 sps:$4 sm:$0xff]  }
  0x40   : > { %3573 = vmatpush3.bf16.msra.mxu1 %v4066_v51  ;;  %1832 = vmatprep.mubr.bf16.mxu0 %v4071_v53  ;;  %v4139_v51 = vld [vmem:[%s4389_s15 + $0x10] ss:$36 sps:$4 sm:$0xff]  }
  0x41   : > { %3574 = vmatprep.subr.bf16.mxu1 %v4067_v52  ;;  %1961 = vmatprep.mubr.bf16.mxu1 %v4075_v54  ;;  %v4142_v52 = vld [vmem:[%s4389_s15 + $0x248] ss:$36 sps:$4 sm:$0xff]   ;;  %v4146_v53 = vld [vmem:[%s4389_s15 + $0x294] ss:$36 sps:$4 sm:$0xff]   ;;  %v4148_v54 = vld [vmem:[%s4389_s15 + $0x5c] ss:$36 sps:$4 sm:$0xff]  }
  0x42   : > { %3683 = vmatpush3.bf16.msra.mxu0 %v4111_v10  ;;  %v4171_v10 = vld [vmem:[%s4389_s15 + $0x368] ss:$36 sps:$4 sm:$0xff]  }
  0x43   : > { %3684 = vmatprep.subr.bf16.mxu0 %v4119_v15  ;;  %v4181_v15 = vld [vmem:[%s4389_s15 + $0x178] ss:$36 sps:$4 sm:$0xff]  }
  0x44   : > { %3575 = vmatpush3.bf16.msra.mxu1 %v4069_v57  ;;  %v4150_v57 = vld [vmem:[%s4389_s15 + $0x290] ss:$36 sps:$4 sm:$0xff]  }
  0x45   : > { %3784 = vmatprep.subr.bf16.mxu1 %v4077_v60  ;;  %v4154_v60 = vld [vmem:[%s4389_s15 + $0xa4] ss:$36 sps:$4 sm:$0xff]  }
  0x46   : > { %3685 = vmatpush3.bf16.msra.mxu0 %v4120_v16  ;;  %v4182_v16 = vld [vmem:[%s4389_s15 + $0x3fc] ss:$36 sps:$4 sm:$0xff]  }
  0x47   : > { %1833 = vmatmul.mubr.bf16.gmra.mrb[16].mxu0 %v4076_v59  ;;  %1962 = vmatmul.mubr.bf16.vlgmr.msra.gmra.mrb[16].mxu1 %v4073_v58  ;;  %v4151_v58 = vld [vmem:[%s4389_s15 + $0x58] ss:$36 sps:$4 sm:$0xff]  }
  0x48   : > { %3785 = vmatpush3.bf16.msra.mxu1 %v4078_v61  ;;  %1840 = vmatprep.mubr.bf16.mxu0 %v4079_v62  ;;  %v4152_v59 = vld [vmem:[%s4389_s15 + $0x2dc] ss:$36 sps:$4 sm:$0xff]  }
  0x49   : > { %1969 = vmatprep.mubr.bf16.mxu1 %v4081_v63  ;;  %3786 = vmatprep.subr.bf16.mxu1 %v4093_v1  ;;  %v4190_v61 = vld [vmem:[%s5166_s1 + $0x218] sm:$0xff]   ;;  %v4203_v62 = vld [vmem:[%s5166_s1 + $0x220] sm:$0xff]  }
  0x4a   : > { %3686 = vmatprep.subr.bf16.mxu0 %v4135_v24  ;;  %v4156_v63 = vld [vmem:[%s4389_s15 + $0x2d8] ss:$36 sps:$4 sm:$0xff]   ;;  %v4161_v1 = vld [vmem:[%s4389_s15 + $0x324] ss:$36 sps:$4 sm:$0xff]  }
  0x4b   : > { %3687 = vmatpush3.bf16.msra.mxu0 %v4136_v25  ;;  %v4197_v24 = vld [vmem:[%s4389_s15 + $0x254] ss:$36 sps:$4 sm:$0xff]   ;;  %v4201_v25 = vld [vmem:[%s4389_s15 + $0x1c] ss:$36 sps:$4 sm:$0xff]  }
  0x4c   : > { %3787 = vmatpush3.bf16.msra.mxu1 %v4094_v3  ;;  %3920 = vmatprep.subr.bf16.mxu0 %v4145_v29  ;;  %v4216_v3 = vld [vmem:[%s5166_s1 + $0x228] sm:$0xff]  }
  0x4d   : > { %3788 = vmatprep.subr.bf16.mxu1 %v4110_v9  ;;  %v4242_v9 = vld [vmem:[%s5166_s1 + $0x238] sm:$0xff]  }
  0x4f   : > { %1841 = vmatmul.mubr.bf16.gmra.mrb[20].mxu0 %v4083_v4  ;;  %1970 = vmatmul.mubr.bf16.gmra.mrb[20].mxu1 %v4084_v5  ;;  %v4165_v4 = vld [vmem:[%s4389_s15 + $0x320] ss:$36 sps:$4 sm:$0xff]   ;;  %v4166_v5 = vld [vmem:[%s4389_s15 + $0xe8] ss:$36 sps:$4 sm:$0xff]  }
  0x50   : > { %1848 = vmatprep.mubr.bf16.mxu0 %v4087_v6  ;;  %1977 = vmatprep.mubr.bf16.mxu1 %v4089_v7  ;;  %v4229_v6 = vld [vmem:[%s5166_s1 + $0x230] sm:$0xff]  }
  0x51   : > { %3789 = vmatpush3.bf16.msra.mxu1 %v4112_v11  ;;  %v4167_v7 = vld [vmem:[%s4389_s15 + $0x36c] ss:$36 sps:$4 sm:$0xff]  }
  0x52   : > { %3790 = vmatprep.subr.bf16.mxu1 %v4127_v18  ;;  %v4172_v11 = vld [vmem:[%s4389_s15 + $0x130] ss:$36 sps:$4 sm:$0xff]   ;;  %v4186_v18 = vld [vmem:[%s4389_s15 + $0x3f8] ss:$36 sps:$4 sm:$0xff]  }
  0x55   : > { %3791 = vmatpush3.bf16.msra.mxu1 %v4128_v19  ;;  %v4187_v19 = vld [vmem:[%s4389_s15 + $0x1c0] ss:$36 sps:$4 sm:$0xff]  }
  0x56   : > { %3792 = vmatprep.subr.bf16.mxu1 %v4143_v26  ;;  %v4199_v26 = vld [vmem:[%s4389_s15 + $0x18] ss:$36 sps:$4 sm:$0xff]  }
  0x57   : > { %1849 = vmatmul.mubr.bf16.gmra.mrb[24].mxu0 %v4091_v12  ;;  %1978 = vmatmul.mubr.bf16.gmra.mrb[24].mxu1 %v4092_v13  ;;  %v4176_v12 = vld [vmem:[%s4389_s15 + $0x3b4] ss:$36 sps:$4 sm:$0xff]   ;;  %v4178_v13 = vld [vmem:[%s4389_s15 + $0x17c] ss:$36 sps:$4 sm:$0xff]  }
  0x58   : > { %1856 = vmatprep.mubr.bf16.mxu0 %v4097_v14  ;;  %1985 = vmatprep.mubr.bf16.mxu1 %v4099_v17  ;;  %v4180_v14 = vld [vmem:[%s4389_s15 + $0x3b0] ss:$36 sps:$4 sm:$0xff]   ;;  %v4184_v17 = vld [vmem:[%s4389_s15 + $0x1c4] ss:$36 sps:$4 sm:$0xff]  }
  0x59   : > { %3793 = vmatpush3.bf16.msra.mxu1 %v4144_v28  ;;  %v4204_v28 = vld [vmem:[%s4389_s15 + $0x29c] ss:$36 sps:$4 sm:$0xff]  }
  0x5a   : > { %3794 = vmatprep.subr.bf16.mxu1 %v4158_v33  ;;  %v4212_v33 = vld [vmem:[%s4389_s15 + $0xac] ss:$36 sps:$4 sm:$0xff]  }
  0x5d   : > { %3795 = vmatpush3.bf16.msra.mxu1 %v4159_v35  ;;  %v4215_v35 = vld [vmem:[%s4389_s15 + $0xa8] ss:$36 sps:$4 sm:$0xff]  }
  0x5e   : > { %3796 = vmatprep.subr.bf16.mxu1 %v4173_v41  ;;  %v4225_v41 = vld [vmem:[%s4389_s15 + $0x13c] ss:$36 sps:$4 sm:$0xff]  }
  0x5f   : > { %1857 = vmatmul.mubr.bf16.gmra.mrb[28].mxu0 %v4101_v20  ;;  %1986 = vmatmul.mubr.bf16.gmra.mrb[28].mxu1 %v4102_v21  ;;  %v4191_v20 = vld [vmem:[%s4389_s15 + $0x444] ss:$36 sps:$4 sm:$0xff]   ;;  %v4193_v21 = vld [vmem:[%s4389_s15 + $0x20c] ss:$36 sps:$4 sm:$0xff]  }
  0x60   : > { %1864 = vmatprep.mubr.bf16.mxu0 %v4103_v22  ;;  %1993 = vmatprep.mubr.bf16.mxu1 %v4105_v23  ;;  %v4195_v22 = vld [vmem:[%s4389_s15 + $0x440] ss:$36 sps:$4 sm:$0xff]   ;;  %v4196_v23 = vld [vmem:[%s4389_s15 + $0x208] ss:$36 sps:$4 sm:$0xff]  }
  0x61   : > { %3797 = vmatpush3.bf16.msra.mxu1 %v4174_v42  ;;  %v4227_v42 = vld [vmem:[%s4389_s15 + $0x370] ss:$36 sps:$4 sm:$0xff]  }
  0x62   : > { %3798 = vmatprep.subr.bf16.mxu1 %v4188_v47  ;;  %v4235_v47 = vld [vmem:[%s4389_s15 + $0x180] ss:$36 sps:$4 sm:$0xff]  }
  0x65   : > { %3799 = vmatpush3.bf16.msra.mxu1 %v4189_v48  ;;  %v4236_v48 = vld [vmem:[%s4389_s15 + $0x404] ss:$36 sps:$4 sm:$0xff]  }
  0x67   : > { %1865 = vmatmul.mubr.bf16.gmra.mrb[32].mxu0 %v4107_v27  ;;  %1994 = vmatmul.mubr.bf16.gmra.mrb[32].mxu1 %v4108_v30  ;;  %v4202_v27 = vld [vmem:[%s4389_s15 + $0x250] ss:$36 sps:$4 sm:$0xff]   ;;  %v4208_v30 = vld [vmem:[%s4389_s15 + $0x298] ss:$36 sps:$4 sm:$0xff]  }
  0x68   : > { %1872 = vmatprep.mubr.bf16.mxu0 %v4113_v31  ;;  %2001 = vmatprep.mubr.bf16.mxu1 %v4115_v32  ;;  %v4209_v31 = vld [vmem:[%s4389_s15 + $0x60] ss:$36 sps:$4 sm:$0xff]  }
  0x69   : > { %v4210_v32 = vld [vmem:[%s4389_s15 + $0x2e4] ss:$36 sps:$4 sm:$0xff]  }
  0x6f   : > { %1873 = vmatmul.mubr.bf16.gmra.mrb[36].mxu0 %v4117_v34  ;;  %2002 = vmatmul.mubr.bf16.gmra.mrb[36].mxu1 %v4118_v36  ;;  %v4214_v34 = vld [vmem:[%s4389_s15 + $0x2e0] ss:$36 sps:$4 sm:$0xff]   ;;  %v4217_v36 = vld [vmem:[%s4389_s15 + $0x32c] ss:$36 sps:$4 sm:$0xff]  }
  0x70   : > { %1880 = vmatprep.mubr.bf16.mxu0 %v4121_v37  ;;  %2009 = vmatprep.mubr.bf16.mxu1 %v4123_v38  ;;  %v4219_v37 = vld [vmem:[%s4389_s15 + $0xf4] ss:$36 sps:$4 sm:$0xff]   ;;  %v4221_v38 = vld [vmem:[%s4389_s15 + $0x328] ss:$36 sps:$4 sm:$0xff]  }
  0x77   : > { %1881 = vmatmul.mubr.bf16.gmra.mrb[40].mxu0 %v4125_v39  ;;  %2010 = vmatmul.mubr.bf16.gmra.mrb[40].mxu1 %v4126_v40  ;;  %v4222_v39 = vld [vmem:[%s4389_s15 + $0xf0] ss:$36 sps:$4 sm:$0xff]  }
  0x78   : > { %1888 = vmatprep.mubr.bf16.mxu0 %v4129_v43  ;;  %2017 = vmatprep.mubr.bf16.mxu1 %v4131_v44  ;;  %v4223_v40 = vld [vmem:[%s4389_s15 + $0x374] ss:$36 sps:$4 sm:$0xff]   ;;  %v4230_v44 = vld [vmem:[%s4389_s15 + $0x3bc] ss:$36 sps:$4 sm:$0xff]  }
  0x79   : > { %v4228_v43 = vld [vmem:[%s4389_s15 + $0x138] ss:$36 sps:$4 sm:$0xff]  }
  0x7f   : > { %1889 = vmatmul.mubr.bf16.gmra.mrb[44].mxu0 %v4133_v45  ;;  %2018 = vmatmul.mubr.bf16.gmra.mrb[44].mxu1 %v4134_v46  ;;  %v4232_v45 = vld [vmem:[%s4389_s15 + $0x184] ss:$36 sps:$4 sm:$0xff]   ;;  %v4234_v46 = vld [vmem:[%s4389_s15 + $0x3b8] ss:$36 sps:$4 sm:$0xff]  }
  0x80   : > { %2025 = vmatprep.mubr.bf16.mxu1 %v4137_v49  ;;  %2122 = vmatprep.mubr.bf16.mxu0 %v4141_v50  ;;  %v4238_v49 = vld [vmem:[%s4389_s15 + $0x1cc] ss:$36 sps:$4 sm:$0xff]   ;;  %v4240_v50 = vld [vmem:[%s4389_s15 + $0x400] ss:$36 sps:$4 sm:$0xff]  }
  0x87   : > { %2026 = vmatmul.mubr.bf16.gmra.mrb[48].mxu1 %v4142_v52  ;;  %2123 = vmatmul.mubr.bf16.vlgmr.msra.gmra.mrb[48].mxu0 %v4139_v51  ;;  %v4241_v51 = vld [vmem:[%s4389_s15 + $0x1c8] ss:$36 sps:$4 sm:$0xff]  }
  0x88   : > { %3921 = vmatpush3.bf16.msra.mxu0 %v4145_v29  ;;  %2033 = vmatprep.mubr.bf16.mxu1 %v4146_v53  ;;  %v4206_v29 = vld [vmem:[%s4389_s15 + $0x64] ss:$36 sps:$4 sm:$0xff]   ;;  %v4243_v52 = vld [vmem:[%s4389_s15 + $0x44c] ss:$36 sps:$4 sm:$0xff]   ;;  %v4245_v53 = vld [vmem:[%s4389_s15 + $0x214] ss:$36 sps:$4 sm:$0xff]  }
  0x89   : > { %2130 = vmatprep.mubr.bf16.mxu0 %v4148_v54  ;;  %3922 = vmatprep.subr.bf16.mxu0 %v4160_v55 }
  0x8c   : > { %3923 = vmatpush3.bf16.msra.mxu0 %v4160_v55 }
  0x8d   : > { %3924 = vmatprep.subr.bf16.mxu0 %v4175_v56 }
  0x8f   : > { %2034 = vmatmul.mubr.bf16.gmra.mrb[52].mxu1 %v4150_v57  ;;  %2131 = vmatmul.mubr.bf16.gmra.mrb[52].mxu0 %v4151_v58  ;;  %v4247_v58 = vld [vmem:[%s4389_s15 + $0x448] ss:$36 sps:$4 sm:$0xff]  }
  0x90   : > { %2041 = vmatprep.mubr.bf16.mxu1 %v4152_v59  ;;  %2138 = vmatprep.mubr.bf16.mxu0 %v4154_v60  ;;  %v4248_v59 = vld [vmem:[%s4389_s15 + $0x210] ss:$36 sps:$4 sm:$0xff]  }
  0x91   : > { %3925 = vmatpush3.bf16.msra.mxu0 %v4175_v56 }
  0x92   : > { %3926 = vmatprep.subr.bf16.mxu0 %v4190_v61 }
  0x95   : > { %3927 = vmatpush3.bf16.msra.mxu0 %v4190_v61 }
  0x96   : > { %3928 = vmatprep.subr.bf16.mxu0 %v4203_v62 }
  0x97   : > { %2042 = vmatmul.mubr.bf16.gmra.mrb[56].mxu1 %v4156_v63  ;;  %2139 = vmatmul.mubr.bf16.gmra.mrb[56].mxu0 %v4157_v0  ;;  %v4249_v0 = vld [vmem:[%s4389_s15 + $0x25c] ss:$36 sps:$4 sm:$0xff]  }
  0x98   : > { %2049 = vmatprep.mubr.bf16.mxu1 %v4161_v1  ;;  %2146 = vmatprep.mubr.bf16.mxu0 %v4163_v2  ;;  %v4251_v1 = vld [vmem:[%s4389_s15 + $0x20] ss:$36 sps:$4 sm:$0xff]  }
  0x99   : > { %3929 = vmatpush3.bf16.msra.mxu0 %v4203_v62 }
  0x9a   : > { %3930 = vmatprep.subr.bf16.mxu0 %v4216_v3 }
  0x9d   : > { %3931 = vmatpush3.bf16.msra.mxu0 %v4216_v3 }
  0x9e   : > { %3932 = vmatprep.subr.bf16.mxu0 %v4229_v6 }
  0x9f   : > { %2050 = vmatmul.mubr.bf16.gmra.mrb[60].mxu1 %v4165_v4  ;;  %2147 = vmatmul.mubr.bf16.gmra.mrb[60].mxu0 %v4166_v5 }
  0xa0   : > { %2057 = vmatprep.mubr.bf16.mxu1 %v4167_v7  ;;  %2154 = vmatprep.mubr.bf16.mxu0 %v4169_v8 }
  0xa1   : > { %3933 = vmatpush3.bf16.msra.mxu0 %v4229_v6 }
  0xa2   : > { %3934 = vmatprep.subr.bf16.mxu0 %v4242_v9 }
  0xa5   : > { %3935 = vmatpush3.bf16.msra.mxu0 %v4242_v9 }
  0xa7   : > { %2058 = vmatmul.mubr.bf16.gmra.mrb[64].mxu1 %v4171_v10  ;;  %2155 = vmatmul.mubr.bf16.gmra.mrb[64].mxu0 %v4172_v11  ;;  %v4252_v10 = vld [vmem:[%s4389_s15 + $0x258] ss:$36 sps:$4 sm:$0xff]   ;;  %v4253_v11 = vld [vmem:[%s4389_s15 + $0x68] ss:$36 sps:$4 sm:$0xff]  }
  0xa8   : > { %2065 = vmatprep.mubr.bf16.mxu1 %v4176_v12  ;;  %2162 = vmatprep.mubr.bf16.mxu0 %v4178_v13 }
  0xaf   : > { %2066 = vmatmul.mubr.bf16.gmra.mrb[68].mxu1 %v4180_v14  ;;  %2163 = vmatmul.mubr.bf16.gmra.mrb[68].mxu0 %v4181_v15 }
  0xb0   : > { %2073 = vmatprep.mubr.bf16.mxu1 %v4182_v16  ;;  %2170 = vmatprep.mubr.bf16.mxu0 %v4184_v17  ;;  %v4254_v16 = vld [vmem:[%s4389_s15 + $0x2a4] ss:$36 sps:$4 sm:$0xff]   ;;  %v4256_v17 = vld [vmem:[%s4389_s15 + $0xb0] ss:$36 sps:$4 sm:$0xff]  }
  0xb7   : > { %2074 = vmatmul.mubr.bf16.gmra.mrb[72].mxu1 %v4186_v18  ;;  %2171 = vmatmul.mubr.bf16.gmra.mrb[72].mxu0 %v4187_v19 }
  0xb8   : > { %2081 = vmatprep.mubr.bf16.mxu1 %v4191_v20  ;;  %2178 = vmatprep.mubr.bf16.mxu0 %v4193_v21 }
  0xbf   : > { %2082 = vmatmul.mubr.bf16.gmra.mrb[76].mxu1 %v4195_v22  ;;  %2179 = vmatmul.mubr.bf16.gmra.mrb[76].mxu0 %v4196_v23 }
  0xc0   : > { %2186 = vmatprep.mubr.bf16.mxu0 %v4197_v24  ;;  %2283 = vmatprep.mubr.bf16.mxu1 %v4201_v25 }
  0xc7   : > { %2187 = vmatmul.mubr.bf16.gmra.mrb[80].mxu0 %v4202_v27  ;;  %2284 = vmatmul.mubr.bf16.vlgmr.msra.gmra.mrb[80].mxu1 %v4199_v26  ;;  %v4257_v26 = vld [vmem:[%s4389_s15 + $0x2a0] ss:$36 sps:$4 sm:$0xff]   ;;  %v4258_v27 = vld [vmem:[%s4389_s15 + $0xf8] ss:$36 sps:$4 sm:$0xff]  }
  0xc8   : > { %2194 = vmatprep.mubr.bf16.mxu0 %v4204_v28  ;;  %2291 = vmatprep.mubr.bf16.mxu1 %v4206_v29 }
  0xcf   : > { %2195 = vmatmul.mubr.bf16.gmra.mrb[84].mxu0 %v4208_v30  ;;  %2292 = vmatmul.mubr.bf16.gmra.mrb[84].mxu1 %v4209_v31 }
  0xd0   : > { %2202 = vmatprep.mubr.bf16.mxu0 %v4210_v32  ;;  %2299 = vmatprep.mubr.bf16.mxu1 %v4212_v33  ;;  %v4259_v32 = vld [vmem:[%s4389_s15 + $0x2ec] ss:$36 sps:$4 sm:$0xff]   ;;  %v4261_v33 = vld [vmem:[%s4389_s15 + $0x140] ss:$36 sps:$4 sm:$0xff]  }
  0xd7   : > { %2203 = vmatmul.mubr.bf16.gmra.mrb[88].mxu0 %v4214_v34  ;;  %2300 = vmatmul.mubr.bf16.gmra.mrb[88].mxu1 %v4215_v35 }
  0xd8   : > { %2210 = vmatprep.mubr.bf16.mxu0 %v4217_v36  ;;  %2307 = vmatprep.mubr.bf16.mxu1 %v4219_v37 }
  0xdf   : > { %2211 = vmatmul.mubr.bf16.gmra.mrb[92].mxu0 %v4221_v38  ;;  %2308 = vmatmul.mubr.bf16.gmra.mrb[92].mxu1 %v4222_v39 }
  0xe0   : > { %2218 = vmatprep.mubr.bf16.mxu0 %v4223_v40  ;;  %2315 = vmatprep.mubr.bf16.mxu1 %v4225_v41 }
  0xe7   : > { %2219 = vmatmul.mubr.bf16.gmra.mrb[96].mxu0 %v4227_v42  ;;  %2316 = vmatmul.mubr.bf16.gmra.mrb[96].mxu1 %v4228_v43  ;;  %v4262_v42 = vld [vmem:[%s4389_s15 + $0x2e8] ss:$36 sps:$4 sm:$0xff]  }
  0xe8   : > { %2226 = vmatprep.mubr.bf16.mxu0 %v4230_v44  ;;  %2323 = vmatprep.mubr.bf16.mxu1 %v4232_v45  ;;  %v4263_v43 = vld [vmem:[%s4389_s15 + $0x188] ss:$36 sps:$4 sm:$0xff]  }
  0xef   : > { %2227 = vmatmul.mubr.bf16.gmra.mrb[100].mxu0 %v4234_v46  ;;  %2324 = vmatmul.mubr.bf16.gmra.mrb[100].mxu1 %v4235_v47 }
  0xf0   : > { %2234 = vmatprep.mubr.bf16.mxu0 %v4236_v48  ;;  %2331 = vmatprep.mubr.bf16.mxu1 %v4238_v49  ;;  %v4264_v48 = vld [vmem:[%s4389_s15 + $0x334] ss:$36 sps:$4 sm:$0xff]  }
  0xf1   : > { %v4266_v49 = vld [vmem:[%s4389_s15 + $0x1d0] ss:$36 sps:$4 sm:$0xff]  }
  0xf7   : > { %2235 = vmatmul.mubr.bf16.gmra.mrb[104].mxu0 %v4240_v50  ;;  %2332 = vmatmul.mubr.bf16.gmra.mrb[104].mxu1 %v4241_v51 }
  0xf8   : > { %2242 = vmatprep.mubr.bf16.mxu0 %v4243_v52  ;;  %2339 = vmatprep.mubr.bf16.mxu1 %v4245_v53 }
  0xfa   : > { %v3536_v54 = vpop.f32.mrb[0].mxu1  ;;  %v3464_v55 = vpop.f32.mrb[0].mxu0 }
  0xfb   : > { %v3537_v56 = vpop.f32.mrb[1].mxu1  ;;  %v3465_v57 = vpop.f32.mrb[1].mxu0 }
  0xfc   : > { %v4692_v60 = vadd.f32 %v3537_v56, %v3536_v54  ;;  %v3539_v61 = vpop.f32.mrb[2].mxu1  ;;  %v4694_v62 = vadd.f32 %v3465_v57, %v3464_v55  ;;  %v3467_v63 = vpop.f32.mrb[2].mxu0  ;;  %v4741_v54 = vld [vmem:[%s5167_s2] ss:$0 sm:$0xff] }
  0xfd   : > { %v3540_v2 = vpop.f32.mrb[3].mxu1  ;;  %v3468_v3 = vpop.f32.mrb[3].mxu0 }
  0xfe   : > { %v4698_v4 = vadd.f32 %v3540_v2, %v3539_v61  ;;  %v4700_v5 = vadd.f32 %v3468_v3, %v3467_v63  ;;  %v4268_v61 = vld [vmem:[%s4389_s15 + $0x218] ss:$36 sps:$4 sm:$0xff]   ;;  %v1803_v63 = vadd.f32 %v4694_v62, %v4741_v54 }
  0xff   : > { %2243 = vmatmul.mubr.bf16.gmra.mrb[108].mxu0 %v4247_v58  ;;  %2340 = vmatmul.mubr.bf16.gmra.mrb[108].mxu1 %v4248_v59  ;;  %v4267_v59 = vld [vmem:[%s4389_s15 + $0x330] ss:$36 sps:$4 sm:$0xff]  }
 0x100   : > { %2347 = vmatprep.mubr.bf16.mxu1 %v4249_v0  ;;  %3936 = vmatprep.mubr.bf16.mxu0 %v4251_v1 }
 0x102   : > { %v3542_v6 = vpop.f32.mrb[4].mxu1  ;;  %v3470_v7 = vpop.f32.mrb[4].mxu0 }
 0x103   : > { %v3543_v8 = vpop.f32.mrb[5].mxu1  ;;  %v3471_v9 = vpop.f32.mrb[5].mxu0 }
 0x104   : > { %v4704_v12 = vadd.f32 %v3543_v8, %v3542_v6  ;;  %v3545_v13 = vpop.f32.mrb[6].mxu1  ;;  %v4706_v14 = vadd.f32 %v3471_v9, %v3470_v7  ;;  %v3473_v15 = vpop.f32.mrb[6].mxu0  ;;  %v4269_v6 = vld [vmem:[%s4389_s15 + $0x37c] ss:$36 sps:$4 sm:$0xff]  }
 0x105   : > { %v3546_v18 = vpop.f32.mrb[7].mxu1  ;;  %v3474_v19 = vpop.f32.mrb[7].mxu0  ;;  %v4271_v7 = vld [vmem:[%s4389_s15 + $0x260] ss:$36 sps:$4 sm:$0xff]  }
 0x106   : > { %v4710_v20 = vadd.f32 %v3546_v18, %v3545_v13  ;;  %v4712_v21 = vadd.f32 %v3474_v19, %v3473_v15 }
 0x107   : > { %2348 = vmatmul.mubr.bf16.gmra.mrb[112].mxu1 %v4252_v10  ;;  %3937 = vmatmul.mubr.bf16.vlgmr.msra.gmra.mrb[112].mxu0 %v4253_v11  ;;  %v1806_v10 = vadd.f32 %v4700_v5, %v4741_v54  ;;  %v1811_v5 = vadd.f32 %v4706_v14, %v4741_v54 }
 0x108   : > { %2355 = vmatprep.mubr.bf16.mxu1 %v4254_v16  ;;  %3940 = vmatprep.mubr.bf16.mxu0 %v4256_v17 }
 0x10a   : > { %v3548_v22 = vpop.f32.mrb[8].mxu1  ;;  %v3476_v23 = vpop.f32.mrb[8].mxu0 }
 0x10b   : > { %v3549_v24 = vpop.f32.mrb[9].mxu1  ;;  %v3477_v25 = vpop.f32.mrb[9].mxu0 }
 0x10c   : > { %v4716_v28 = vadd.f32 %v3549_v24, %v3548_v22  ;;  %v3551_v29 = vpop.f32.mrb[10].mxu1  ;;  %v4718_v30 = vadd.f32 %v3477_v25, %v3476_v23  ;;  %v3479_v31 = vpop.f32.mrb[10].mxu0  ;;  %v4272_v22 = vld [vmem:[%s4389_s15 + $0x378] ss:$36 sps:$4 sm:$0xff]   ;;  %v4273_v23 = vld [vmem:[%s4389_s15 + $0x2a8] ss:$36 sps:$4 sm:$0xff]  }
 0x10d   : > { %v3552_v34 = vpop.f32.mrb[11].mxu1  ;;  %v3480_v35 = vpop.f32.mrb[11].mxu0 }
 0x10e   : > { %v4722_v36 = vadd.f32 %v3552_v34, %v3551_v29  ;;  %v4724_v37 = vadd.f32 %v3480_v35, %v3479_v31  ;;  %v4274_v29 = vld [vmem:[%s4389_s15 + $0x3c4] ss:$36 sps:$4 sm:$0xff]   ;;  %v4276_v31 = vld [vmem:[%s4389_s15 + $0x2f0] ss:$36 sps:$4 sm:$0xff]   ;;  %v1814_v34 = vadd.f32 %v4712_v21, %v4741_v54  ;;  %v1819_v21 = vadd.f32 %v4718_v30, %v4741_v54 }
 0x10f   : > { %2356 = vmatmul.mubr.bf16.gmra.mrb[116].mxu1 %v4257_v26  ;;  %3941 = vmatmul.mubr.bf16.gmra.mrb[116].mxu0 %v4258_v27 }
 0x110   : > { %2363 = vmatprep.mubr.bf16.mxu1 %v4259_v32  ;;  %3944 = vmatprep.mubr.bf16.mxu0 %v4261_v33 }
 0x112   : > { %v3554_v38 = vpop.f32.mrb[12].mxu1  ;;  %v3482_v39 = vpop.f32.mrb[12].mxu0 }
 0x113   : > { %v3555_v40 = vpop.f32.mrb[13].mxu1  ;;  %v3483_v41 = vpop.f32.mrb[13].mxu0 }
 0x114   : > { %v4728_v44 = vadd.f32 %v3555_v40, %v3554_v38  ;;  %v3557_v45 = vpop.f32.mrb[14].mxu1  ;;  %v4730_v46 = vadd.f32 %v3483_v41, %v3482_v39  ;;  %v3485_v47 = vpop.f32.mrb[14].mxu0 }
 0x115   : > { %v3558_v50 = vpop.f32.mrb[15].mxu1  ;;  %v3486_v51 = vpop.f32.mrb[15].mxu0 }
 0x116   : > { %v4734_v52 = vadd.f32 %v3558_v50, %v3557_v45  ;;  %v4736_v53 = vadd.f32 %v3486_v51, %v3485_v47  ;;  %v4277_v45 = vld [vmem:[%s4389_s15 + $0x3c0] ss:$36 sps:$4 sm:$0xff]   ;;  %v4278_v47 = vld [vmem:[%s4389_s15 + $0x338] ss:$36 sps:$4 sm:$0xff]  }
 0x117   : > { %2364 = vmatmul.mubr.bf16.gmra.mrb[120].mxu1 %v4262_v42  ;;  %3945 = vmatmul.mubr.bf16.gmra.mrb[120].mxu0 %v4263_v43 }
 0x118   : > { %2371 = vmatprep.mubr.bf16.mxu1 %v4264_v48  ;;  %3948 = vmatprep.mubr.bf16.mxu0 %v4266_v49 }
 0x11a   : > { %v3576_v55 = vpop.f32.mrb[16].mxu1  ;;  %v3488_v56 = vpop.f32.mrb[16].mxu0 }
 0x11b   : > { %v3577_v57 = vpop.f32.mrb[17].mxu1  ;;  %v3489_v58 = vpop.f32.mrb[17].mxu0 }
 0x11c   : > { %v3578_v0 = vadd.f32 %v3577_v57, %v3576_v55  ;;  %v3579_v1 = vpop.f32.mrb[18].mxu1  ;;  %v4747_v2 = vadd.f32 %v3489_v58, %v3488_v56  ;;  %v3491_v3 = vpop.f32.mrb[18].mxu0  ;;  %v4279_v55 = vld [vmem:[%s4389_s15 + $0x40c] ss:$36 sps:$4 sm:$0xff]   ;;  %v4281_v56 = vld [vmem:[%s4389_s15 + $0x380] ss:$36 sps:$4 sm:$0xff]  }
 0x11d   : > { %v3580_v8 = vpop.f32.mrb[19].mxu1  ;;  %v3492_v9 = vpop.f32.mrb[19].mxu0 }
 0x11e   : > { %v4753_v11 = vadd.f32 %v3578_v0, %v1803_v63  ;;  %v3581_v13 = vadd.f32 %v3580_v8, %v3579_v1  ;;  %v4755_v15 = vadd.f32 %v3492_v9, %v3491_v3  ;;  %v4282_v8 = vld [vmem:[%s4389_s15 + $0x408] ss:$36 sps:$4 sm:$0xff]  }
 0x11f   : > { %2372 = vmatmul.mubr.bf16.gmra.mrb[124].mxu1 %v4267_v59  ;;  %3949 = vmatmul.mubr.bf16.gmra.mrb[124].mxu0 %v4268_v61  ;;  %v1822_v59 = vadd.f32 %v4724_v37, %v4741_v54  ;;  %v4283_v9 = vld [vmem:[%s4389_s15 + $0x3c8] ss:$36 sps:$4 sm:$0xff]   ;;  %v1827_v37 = vadd.f32 %v4730_v46, %v4741_v54 }
 0x120   : > { %v4757_v62 = vadd.f32 %v3581_v13, %v1806_v10  ;;  %2379 = vmatprep.mubr.bf16.mxu1 %v4269_v6  ;;  %3952 = vmatprep.mubr.bf16.mxu0 %v4271_v7 }
 0x122   : > { %v3582_v16 = vpop.f32.mrb[20].mxu1  ;;  %v3494_v17 = vpop.f32.mrb[20].mxu0 }
 0x123   : > { %v3583_v18 = vpop.f32.mrb[21].mxu1  ;;  %v3495_v19 = vpop.f32.mrb[21].mxu0 }
 0x124   : > { %v3584_v24 = vadd.f32 %v3583_v18, %v3582_v16  ;;  %v3585_v25 = vpop.f32.mrb[22].mxu1  ;;  %v4763_v26 = vadd.f32 %v3495_v19, %v3494_v17  ;;  %v3497_v27 = vpop.f32.mrb[22].mxu0  ;;  %v4284_v18 = vld [vmem:[%s4389_s15 + $0x454] ss:$36 sps:$4 sm:$0xff]  }
 0x125   : > { %v3586_v32 = vpop.f32.mrb[23].mxu1  ;;  %v3498_v33 = vpop.f32.mrb[23].mxu0  ;;  %v4286_v19 = vld [vmem:[%s4389_s15 + $0x410] ss:$36 sps:$4 sm:$0xff]  }
 0x126   : > { %v4769_v35 = vadd.f32 %v3584_v24, %v1811_v5  ;;  %v3587_v38 = vadd.f32 %v3586_v32, %v3585_v25  ;;  %v4771_v39 = vadd.f32 %v3498_v33, %v3497_v27  ;;  %v1830_v5 = vadd.f32 %v4736_v53, %v4741_v54 }
 0x127   : > { %2380 = vmatmul.mubr.bf16.gmra.mrb[128].mxu1 %v4272_v22  ;;  %3953 = vmatmul.mubr.bf16.gmra.mrb[128].mxu0 %v4273_v23  ;;  %v1835_v53 = vadd.f32 %v4747_v2, %v4741_v54 }
 0x128   : > { %v4773_v14 = vadd.f32 %v3587_v38, %v1814_v34  ;;  %2387 = vmatprep.mubr.bf16.mxu1 %v4274_v29  ;;  %3956 = vmatprep.mubr.bf16.mxu0 %v4276_v31  ;;  %v4287_v34 = vld [vmem:[%s4389_s15 + $0x450] ss:$36 sps:$4 sm:$0xff]   ;;  %v4288_v38 = vld [vmem:[%s4389_s15 + $0x458] ss:$36 sps:$4 sm:$0xff]   ;;  %s2988_s15 = sshll.u32 %s5175_s21, 2 }
 0x129   : > { %s5053_s24 = scalar_lea.vmem %s5168_s3, %s2988_s15  ;;  %s5086_s27 = scalar_lea.vmem %s5169_s4, %s2988_s15 }
 0x12a   : > { %v3588_v40 = vpop.f32.mrb[24].mxu1  ;;  %v3500_v41 = vpop.f32.mrb[24].mxu0 }
 0x12b   : > { %v3589_v42 = vpop.f32.mrb[25].mxu1  ;;  %v3501_v43 = vpop.f32.mrb[25].mxu0 }
 0x12c   : > { %v3590_v48 = vadd.f32 %v3589_v42, %v3588_v40  ;;  %v3591_v49 = vpop.f32.mrb[26].mxu1  ;;  %v4779_v50 = vadd.f32 %v3501_v43, %v3500_v41  ;;  %v3503_v51 = vpop.f32.mrb[26].mxu0 }
 0x12d   : > { %v3592_v57 = vpop.f32.mrb[27].mxu1  ;;  %v3504_v58 = vpop.f32.mrb[27].mxu0 }
 0x12e   : > { %v4785_v61 = vadd.f32 %v3590_v48, %v1819_v21  ;;  %v3593_v63 = vadd.f32 %v3592_v57, %v3591_v49  ;;  %v4787_v0 = vadd.f32 %v3504_v58, %v3503_v51  ;;  %v1838_v21 = vadd.f32 %v4755_v15, %v4741_v54 }
 0x12f   : > { %2388 = vmatmul.mubr.bf16.gmra.mrb[132].mxu1 %v4277_v45  ;;  %3957 = vmatmul.mubr.bf16.gmra.mrb[132].mxu0 %v4278_v47 }
 0x130   : > { %v4789_v30 = vadd.f32 %v3593_v63, %v1822_v59  ;;  %2395 = vmatprep.mubr.bf16.mxu1 %v4279_v55  ;;  %3960 = vmatprep.mubr.bf16.mxu0 %v4281_v56  ;;  %v1843_v59 = vadd.f32 %v4763_v26, %v4741_v54 }
 0x132   : > { %v3594_v1 = vpop.f32.mrb[28].mxu1  ;;  %v3506_v3 = vpop.f32.mrb[28].mxu0 }
 0x133   : > { %v3595_v6 = vpop.f32.mrb[29].mxu1  ;;  %v3507_v7 = vpop.f32.mrb[29].mxu0 }
 0x134   : > { %v3596_v10 = vadd.f32 %v3595_v6, %v3594_v1  ;;  %v3597_v13 = vpop.f32.mrb[30].mxu1  ;;  %v4795_v16 = vadd.f32 %v3507_v7, %v3506_v3  ;;  %v3509_v17 = vpop.f32.mrb[30].mxu0 }
 0x135   : > { %v3598_v22 = vpop.f32.mrb[31].mxu1  ;;  %v3510_v23 = vpop.f32.mrb[31].mxu0 }
 0x136   : > { %v4801_v24 = vadd.f32 %v3596_v10, %v1827_v37  ;;  %v3599_v25 = vadd.f32 %v3598_v22, %v3597_v13  ;;  %v4803_v27 = vadd.f32 %v3510_v23, %v3509_v17  ;;  %v1851_v22 = vadd.f32 %v4779_v50, %v4741_v54 }
 0x137   : > { %2396 = vmatmul.mubr.bf16.gmra.mrb[136].mxu1 %v4282_v8  ;;  %3961 = vmatmul.mubr.bf16.gmra.mrb[136].mxu0 %v4283_v9  ;;  %v1846_v8 = vadd.f32 %v4771_v39, %v4741_v54 }
 0x138   : > { %v4805_v46 = vadd.f32 %v3599_v25, %v1830_v5  ;;  %2403 = vmatprep.mubr.bf16.mxu1 %v4284_v18  ;;  %3964 = vmatprep.mubr.bf16.mxu0 %v4286_v19 }
 0x13a   : > { %v3600_v29 = vpop.f32.mrb[32].mxu1  ;;  %v3512_v31 = vpop.f32.mrb[32].mxu0 }
 0x13b   : > { %v3601_v32 = vpop.f32.mrb[33].mxu1  ;;  %v3513_v33 = vpop.f32.mrb[33].mxu0 }
 0x13c   : > { %v3602_v40 = vadd.f32 %v3601_v32, %v3600_v29  ;;  %v3603_v41 = vpop.f32.mrb[34].mxu1  ;;  %v4811_v42 = vadd.f32 %v3513_v33, %v3512_v31  ;;  %v3515_v43 = vpop.f32.mrb[34].mxu0  ;;  %v1854_v32 = vadd.f32 %v4787_v0, %v4741_v54 }
 0x13d   : > { %v3604_v45 = vpop.f32.mrb[35].mxu1  ;;  %v3516_v47 = vpop.f32.mrb[35].mxu0 }
 0x13e   : > { %v4815_v48 = vadd.f32 %v3602_v40, %v1835_v53  ;;  %v3605_v49 = vadd.f32 %v3604_v45, %v3603_v41  ;;  %v3517_v51 = vadd.f32 %v3516_v47, %v3515_v43  ;;  %v1859_v45 = vadd.f32 %v4795_v16, %v4741_v54 }
 0x13f   : > { %2404 = vmatmul.mubr.bf16.gmra.mrb[140].mxu1 %v4287_v34  ;;  %3965 = vmatmul.mubr.bf16.gmra.mrb[140].mxu0 %v4288_v38 }
 0x140   : > { %v4817_v55 = vadd.f32 %v3605_v49, %v1838_v21 }
 0x142   : > { %v3606_v56 = vpop.f32.mrb[36].mxu1  ;;  %v3518_v2 = vpop.f32.mrb[36].mxu0 }
 0x143   : > { %v3607_v57 = vpop.f32.mrb[37].mxu1  ;;  %v3519_v58 = vpop.f32.mrb[37].mxu0 }
 0x144   : > { %v3608_v63 = vadd.f32 %v3607_v57, %v3606_v56  ;;  %v3609_v1 = vpop.f32.mrb[38].mxu1  ;;  %v4821_v3 = vadd.f32 %v3519_v58, %v3518_v2  ;;  %v3521_v15 = vpop.f32.mrb[38].mxu0  ;;  %v1862_v57 = vadd.f32 %v4803_v27, %v4741_v54  ;;  %v1870_v27 = vadd.f32 %v3517_v51, %v4741_v54 }
 0x145   : > { %v3610_v6 = vpop.f32.mrb[39].mxu1  ;;  %v3522_v7 = vpop.f32.mrb[39].mxu0 }
 0x146   : > { %v4825_v9 = vadd.f32 %v3608_v63, %v1843_v59  ;;  %v3611_v37 = vadd.f32 %v3610_v6, %v3609_v1  ;;  %v3523_v10 = vadd.f32 %v3522_v7, %v3521_v15  ;;  %v1875_v51 = vadd.f32 %v4821_v3, %v4741_v54 }
 0x148   : > { %v4827_v13 = vadd.f32 %v3611_v37, %v1846_v8  ;;  %v1867_v8 = vadd.f32 %v4811_v42, %v4741_v54 }
 0x14a   : > { %v3612_v17 = vpop.f32.mrb[40].mxu1  ;;  %v3524_v18 = vpop.f32.mrb[40].mxu0 }
 0x14b   : > { %v3613_v19 = vpop.f32.mrb[41].mxu1  ;;  %v3525_v26 = vpop.f32.mrb[41].mxu0 }
 0x14c   : > { %v3614_v23 = vadd.f32 %v3613_v19, %v3612_v17  ;;  %v3615_v5 = vpop.f32.mrb[42].mxu1  ;;  %v4831_v25 = vadd.f32 %v3525_v26, %v3524_v18  ;;  %v3527_v29 = vpop.f32.mrb[42].mxu0 }
 0x14d   : > { %v3616_v31 = vpop.f32.mrb[43].mxu1  ;;  %v3528_v39 = vpop.f32.mrb[43].mxu0 }
 0x14e   : > { %v4835_v33 = vadd.f32 %v3614_v23, %v1851_v22  ;;  %v3617_v34 = vadd.f32 %v3616_v31, %v3615_v5  ;;  %v4837_v38 = vadd.f32 %v3528_v39, %v3527_v29 }
 0x150   : > { %v4839_v53 = vadd.f32 %v3617_v34, %v1854_v32 }
 0x152   : > { %v3618_v40 = vpop.f32.mrb[44].mxu1  ;;  %v3530_v41 = vpop.f32.mrb[44].mxu0 }
 0x153   : > { %v3619_v50 = vpop.f32.mrb[45].mxu1  ;;  %v3531_v43 = vpop.f32.mrb[45].mxu0 }
 0x154   : > { %v3620_v47 = vadd.f32 %v3619_v50, %v3618_v40  ;;  %v3621_v21 = vpop.f32.mrb[46].mxu1  ;;  %v4843_v49 = vadd.f32 %v3531_v43, %v3530_v41  ;;  %v3533_v56 = vpop.f32.mrb[46].mxu0 }
 0x155   : > { %v3622_v0 = vpop.f32.mrb[47].mxu1  ;;  %v3534_v2 = vpop.f32.mrb[47].mxu0 }
 0x156   : > { %v4847_v58 = vadd.f32 %v3620_v47, %v1859_v45  ;;  %v3623_v59 = vadd.f32 %v3622_v0, %v3621_v21  ;;  %v4849_v63 = vadd.f32 %v3534_v2, %v3533_v56 }
 0x158   : > { %v4851_v1 = vadd.f32 %v3623_v59, %v1862_v57 }
 0x15a   : > { %v3624_v15 = vpop.f32.mrb[48].mxu1  ;;  %v3688_v6 = vpop.f32.mrb[48].mxu0 }
 0x15b   : > { %v3625_v16 = vpop.f32.mrb[49].mxu1  ;;  %v3689_v7 = vpop.f32.mrb[49].mxu0 }
 0x15c   : > { %v3626_v37 = vadd.f32 %v3625_v16, %v3624_v15  ;;  %v3690_v17 = vadd.f32 %v3689_v7, %v3688_v6  ;;  %v3627_v18 = vpop.f32.mrb[50].mxu1  ;;  %v3691_v19 = vpop.f32.mrb[50].mxu0 }
 0x15d   : > { %v3628_v26 = vpop.f32.mrb[51].mxu1  ;;  %v3692_v22 = vpop.f32.mrb[51].mxu0 }
 0x15e   : > { %v4856_v23 = vadd.f32 %v3626_v37, %v1867_v8  ;;  %v4859_v5 = vadd.f32 %v3690_v17, %v4753_v11  ;;  %v3629_v29 = vadd.f32 %v3628_v26, %v3627_v18  ;;  %v3693_v31 = vadd.f32 %v3692_v22, %v3691_v19 }
 0x15f   : > { %v1878_v11 = vadd.f32 %v3523_v10, %v4741_v54  ;;  %v1883_v10 = vadd.f32 %v4831_v25, %v4741_v54 }
 0x160   : > { %v4861_v39 = vadd.f32 %v3629_v29, %v1870_v27  ;;  %v4864_v32 = vadd.f32 %v3693_v31, %v4757_v62 }
 0x162   : > { %v3630_v42 = vpop.f32.mrb[52].mxu1  ;;  %v3694_v34 = vpop.f32.mrb[52].mxu0 }
 0x163   : > { %v3631_v40 = vpop.f32.mrb[53].mxu1  ;;  %v3695_v41 = vpop.f32.mrb[53].mxu0 }
 0x164   : > { %v3632_v50 = vadd.f32 %v3631_v40, %v3630_v42  ;;  %v3696_v43 = vadd.f32 %v3695_v41, %v3694_v34  ;;  %v3633_v45 = vpop.f32.mrb[54].mxu1  ;;  %v3697_v47 = vpop.f32.mrb[54].mxu0 }
 0x165   : > { %v3634_v21 = vpop.f32.mrb[55].mxu1  ;;  %v3698_v56 = vpop.f32.mrb[55].mxu0 }
 0x166   : > { %v4869_v0 = vadd.f32 %v3632_v50, %v1875_v51  ;;  %v4872_v62 = vadd.f32 %v3696_v43, %v4769_v35  ;;  %v3635_v2 = vadd.f32 %v3634_v21, %v3633_v45  ;;  %v3699_v57 = vadd.f32 %v3698_v56, %v3697_v47 }
 0x167   : > { %v1886_v35 = vadd.f32 %v4837_v38, %v4741_v54  ;;  %v1891_v38 = vadd.f32 %v4843_v49, %v4741_v54 }
 0x168   : > { %v4874_v59 = vadd.f32 %v3635_v2, %v1878_v11  ;;  %v4877_v15 = vadd.f32 %v3699_v57, %v4773_v14 }
 0x16a   : > { %v3636_v3 = vpop.f32.mrb[56].mxu1  ;;  %v3700_v6 = vpop.f32.mrb[56].mxu0 }
 0x16b   : > { %v3637_v16 = vpop.f32.mrb[57].mxu1  ;;  %v3701_v7 = vpop.f32.mrb[57].mxu0 }
 0x16c   : > { %v3638_v8 = vadd.f32 %v3637_v16, %v3636_v3  ;;  %v3702_v37 = vadd.f32 %v3701_v7, %v3700_v6  ;;  %v3639_v17 = vpop.f32.mrb[58].mxu1  ;;  %v3703_v18 = vpop.f32.mrb[58].mxu0 }
 0x16d   : > { %v3640_v19 = vpop.f32.mrb[59].mxu1  ;;  %v3704_v27 = vpop.f32.mrb[59].mxu0 }
 0x16e   : > { %v4883_v26 = vadd.f32 %v3638_v8, %v1883_v10  ;;  %v4886_v14 = vadd.f32 %v3702_v37, %v4785_v61  ;;  %v3641_v22 = vadd.f32 %v3640_v19, %v3639_v17  ;;  %v3705_v29 = vadd.f32 %v3704_v27, %v3703_v18 }
 0x16f   : > { %v1894_v61 = vadd.f32 %v4849_v63, %v4741_v54  ;;  %v1899_v63 = vadd.f32 %v4692_v60, %v4741_v54 }
 0x170   : > { %v4888_v31 = vadd.f32 %v3641_v22, %v1886_v35  ;;  %v4891_v25 = vadd.f32 %v3705_v29, %v4789_v30 }
 0x172   : > { %v3642_v42 = vpop.f32.mrb[60].mxu1  ;;  %v3706_v34 = vpop.f32.mrb[60].mxu0 }
 0x173   : > { %v3643_v40 = vpop.f32.mrb[61].mxu1  ;;  %v3707_v41 = vpop.f32.mrb[61].mxu0 }
 0x174   : > { %v3644_v51 = vadd.f32 %v3643_v40, %v3642_v42  ;;  %v3708_v50 = vadd.f32 %v3707_v41, %v3706_v34  ;;  %v3645_v43 = vpop.f32.mrb[62].mxu1  ;;  %v3709_v45 = vpop.f32.mrb[62].mxu0 }
 0x175   : > { %v3646_v47 = vpop.f32.mrb[63].mxu1  ;;  %v3710_v11 = vpop.f32.mrb[63].mxu0 }
 0x176   : > { %v4897_v21 = vadd.f32 %v3644_v51, %v1891_v38  ;;  %v4900_v30 = vadd.f32 %v3708_v50, %v4801_v24  ;;  %v3647_v56 = vadd.f32 %v3646_v47, %v3645_v43  ;;  %v3711_v2 = vadd.f32 %v3710_v11, %v3709_v45 }
 0x177   : > { %v1902_v24 = vadd.f32 %v4698_v4, %v4741_v54  ;;  %v1907_v4 = vadd.f32 %v4704_v12, %v4741_v54 }
 0x178   : > { %v4902_v57 = vadd.f32 %v3647_v56, %v1894_v61  ;;  %v4905_v49 = vadd.f32 %v3711_v2, %v4805_v46 }
 0x17a   : > { %v3648_v3 = vpop.f32.mrb[64].mxu1  ;;  %v3712_v6 = vpop.f32.mrb[64].mxu0 }
 0x17b   : > { %v3649_v16 = vpop.f32.mrb[65].mxu1  ;;  %v3713_v7 = vpop.f32.mrb[65].mxu0 }
 0x17c   : > { %v3650_v10 = vadd.f32 %v3649_v16, %v3648_v3  ;;  %v3714_v8 = vadd.f32 %v3713_v7, %v3712_v6  ;;  %v3651_v37 = vpop.f32.mrb[66].mxu1  ;;  %v3715_v17 = vpop.f32.mrb[66].mxu0 }
 0x17d   : > { %v3652_v18 = vpop.f32.mrb[67].mxu1  ;;  %v3716_v35 = vpop.f32.mrb[67].mxu0 }
 0x17e   : > { %v4911_v19 = vadd.f32 %v3650_v10, %v1899_v63  ;;  %v4914_v46 = vadd.f32 %v3714_v8, %v4815_v48  ;;  %v3653_v27 = vadd.f32 %v3652_v18, %v3651_v37  ;;  %v3717_v22 = vadd.f32 %v3716_v35, %v3715_v17 }
 0x17f   : > { %v1910_v48 = vadd.f32 %v4710_v20, %v4741_v54  ;;  %v1915_v20 = vadd.f32 %v4716_v28, %v4741_v54 }
 0x180   : > { %v4916_v29 = vadd.f32 %v3653_v27, %v1902_v24  ;;  %v4919_v60 = vadd.f32 %v3717_v22, %v4817_v55 }
 0x182   : > { %v3654_v42 = vpop.f32.mrb[68].mxu1  ;;  %v3718_v34 = vpop.f32.mrb[68].mxu0 }
 0x183   : > { %v3655_v40 = vpop.f32.mrb[69].mxu1  ;;  %v3719_v41 = vpop.f32.mrb[69].mxu0 }
 0x184   : > { %v3656_v38 = vadd.f32 %v3655_v40, %v3654_v42  ;;  %v3720_v51 = vadd.f32 %v3719_v41, %v3718_v34  ;;  %v3657_v50 = vpop.f32.mrb[70].mxu1  ;;  %v3721_v43 = vpop.f32.mrb[70].mxu0 }
 0x185   : > { %v3658_v45 = vpop.f32.mrb[71].mxu1  ;;  %v3722_v61 = vpop.f32.mrb[71].mxu0 }
 0x186   : > { %v4925_v47 = vadd.f32 %v3656_v38, %v1907_v4  ;;  %v4928_v55 = vadd.f32 %v3720_v51, %v4825_v9  ;;  %v3659_v11 = vadd.f32 %v3658_v45, %v3657_v50  ;;  %v3723_v56 = vadd.f32 %v3722_v61, %v3721_v43 }
 0x187   : > { %v1918_v9 = vadd.f32 %v4722_v36, %v4741_v54  ;;  %v1923_v36 = vadd.f32 %v4728_v44, %v4741_v54 }
 0x188   : > { %v4930_v2 = vadd.f32 %v3659_v11, %v1910_v48  ;;  %v4933_v12 = vadd.f32 %v3723_v56, %v4827_v13 }
 0x18a   : > { %v3660_v3 = vpop.f32.mrb[72].mxu1  ;;  %v3724_v6 = vpop.f32.mrb[72].mxu0 }
 0x18b   : > { %v3661_v16 = vpop.f32.mrb[73].mxu1  ;;  %v3725_v7 = vpop.f32.mrb[73].mxu0 }
 0x18c   : > { %v3662_v63 = vadd.f32 %v3661_v16, %v3660_v3  ;;  %v3726_v10 = vadd.f32 %v3725_v7, %v3724_v6  ;;  %v3663_v8 = vpop.f32.mrb[74].mxu1  ;;  %v3727_v37 = vpop.f32.mrb[74].mxu0 }
 0x18d   : > { %v3664_v17 = vpop.f32.mrb[75].mxu1  ;;  %v3728_v24 = vpop.f32.mrb[75].mxu0 }
 0x18e   : > { %v4939_v18 = vadd.f32 %v3662_v63, %v1915_v20  ;;  %v4942_v13 = vadd.f32 %v3726_v10, %v4835_v33  ;;  %v3665_v35 = vadd.f32 %v3664_v17, %v3663_v8  ;;  %v3729_v27 = vadd.f32 %v3728_v24, %v3727_v37 }
 0x18f   : > { %v1926_v33 = vadd.f32 %v4734_v52, %v4741_v54 }
 0x190   : > { %v4944_v22 = vadd.f32 %v3665_v35, %v1918_v9  ;;  %v4947_v28 = vadd.f32 %v3729_v27, %v4839_v53 }
 0x192   : > { %v3666_v42 = vpop.f32.mrb[76].mxu1  ;;  %v3730_v34 = vpop.f32.mrb[76].mxu0 }
 0x193   : > { %v3667_v40 = vpop.f32.mrb[77].mxu1  ;;  %v3731_v41 = vpop.f32.mrb[77].mxu0 }
 0x194   : > { %v3668_v4 = vadd.f32 %v3667_v40, %v3666_v42  ;;  %v3732_v38 = vadd.f32 %v3731_v41, %v3730_v34  ;;  %v3669_v51 = vpop.f32.mrb[78].mxu1  ;;  %v3733_v50 = vpop.f32.mrb[78].mxu0 }
 0x195   : > { %v3670_v43 = vpop.f32.mrb[79].mxu1  ;;  %v3734_v48 = vpop.f32.mrb[79].mxu0 }
 0x196   : > { %v4953_v45 = vadd.f32 %v3668_v4, %v1923_v36  ;;  %v4956_v53 = vadd.f32 %v3732_v38, %v4847_v58  ;;  %v3671_v61 = vadd.f32 %v3670_v43, %v3669_v51  ;;  %v3735_v11 = vadd.f32 %v3734_v48, %v3733_v50 }
 0x198   : > { %v4958_v56 = vadd.f32 %v3671_v61, %v1926_v33  ;;  %v4961_v44 = vadd.f32 %v3735_v11, %v4851_v1 }
 0x19a   : > { %v3736_v3 = vpop.f32.mrb[80].mxu0  ;;  %v3800_v6 = vpop.f32.mrb[80].mxu1 }
 0x19b   : > { %v3737_v16 = vpop.f32.mrb[81].mxu0  ;;  %v3801_v7 = vpop.f32.mrb[81].mxu1 }
 0x19c   : > { %v3738_v20 = vadd.f32 %v3737_v16, %v3736_v3  ;;  %v3802_v52 = vadd.f32 %v3801_v7, %v3800_v6  ;;  %v3739_v54 = vpop.f32.mrb[82].mxu0  ;;  %v3803_v63 = vpop.f32.mrb[82].mxu1 }
 0x19d   : > { %v3740_v10 = vpop.f32.mrb[83].mxu0  ;;  %v3804_v8 = vpop.f32.mrb[83].mxu1 }
 0x19e   : > { %v4964_v58 = vadd.f32 %v3738_v20, %v4856_v23  ;;  %v3741_v37 = vadd.f32 %v3740_v10, %v3739_v54  ;;  %v3805_v9 = vadd.f32 %v3804_v8, %v3803_v63  ;;  %v4967_v17 = vadd.f32 %v3802_v52, %v4859_v5 }
 0x1a0   : > { %v4970_v1 = vadd.f32 %v3741_v37, %v4861_v39  ;;  %v4973_v24 = vadd.f32 %v3805_v9, %v4864_v32 }
 0x1a2   : > { %v3742_v35 = vpop.f32.mrb[84].mxu0  ;;  %v3806_v27 = vpop.f32.mrb[84].mxu1 }
 0x1a3   : > { %v3743_v42 = vpop.f32.mrb[85].mxu0  ;;  %v3807_v34 = vpop.f32.mrb[85].mxu1 }
 0x1a4   : > { %v3744_v40 = vadd.f32 %v3743_v42, %v3742_v35  ;;  %v3808_v41 = vadd.f32 %v3807_v34, %v3806_v27  ;;  %v3745_v36 = vpop.f32.mrb[86].mxu0  ;;  %v3809_v23 = vpop.f32.mrb[86].mxu1 }
 0x1a5   : > { %v3746_v4 = vpop.f32.mrb[87].mxu0  ;;  %v3810_v38 = vpop.f32.mrb[87].mxu1 }
 0x1a6   : > { %v4976_v51 = vadd.f32 %v3744_v40, %v4869_v0  ;;  %v3747_v5 = vadd.f32 %v3746_v4, %v3745_v36  ;;  %v3811_v50 = vadd.f32 %v3810_v38, %v3809_v23  ;;  %v4979_v39 = vadd.f32 %v3808_v41, %v4872_v62 }
 0x1a8   : > { %v4982_v32 = vadd.f32 %v3747_v5, %v4874_v59  ;;  %v4985_v33 = vadd.f32 %v3811_v50, %v4877_v15 }
 0x1aa   : > { %v3748_v43 = vpop.f32.mrb[88].mxu0  ;;  %v3812_v48 = vpop.f32.mrb[88].mxu1 }
 0x1ab   : > { %v3749_v61 = vpop.f32.mrb[89].mxu0  ;;  %v3813_v11 = vpop.f32.mrb[89].mxu1 }
 0x1ac   : > { %v3750_v3 = vadd.f32 %v3749_v61, %v3748_v43  ;;  %v3814_v6 = vadd.f32 %v3813_v11, %v3812_v48  ;;  %v3751_v16 = vpop.f32.mrb[90].mxu0  ;;  %v3815_v0 = vpop.f32.mrb[90].mxu1 }
 0x1ad   : > { %v3752_v7 = vpop.f32.mrb[91].mxu0  ;;  %v3816_v20 = vpop.f32.mrb[91].mxu1 }
 0x1ae   : > { %v4988_v52 = vadd.f32 %v3750_v3, %v4883_v26  ;;  %v3753_v62 = vadd.f32 %v3752_v7, %v3751_v16  ;;  %v3817_v54 = vadd.f32 %v3816_v20, %v3815_v0  ;;  %v4991_v59 = vadd.f32 %v3814_v6, %v4886_v14 }
 0x1b0   : > { %v4994_v15 = vadd.f32 %v3753_v62, %v4888_v31  ;;  %v4997_v63 = vadd.f32 %v3817_v54, %v4891_v25 }
 0x1b2   : > { %v3754_v10 = vpop.f32.mrb[92].mxu0  ;;  %v3818_v8 = vpop.f32.mrb[92].mxu1 }
 0x1b3   : > { %v3755_v37 = vpop.f32.mrb[93].mxu0  ;;  %v3819_v9 = vpop.f32.mrb[93].mxu1 }
 0x1b4   : > { %v3756_v35 = vadd.f32 %v3755_v37, %v3754_v10  ;;  %v3820_v27 = vadd.f32 %v3819_v9, %v3818_v8  ;;  %v3757_v42 = vpop.f32.mrb[94].mxu0  ;;  %v3821_v26 = vpop.f32.mrb[94].mxu1 }
 0x1b5   : > { %v3758_v34 = vpop.f32.mrb[95].mxu0  ;;  %v3822_v40 = vpop.f32.mrb[95].mxu1 }
 0x1b6   : > { %v5000_v41 = vadd.f32 %v3756_v35, %v4897_v21  ;;  %v3759_v14 = vadd.f32 %v3758_v34, %v3757_v42  ;;  %v3823_v36 = vadd.f32 %v3822_v40, %v3821_v26  ;;  %v5003_v31 = vadd.f32 %v3820_v27, %v4900_v30 }
 0x1b8   : > { %v5006_v25 = vadd.f32 %v3759_v14, %v4902_v57  ;;  %v5009_v23 = vadd.f32 %v3823_v36, %v4905_v49 }
 0x1ba   : > { %v3760_v4 = vpop.f32.mrb[96].mxu0  ;;  %v3824_v38 = vpop.f32.mrb[96].mxu1 }
 0x1bb   : > { %v3761_v5 = vpop.f32.mrb[97].mxu0  ;;  %v3825_v50 = vpop.f32.mrb[97].mxu1 }
 0x1bc   : > { %v3762_v43 = vadd.f32 %v3761_v5, %v3760_v4  ;;  %v3826_v48 = vadd.f32 %v3825_v50, %v3824_v38  ;;  %v3763_v61 = vpop.f32.mrb[98].mxu0  ;;  %v3827_v21 = vpop.f32.mrb[98].mxu1 }
 0x1bd   : > { %v3764_v11 = vpop.f32.mrb[99].mxu0  ;;  %v3828_v3 = vpop.f32.mrb[99].mxu1 }
 0x1be   : > { %v5012_v6 = vadd.f32 %v3762_v43, %v4911_v19  ;;  %v3765_v30 = vadd.f32 %v3764_v11, %v3763_v61  ;;  %v3829_v16 = vadd.f32 %v3828_v3, %v3827_v21  ;;  %v5015_v57 = vadd.f32 %v3826_v48, %v4914_v46 }
 0x1c0   : > { %v5018_v49 = vadd.f32 %v3765_v30, %v4916_v29  ;;  %v5021_v0 = vadd.f32 %v3829_v16, %v4919_v60 }
 0x1c2   : > { %v3766_v7 = vpop.f32.mrb[100].mxu0  ;;  %v3830_v20 = vpop.f32.mrb[100].mxu1 }
 0x1c3   : > { %v3767_v62 = vpop.f32.mrb[101].mxu0  ;;  %v3831_v54 = vpop.f32.mrb[101].mxu1 }
 0x1c4   : > { %v3768_v10 = vadd.f32 %v3767_v62, %v3766_v7  ;;  %v3832_v8 = vadd.f32 %v3831_v54, %v3830_v20  ;;  %v3769_v37 = vpop.f32.mrb[102].mxu0  ;;  %v3833_v19 = vpop.f32.mrb[102].mxu1 }
 0x1c5   : > { %v3770_v9 = vpop.f32.mrb[103].mxu0  ;;  %v3834_v35 = vpop.f32.mrb[103].mxu1 }
 0x1c6   : > { %v5024_v27 = vadd.f32 %v3768_v10, %v4925_v47  ;;  %v3771_v46 = vadd.f32 %v3770_v9, %v3769_v37  ;;  %v3835_v42 = vadd.f32 %v3834_v35, %v3833_v19  ;;  %v5027_v29 = vadd.f32 %v3832_v8, %v4928_v55  ;;  %v3418_v8 = vld [vmem:[%s5053_s24 + $0x8] sm:$0xff]   ;;  %v3275_v19 = vld [vmem:[%s5053_s24] sm:$0xff]  }
 0x1c8   : > { %v5030_v60 = vadd.f32 %v3771_v46, %v4930_v2  ;;  %v5033_v26 = vadd.f32 %v3835_v42, %v4933_v12  ;;  %v3280_v46 = vunpack.c.l.bf16 %v3418_v8 }
 0x1ca   : > { %v3772_v34 = vpop.f32.mrb[104].mxu0  ;;  %v3836_v40 = vpop.f32.mrb[104].mxu1 }
 0x1cb   : > { %v3773_v14 = vpop.f32.mrb[105].mxu0  ;;  %v3837_v36 = vpop.f32.mrb[105].mxu1 }
 0x1cc   : > { %v3774_v4 = vadd.f32 %v3773_v14, %v3772_v34  ;;  %v3838_v38 = vadd.f32 %v3837_v36, %v3836_v40  ;;  %v3775_v47 = vpop.f32.mrb[106].mxu0  ;;  %v3839_v5 = vpop.f32.mrb[106].mxu1  ;;  %v3276_v40 = vunpack.c.l.bf16 %v3275_v19 }
 0x1cd   : > { %v3776_v50 = vpop.f32.mrb[107].mxu0  ;;  %v3840_v43 = vpop.f32.mrb[107].mxu1 }
 0x1ce   : > { %v5036_v55 = vadd.f32 %v3774_v4, %v4939_v18  ;;  %v3777_v2 = vadd.f32 %v3776_v50, %v3775_v47  ;;  %v3841_v48 = vadd.f32 %v3840_v43, %v3839_v5  ;;  %v5039_v12 = vadd.f32 %v3838_v38, %v4942_v13 }
 0x1cf   : > { %v3281_v4 = vunpack.c.h.bf16 %v3418_v8  ;;  %v3277_v5 = vunpack.c.h.bf16 %v3275_v19 }
 0x1d0   : > { %v5042_v61 = vadd.f32 %v3777_v2, %v4944_v22  ;;  %v5046_v21 = vadd.f32 %v3841_v48, %v4947_v28 }
 0x1d2   : > { %v3778_v11 = vpop.f32.mrb[108].mxu0  ;;  %v3842_v3 = vpop.f32.mrb[108].mxu1 }
 0x1d3   : > { %v3779_v30 = vpop.f32.mrb[109].mxu0  ;;  %v3843_v16 = vpop.f32.mrb[109].mxu1 }
 0x1d4   : > { %v3780_v18 = vadd.f32 %v3779_v30, %v3778_v11  ;;  %v3844_v13 = vadd.f32 %v3843_v16, %v3842_v3  ;;  %v3781_v22 = vpop.f32.mrb[110].mxu0  ;;  %v3845_v7 = vpop.f32.mrb[110].mxu1  ;;  %v3420_v3 = vld [vmem:[%s5053_s24 + $0x18] sm:$0xff]  }
 0x1d5   : > { %v3782_v20 = vpop.f32.mrb[111].mxu0  ;;  %v3846_v62 = vpop.f32.mrb[111].mxu1 }
 0x1d6   : > { %v5056_v28 = vadd.f32 %v3780_v18, %v4953_v45  ;;  %v3783_v54 = vadd.f32 %v3782_v20, %v3781_v22  ;;  %v3847_v10 = vadd.f32 %v3846_v62, %v3845_v7  ;;  %v5060_v37 = vadd.f32 %v3844_v13, %v4956_v53  ;;  %v3419_v18 = vld [vmem:[%s5053_s24 + $0x10] sm:$0xff]  }
 0x1d8   : > { %v5064_v9 = vadd.f32 %v3783_v54, %v4958_v56  ;;  %v5067_v35 = vadd.f32 %v3847_v10, %v4961_v44  ;;  %v3284_v54 = vunpack.c.l.bf16 %v3419_v18 }
 0x1da   : > { %v3848_v42 = vpop.f32.mrb[112].mxu1  ;;  %v3938_v34 = vpop.f32.mrb[112].mxu0 }
 0x1db   : > { %v2455_v45 = vadd.f32 %v3938_v34, %v4979_v39  ;;  %v3849_v14 = vpop.f32.mrb[113].mxu1  ;;  %v2446_v36 = vpop.f32.mrb[113].mxu0 }
 0x1dc   : > { %v3850_v53 = vadd.f32 %v3849_v14, %v3848_v42  ;;  %v2447_v38 = vadd.f32 %v2446_v36, %v4967_v17  ;;  %v3851_v47 = vpop.f32.mrb[114].mxu1  ;;  %v3939_v56 = vpop.f32.mrb[114].mxu0  ;;  %v3285_v36 = vunpack.c.h.bf16 %v3419_v18 }
 0x1dd   : > { %v2639_v50 = vadd.f32 %v3280_v46, %v2455_v45  ;;  %v2458_v44 = vadd.f32 %v3939_v56, %v4985_v33  ;;  %v3852_v43 = vpop.f32.mrb[115].mxu1  ;;  %v2449_v2 = vpop.f32.mrb[115].mxu0  ;;  %v3288_v33 = vunpack.c.l.bf16 %v3420_v3  ;;  %v3289_v46 = vunpack.c.h.bf16 %v3420_v3 }
 0x1de   : > { %v2637_v48 = vadd.f32 %v3276_v40, %v2447_v38  ;;  %v3853_v11 = vadd.f32 %v3852_v43, %v3851_v47  ;;  %v2450_v39 = vadd.f32 %v2449_v2, %v4973_v24  ;;  %v5075_v30 = vadd.f32 %v3850_v53, %v4964_v58  ;;  %v3421_v43 = vld [vmem:[%s5053_s24 + $0x20] sm:$0xff]  }
 0x1df   : > { %v2640_v16 = vadd.f32 %v3281_v4, %v2458_v44  ;;  %v2671_v22 = vmax.f32 %v2639_v50, 0.0  ;;  %v3422_v50 = vld [vmem:[%s5053_s24 + $0x28] sm:$0xff]  }
 0x1e0   : > { %v2638_v17 = vadd.f32 %v3277_v5, %v2450_v39  ;;  %v5079_v13 = vadd.f32 %v3853_v11, %v4970_v1  ;;  %v2669_v20 = vmax.f32 %v2637_v48, 0.0 }
 0x1e1   : > { %v2672_v7 = vmax.f32 %v2640_v16, 0.0 }
 0x1e2   : > { %v2670_v24 = vmax.f32 %v2638_v17, 0.0  ;;  %v3854_v58 = vpop.f32.mrb[116].mxu1  ;;  %v3942_v62 = vpop.f32.mrb[116].mxu0 }
 0x1e3   : > { %v3346_v10 = vpack.c.bf16 %v2672_v7, %v2671_v22  ;;  %v2471_v1 = vadd.f32 %v3942_v62, %v5003_v31  ;;  %v3855_v8 = vpop.f32.mrb[117].mxu1  ;;  %v2462_v19 = vpop.f32.mrb[117].mxu0  ;;  %v3292_v22 = vunpack.c.l.bf16 %v3421_v43 }
 0x1e4   : > { %v3341_v42 = vpack.c.bf16 %v2670_v24, %v2669_v20  ;;  %v3856_v34 = vadd.f32 %v3855_v8, %v3854_v58  ;;  %v2463_v40 = vadd.f32 %v2462_v19, %v4991_v59  ;;  %v3857_v45 = vpop.f32.mrb[118].mxu1  ;;  %v3943_v14 = vpop.f32.mrb[118].mxu0  ;;  %v3297_v20 = vunpack.c.h.bf16 %v3422_v50 }
 0x1e5   : > { %3433 = vst [vmem:[%s5086_s27 + $0x8] sm:$0xff] %v3346_v10   ;;  %v2643_v4 = vadd.f32 %v3288_v33, %v2471_v1  ;;  %v2474_v53 = vadd.f32 %v3943_v14, %v5009_v23  ;;  %v3858_v38 = vpop.f32.mrb[119].mxu1  ;;  %v2465_v47 = vpop.f32.mrb[119].mxu0  ;;  %v3296_v23 = vunpack.c.l.bf16 %v3422_v50  ;;  %v3293_v10 = vunpack.c.h.bf16 %v3421_v43  ;;  %v3423_v14 = vld [vmem:[%s5053_s24 + $0x30] sm:$0xff]  }
 0x1e6   : > { %3342 = vst [vmem:[%s5086_s27] sm:$0xff] %v3341_v42   ;;  %v2641_v31 = vadd.f32 %v3284_v54, %v2463_v40  ;;  %v3859_v56 = vadd.f32 %v3858_v38, %v3857_v45  ;;  %v2466_v5 = vadd.f32 %v2465_v47, %v4997_v63  ;;  %v5096_v44 = vadd.f32 %v3856_v34, %v4976_v51  ;;  %v3424_v40 = vld [vmem:[%s5053_s24 + $0x38] sm:$0xff]  }
 0x1e7   : > { %v2644_v59 = vadd.f32 %v3289_v46, %v2474_v53  ;;  %v2675_v11 = vmax.f32 %v2643_v4, 0.0  ;;  %v3300_v50 = vunpack.c.l.bf16 %v3423_v14 }
 0x1e8   : > { %v2642_v2 = vadd.f32 %v3285_v36, %v2466_v5  ;;  %v5100_v48 = vadd.f32 %v3859_v56, %v4982_v32  ;;  %v2673_v3 = vmax.f32 %v2641_v31, 0.0 }
 0x1e9   : > { %v2676_v39 = vmax.f32 %v2644_v59, 0.0 }
 0x1ea   : > { %v2674_v16 = vmax.f32 %v2642_v2, 0.0  ;;  %v3860_v18 = vpop.f32.mrb[120].mxu1  ;;  %v3946_v17 = vpop.f32.mrb[120].mxu0  ;;  %v3305_v2 = vunpack.c.h.bf16 %v3424_v40 }
 0x1eb   : > { %v3356_v63 = vpack.c.bf16 %v2676_v39, %v2675_v11  ;;  %v2487_v51 = vadd.f32 %v3946_v17, %v5027_v29  ;;  %v3861_v7 = vpop.f32.mrb[121].mxu1  ;;  %v2478_v33 = vpop.f32.mrb[121].mxu0 }
 0x1ec   : > { %v3351_v24 = vpack.c.bf16 %v2674_v16, %v2673_v3  ;;  %v3862_v32 = vadd.f32 %v3861_v7, %v3860_v18  ;;  %v2479_v58 = vadd.f32 %v2478_v33, %v5015_v57  ;;  %v3863_v62 = vpop.f32.mrb[122].mxu1  ;;  %v3947_v54 = vpop.f32.mrb[122].mxu0  ;;  %v3301_v16 = vunpack.c.h.bf16 %v3423_v14  ;;  %v3426_v33 = vld [vmem:[%s5053_s24 + $0x48] sm:$0xff]  }
 0x1ed   : > { %3435 = vst [vmem:[%s5086_s27 + $0x18] sm:$0xff] %v3356_v63   ;;  %v2647_v1 = vadd.f32 %v3296_v23, %v2487_v51  ;;  %v2490_v8 = vadd.f32 %v3947_v54, %v5033_v26  ;;  %v3864_v19 = vpop.f32.mrb[123].mxu1  ;;  %v2481_v46 = vpop.f32.mrb[123].mxu0  ;;  %v3304_v26 = vunpack.c.l.bf16 %v3424_v40 }
 0x1ee   : > { %3434 = vst [vmem:[%s5086_s27 + $0x10] sm:$0xff] %v3351_v24   ;;  %v2645_v29 = vadd.f32 %v3292_v22, %v2479_v58  ;;  %v3865_v42 = vadd.f32 %v3864_v19, %v3863_v62  ;;  %v2482_v34 = vadd.f32 %v2481_v46, %v5021_v0  ;;  %v5110_v45 = vadd.f32 %v3862_v32, %v4988_v52 }
 0x1ef   : > { %v2648_v57 = vadd.f32 %v3297_v20, %v2490_v8  ;;  %v2679_v53 = vmax.f32 %v2647_v1, 0.0 }
 0x1f0   : > { %v2646_v36 = vadd.f32 %v3293_v10, %v2482_v34  ;;  %v5114_v4 = vadd.f32 %v3865_v42, %v4994_v15  ;;  %v2677_v47 = vmax.f32 %v2645_v29, 0.0  ;;  %v3312_v10 = vunpack.c.l.bf16 %v3426_v33 }
 0x1f1   : > { %v2680_v38 = vmax.f32 %v2648_v57, 0.0  ;;  %v3313_v34 = vunpack.c.h.bf16 %v3426_v33 }
 0x1f2   : > { %v2678_v31 = vmax.f32 %v2646_v36, 0.0  ;;  %v3866_v56 = vpop.f32.mrb[124].mxu1  ;;  %v3950_v5 = vpop.f32.mrb[124].mxu0 }
 0x1f3   : > { %v3366_v0 = vpack.c.bf16 %v2680_v38, %v2679_v53  ;;  %v2503_v52 = vadd.f32 %v3950_v5, %v5060_v37  ;;  %v3867_v59 = vpop.f32.mrb[125].mxu1  ;;  %v2494_v43 = vpop.f32.mrb[125].mxu0 }
 0x1f4   : > { %v3361_v11 = vpack.c.bf16 %v2678_v31, %v2677_v47  ;;  %v3868_v15 = vadd.f32 %v3867_v59, %v3866_v56  ;;  %v2495_v39 = vadd.f32 %v2494_v43, %v5039_v12  ;;  %v3869_v23 = vpop.f32.mrb[126].mxu1  ;;  %v3951_v3 = vpop.f32.mrb[126].mxu0  ;;  %v3425_v12 = vld [vmem:[%s5053_s24 + $0x40] sm:$0xff]  }
 0x1f5   : > { %3437 = vst [vmem:[%s5086_s27 + $0x28] sm:$0xff] %v3366_v0   ;;  %v2651_v18 = vadd.f32 %v3304_v26, %v2503_v52  ;;  %v2506_v17 = vadd.f32 %v3951_v3, %v5067_v35  ;;  %v3870_v22 = vpop.f32.mrb[127].mxu1  ;;  %v2497_v63 = vpop.f32.mrb[127].mxu0  ;;  %v3308_v46 = vunpack.c.l.bf16 %v3425_v12  ;;  %v3309_v53 = vunpack.c.h.bf16 %v3425_v12 }
 0x1f6   : > { %3436 = vst [vmem:[%s5086_s27 + $0x20] sm:$0xff] %v3361_v11   ;;  %v2649_v37 = vadd.f32 %v3300_v50, %v2495_v39  ;;  %v3871_v51 = vadd.f32 %v3870_v22, %v3869_v23  ;;  %v2498_v7 = vadd.f32 %v2497_v63, %v5046_v21  ;;  %v2374_v20 = vadd.f32 %v3868_v15, %v5000_v41  ;;  %v3428_v50 = vld [vmem:[%s5053_s24 + $0x58] sm:$0xff]  }
 0x1f7   : > { %v2652_v24 = vadd.f32 %v3305_v2, %v2506_v17  ;;  %v2683_v62 = vmax.f32 %v2651_v18, 0.0  ;;  %v3320_v15 = vunpack.c.l.bf16 %v3428_v50 }
 0x1f8   : > { %v2650_v32 = vadd.f32 %v3301_v16, %v2498_v7  ;;  %v2377_v58 = vadd.f32 %v3871_v51, %v5006_v25  ;;  %v2681_v1 = vmax.f32 %v2649_v37, 0.0 }
 0x1f9   : > { %v2684_v54 = vmax.f32 %v2652_v24, 0.0 }
 0x1fa   : > { %v2682_v35 = vmax.f32 %v2650_v32, 0.0  ;;  %v3872_v8 = vpop.f32.mrb[128].mxu1  ;;  %v3954_v19 = vpop.f32.mrb[128].mxu0 }
 0x1fb   : > { %v3376_v29 = vpack.c.bf16 %v2684_v54, %v2683_v62  ;;  %v2519_v21 = vadd.f32 %v3954_v19, %v5096_v44  ;;  %v3873_v42 = vpop.f32.mrb[129].mxu1  ;;  %v2510_v41 = vpop.f32.mrb[129].mxu0  ;;  %v3429_v19 = vld [vmem:[%s5053_s24 + $0x60] sm:$0xff]  }
 0x1fc   : > { %v3371_v40 = vpack.c.bf16 %v2682_v35, %v2681_v1  ;;  %v3874_v57 = vadd.f32 %v3873_v42, %v3872_v8  ;;  %v2511_v25 = vadd.f32 %v2510_v41, %v5075_v30  ;;  %v3875_v14 = vpop.f32.mrb[130].mxu1  ;;  %v3955_v36 = vpop.f32.mrb[130].mxu0  ;;  %v3427_v30 = vld [vmem:[%s5053_s24 + $0x50] sm:$0xff]   ;;  %v3430_v35 = vld [vmem:[%s5053_s24 + $0x68] sm:$0xff]  }
 0x1fd   : > { %3439 = vst [vmem:[%s5086_s27 + $0x38] sm:$0xff] %v3376_v29   ;;  %v2655_v38 = vadd.f32 %v3312_v10, %v2519_v21  ;;  %v2522_v26 = vadd.f32 %v3955_v36, %v5100_v48  ;;  %v3876_v47 = vpop.f32.mrb[131].mxu1  ;;  %v2513_v31 = vpop.f32.mrb[131].mxu0  ;;  %v3316_v16 = vunpack.c.l.bf16 %v3427_v30  ;;  %v3317_v33 = vunpack.c.h.bf16 %v3427_v30 }
 0x1fe   : > { %3438 = vst [vmem:[%s5086_s27 + $0x30] sm:$0xff] %v3371_v40   ;;  %v2653_v44 = vadd.f32 %v3308_v46, %v2511_v25  ;;  %v3877_v56 = vadd.f32 %v3876_v47, %v3875_v14  ;;  %v2514_v5 = vadd.f32 %v2513_v31, %v5079_v13  ;;  %v2382_v0 = vadd.f32 %v3874_v57, %v5012_v6 }
 0x1ff   : > { %v2656_v52 = vadd.f32 %v3313_v34, %v2522_v26  ;;  %v2687_v2 = vmax.f32 %v2655_v38, 0.0  ;;  %v3321_v6 = vunpack.c.h.bf16 %v3428_v50  ;;  %v3328_v42 = vunpack.c.l.bf16 %v3430_v35 }
 0x200   : > { %v2654_v59 = vadd.f32 %v3309_v53, %v2514_v5  ;;  %v2385_v43 = vadd.f32 %v3877_v56, %v5018_v49  ;;  %v2685_v39 = vmax.f32 %v2653_v44, 0.0  ;;  %v3324_v57 = vunpack.c.l.bf16 %v3429_v19 }
 0x201   : > { %v2688_v11 = vmax.f32 %v2656_v52, 0.0  ;;  %v3329_v36 = vunpack.c.h.bf16 %v3430_v35  ;;  %v3325_v31 = vunpack.c.h.bf16 %v3429_v19 }
 0x202   : > { %v2686_v48 = vmax.f32 %v2654_v59, 0.0  ;;  %v3878_v23 = vpop.f32.mrb[132].mxu1  ;;  %v3958_v3 = vpop.f32.mrb[132].mxu0 }
 0x203   : > { %v3386_v18 = vpack.c.bf16 %v2688_v11, %v2687_v2  ;;  %v2535_v13 = vadd.f32 %v3958_v3, %v2374_v20  ;;  %v3879_v17 = vpop.f32.mrb[133].mxu1  ;;  %v2526_v22 = vpop.f32.mrb[133].mxu0 }
 0x204   : > { %v3381_v63 = vpack.c.bf16 %v2686_v48, %v2685_v39  ;;  %v3880_v37 = vadd.f32 %v3879_v17, %v3878_v23  ;;  %v2527_v49 = vadd.f32 %v2526_v22, %v5110_v45  ;;  %v3881_v51 = vpop.f32.mrb[134].mxu1  ;;  %v3959_v7 = vpop.f32.mrb[134].mxu0  ;;  %v3432_v17 = vld [vmem:[%s5053_s24 + $0x78] sm:$0xff]  }
 0x205   : > { %3441 = vst [vmem:[%s5086_s27 + $0x48] sm:$0xff] %v3386_v18   ;;  %v2659_v24 = vadd.f32 %v3320_v15, %v2535_v13  ;;  %v2538_v12 = vadd.f32 %v3959_v7, %v2377_v58  ;;  %v3882_v32 = vpop.f32.mrb[135].mxu1  ;;  %v2529_v62 = vpop.f32.mrb[135].mxu0  ;;  %v3431_v15 = vld [vmem:[%s5053_s24 + $0x70] sm:$0xff]   ;;  %v3337_v35 = vunpack.c.h.bf16 %v3432_v17 }
 0x206   : > { %3440 = vst [vmem:[%s5086_s27 + $0x40] sm:$0xff] %v3381_v63   ;;  %v2657_v54 = vadd.f32 %v3316_v16, %v2527_v49  ;;  %v3883_v20 = vadd.f32 %v3882_v32, %v3881_v51  ;;  %v2530_v10 = vadd.f32 %v2529_v62, %v5114_v4  ;;  %v2390_v1 = vadd.f32 %v3880_v37, %v5024_v27 }
 0x207   : > { %v2660_v8 = vadd.f32 %v3321_v6, %v2538_v12  ;;  %v2691_v29 = vmax.f32 %v2659_v24, 0.0  ;;  %v3332_v22 = vunpack.c.l.bf16 %v3431_v15 }
 0x208   : > { %v2658_v45 = vadd.f32 %v3317_v33, %v2530_v10  ;;  %v2393_v46 = vadd.f32 %v3883_v20, %v5030_v60  ;;  %v2689_v41 = vmax.f32 %v2657_v54, 0.0  ;;  %v3333_v33 = vunpack.c.h.bf16 %v3431_v15 }
 0x209   : > { %v2692_v21 = vmax.f32 %v2660_v8, 0.0 }
 0x20a   : > { %v2690_v58 = vmax.f32 %v2658_v45, 0.0  ;;  %v3884_v34 = vpop.f32.mrb[136].mxu1  ;;  %v3962_v40 = vpop.f32.mrb[136].mxu0 }
 0x20b   : > { %v3396_v25 = vpack.c.bf16 %v2692_v21, %v2691_v29  ;;  %v2551_v4 = vadd.f32 %v3962_v40, %v2390_v1  ;;  %v3885_v14 = vpop.f32.mrb[137].mxu1  ;;  %v2542_v27 = vpop.f32.mrb[137].mxu0 }
 0x20c   : > { %v3391_v53 = vpack.c.bf16 %v2690_v58, %v2689_v41  ;;  %v3886_v38 = vadd.f32 %v3885_v14, %v3884_v34  ;;  %v2543_v26 = vadd.f32 %v2542_v27, %v2382_v0  ;;  %v3887_v60 = vpop.f32.mrb[138].mxu1  ;;  %v3963_v47 = vpop.f32.mrb[138].mxu0 }
 0x20d   : > { %3443 = vst [vmem:[%s5086_s27 + $0x58] sm:$0xff] %v3396_v25   ;;  %v2663_v44 = vadd.f32 %v3328_v42, %v2551_v4  ;;  %v2554_v56 = vadd.f32 %v3963_v47, %v2393_v46  ;;  %v3888_v5 = vpop.f32.mrb[139].mxu1  ;;  %v2545_v50 = vpop.f32.mrb[139].mxu0 }
 0x20e   : > { %3442 = vst [vmem:[%s5086_s27 + $0x50] sm:$0xff] %v3391_v53   ;;  %v2661_v52 = vadd.f32 %v3324_v57, %v2543_v26  ;;  %v3889_v30 = vadd.f32 %v3888_v5, %v3887_v60  ;;  %v2546_v59 = vadd.f32 %v2545_v50, %v2385_v43  ;;  %v2398_v2 = vadd.f32 %v3886_v38, %v5036_v55 }
 0x20f   : > { %v2664_v11 = vadd.f32 %v3329_v36, %v2554_v56  ;;  %v2695_v48 = vmax.f32 %v2663_v44, 0.0 }
 0x210   : > { %v2662_v39 = vadd.f32 %v3325_v31, %v2546_v59  ;;  %v2401_v0 = vadd.f32 %v3889_v30, %v5042_v61  ;;  %v2693_v3 = vmax.f32 %v2661_v52, 0.0  ;;  %v3336_v61 = vunpack.c.l.bf16 %v3432_v17 }
 0x211   : > { %v2696_v23 = vmax.f32 %v2664_v11, 0.0 }
 0x212   : > { %v2694_v16 = vmax.f32 %v2662_v39, 0.0  ;;  %v3890_v18 = vpop.f32.mrb[140].mxu1  ;;  %v3966_v13 = vpop.f32.mrb[140].mxu0 }
 0x213   : > { %v3406_v6 = vpack.c.bf16 %v2696_v23, %v2695_v48  ;;  %v3891_v63 = vpop.f32.mrb[141].mxu1  ;;  %v2558_v43 = vpop.f32.mrb[141].mxu0 }
 0x214   : > { %v3401_v37 = vpack.c.bf16 %v2694_v16, %v2693_v3  ;;  %v3892_v55 = vadd.f32 %v3891_v63, %v3890_v18  ;;  %v2559_v49 = vadd.f32 %v2558_v43, %v2398_v2  ;;  %v3893_v51 = vpop.f32.mrb[142].mxu1  ;;  %v3967_v7 = vpop.f32.mrb[142].mxu0 }
 0x215   : > { %3445 = vst [vmem:[%s5086_s27 + $0x68] sm:$0xff] %v3406_v6   ;;  %v3894_v24 = vpop.f32.mrb[143].mxu1  ;;  %v2561_v12 = vpop.f32.mrb[143].mxu0 }
 0x216   : > { %3444 = vst [vmem:[%s5086_s27 + $0x60] sm:$0xff] %v3401_v37   ;;  %v2406_v32 = vadd.f32 %v3892_v55, %v5056_v28  ;;  %v2665_v62 = vadd.f32 %v3332_v22, %v2559_v49  ;;  %v3895_v54 = vadd.f32 %v3894_v24, %v3893_v51  ;;  %v2562_v20 = vadd.f32 %v2561_v12, %v2401_v0 }
 0x218   : > { %v2567_v10 = vadd.f32 %v3966_v13, %v2406_v32  ;;  %v2409_v1 = vadd.f32 %v3895_v54, %v5064_v9  ;;  %v2666_v8 = vadd.f32 %v3333_v33, %v2562_v20  ;;  %v2697_v45 = vmax.f32 %v2665_v62, 0.0 }
 0x21a   : > { %v2667_v19 = vadd.f32 %v3336_v61, %v2567_v10  ;;  %v2570_v46 = vadd.f32 %v3967_v7, %v2409_v1  ;;  %v2698_v29 = vmax.f32 %v2666_v8, 0.0 }
 0x21c   : > { %v2668_v21 = vadd.f32 %v3337_v35, %v2570_v46  ;;  %v3411_v42 = vpack.c.bf16 %v2698_v29, %v2697_v45  ;;  %v2699_v41 = vmax.f32 %v2667_v19, 0.0 }
 0x21e   : > { %v2700_v58 = vmax.f32 %v2668_v21, 0.0  ;;  %3446 = vst [vmem:[%s5086_s27 + $0x70] sm:$0xff] %v3411_v42  }
 0x220   : > { %v3416_v28 = vpack.c.bf16 %v2700_v58, %v2699_v41 }
 0x222   : > { %3447 = vst [vmem:[%s5086_s27 + $0x78] sm:$0xff] %v3416_v28  }
 0x223 PF: > { %s14_s17 = sadd.s32 1, %s4311_s17   ;;  %s5170_s15 = smov %s4307_s16 }
 0x224   : > { %p11_p5 = scmp.ge.s32.totalorder %s14_s17, 4   ;;  %s5171_s16 = smov %s5173_s18 }
 0x226   :  { %13 = sbr.rel (!%p11_p5) target bundleno = 2 (0x2), region = 75 }

// kernel: _resnet_forward.9
= control target key start
LH: loop header
LB: loop body
LE: loop exit
PB: predicated region body
PF: predicated region fallthrough
CT: control target
= control target key end

     0   :  { %s4051_s15 = smov 0   ;;  %s4053_s16 = smov 0   ;;  %s4861_s0 = inlined_call_operand.vmem [shape: bf16[512,1152], index: 0, kind: input, shape index: {}]   ;;  %s4862_s1 = inlined_call_operand.vmem [shape: bf16[1152,128], index: 1, kind: input, shape index: {}]   ;;  %s4863_s2 = inlined_call_operand.vmem [shape: f32[1,128], index: 2, kind: input, shape index: {}]   ;;  %s4864_s3 = inlined_call_operand.vmem [shape: bf16[512,128], index: 3, kind: input, shape index: {}]   ;;  %s4865_s4 = inlined_call_operand.vmem [shape: f32[2,8,128], index: 4, kind: output, shape index: {}]  }
   0x1   :  { %s4055_s17 = smov 0  }
   0x2 LB: > { %s26_s18 = sadd.s32 1, %s4020_s16  ;;  %p2857_p0 = scmp.ge.s32.totalorder %s4024_s17, 1  ;;  %s4024_s17 = sphi %s4055_s17, %s14_s17   ;;  %s4020_s16 = sphi %s4053_s16, %s4867_s16   ;;  %s4016_s15 = sphi %s4051_s15, %s4866_s15  }
   0x3   : > { %p28_p1 = scmp.ge.s32.totalorder %s26_s18, 2  ;;  %p211_p2 = scmp.lt.s32.totalorder %s4024_s17, 3 }
   0x5   : > { %s4869_s18 = smov (%p28_p1, %s26_s18), 0  ;;  %p212_p3 = pnand %p2857_p0, %p211_p2 }
   0x6   : > { %v3722_v0 = vld [vmem:[%s4862_s1 + $0x40] sm:$0xff] (!%p212_p3)   ;;  %s2858_s21 = sshll.u32 (!%p212_p3), %s4016_s15, 5  ;;  %v3724_v2 = vld [vmem:[%s4862_s1 + $0x48] sm:$0xff] (!%p212_p3)   ;;  %v3726_v4 = vld [vmem:[%s4862_s1 + $0x50] sm:$0xff] (!%p212_p3)   ;;  %p278_p5 = scmp.lt.s32.totalorder (!%p212_p3), %s4016_s15, 1 }
   0x7   : > { %215 = sbr.rel (%p212_p3) target bundleno = 562 (0x232), region = 36  ;;  %v3723_v1 = vld [vmem:[%s4862_s1] sm:$0xff] (!%p212_p3)   ;;  %3161 = vmatprep.subr.bf16.mxu0 (!%p212_p3), %v3722_v0  ;;  %3681 = vmatprep.subr.bf16.mxu1 (!%p212_p3), %v3722_v0  ;;  %p256_p4 = scmp.lt.s32.totalorder (!%p212_p3), %s2858_s21, 63  ;;  %v3725_v3 = vld [vmem:[%s4862_s1 + $0x8] sm:$0xff] (!%p212_p3)   ;;  %v3727_v5 = vld [vmem:[%s4862_s1 + $0x10] sm:$0xff] (!%p212_p3)  }
   0x8   : > { %3162 = vmatpush3.bf16.msra.mxu0 (!%p212_p3), %v3723_v1  ;;  %3689 = vmatpush3.bf16.msra.mxu1 (!%p212_p3), %v3723_v1  ;;  %v3728_v6 = vld [vmem:[%s4862_s1 + $0x58] sm:$0xff] (!%p212_p3)   ;;  %v3730_v8 = vld [vmem:[%s4862_s1 + $0x60] sm:$0xff] (!%p212_p3)   ;;  %v3732_v10 = vld [vmem:[%s4862_s1 + $0x68] sm:$0xff] (!%p212_p3)  }
   0x9   : > { %3163 = vmatprep.subr.bf16.mxu0 (!%p212_p3), %v3724_v2  ;;  %3682 = vmatprep.subr.bf16.mxu1 (!%p212_p3), %v3724_v2  ;;  %v3729_v7 = vld [vmem:[%s4862_s1 + $0x18] sm:$0xff] (!%p212_p3)   ;;  %v3731_v9 = vld [vmem:[%s4862_s1 + $0x20] sm:$0xff] (!%p212_p3)   ;;  %v3733_v13 = vld [vmem:[%s4862_s1 + $0x28] sm:$0xff] (!%p212_p3)  }
   0xa   : > { %v3734_v14 = vld [vmem:[%s4862_s1 + $0x70] sm:$0xff] (!%p212_p3)   ;;  %v3736_v16 = vld [vmem:[%s4862_s1 + $0x78] sm:$0xff] (!%p212_p3)   ;;  %v3744_v18 = vld [vmem:[%s4862_s1 + $0xc0] sm:$0xff] (!%p212_p3)  }
   0xb   : > { %v3735_v15 = vld [vmem:[%s4862_s1 + $0x30] sm:$0xff] (!%p212_p3)   ;;  %v3737_v17 = vld [vmem:[%s4862_s1 + $0x38] sm:$0xff] (!%p212_p3)   ;;  %v3745_v21 = vld [vmem:[%s4862_s1 + $0x140] sm:$0xff] (!%p212_p3)  }
   0xc   : > { %3164 = vmatpush3.bf16.msra.mxu0 (!%p212_p3), %v3725_v3  ;;  %3690 = vmatpush3.bf16.msra.mxu1 (!%p212_p3), %v3725_v3  ;;  %v3746_v22 = vld [vmem:[%s4862_s1 + $0x80] sm:$0xff] (!%p212_p3)   ;;  %v3748_v24 = vld [vmem:[%s4862_s1 + $0xc8] sm:$0xff] (!%p212_p3)   ;;  %v3756_v32 = vld [vmem:[%s4862_s1 + $0xd0] sm:$0xff] (!%p212_p3)  }
   0xd   : > { %3165 = vmatprep.subr.bf16.mxu0 (!%p212_p3), %v3726_v4  ;;  %3683 = vmatprep.subr.bf16.mxu1 (!%p212_p3), %v3726_v4  ;;  %v3747_v23 = vld [vmem:[%s4862_s1 + $0x100] sm:$0xff] (!%p212_p3)   ;;  %v3759_v27 = vld [vmem:[%s4862_s1 + $0x148] sm:$0xff] (!%p212_p3)   ;;  %v3757_v33 = vld [vmem:[%s4862_s1 + $0x90] sm:$0xff] (!%p212_p3)  }
   0xe   : > { %s4871_s21 = smov (!%p256_p4, %s2858_s21), 63  ;;  %v3749_v28 = vld [vmem:[%s4862_s1 + $0x88] sm:$0xff]   ;;  %v3758_v34 = vld [vmem:[%s4862_s1 + $0xd8] sm:$0xff]   ;;  %v3768_v38 = vld [vmem:[%s4862_s1 + $0xe0] sm:$0xff]   ;;  %s4873_s15 = smov (!%p278_p5, %s4016_s15), 1 }
   0xf   : > { %s3697_s8 = smul.u32 36, %s4871_s21  ;;  %v3761_v29 = vld [vmem:[%s4862_s1 + $0x108] sm:$0xff]   ;;  %v3760_v37 = vld [vmem:[%s4862_s1 + $0x98] sm:$0xff]   ;;  %v3779_v41 = vld [vmem:[%s4862_s1 + $0x150] sm:$0xff]  }
  0x10   : > { %3166 = vmatpush3.bf16.msra.mxu0 %v3727_v5  ;;  %3691 = vmatpush3.bf16.msra.mxu1 %v3727_v5  ;;  %v3769_v42 = vld [vmem:[%s4862_s1 + $0xa0] sm:$0xff]   ;;  %v3770_v43 = vld [vmem:[%s4862_s1 + $0xe8] sm:$0xff]   ;;  %v3781_v44 = vld [vmem:[%s4862_s1 + $0x110] sm:$0xff]  }
  0x11   : > { %3167 = vmatprep.subr.bf16.mxu0 %v3728_v6  ;;  %3684 = vmatprep.subr.bf16.mxu1 %v3728_v6  ;;  %s4105_s19 = scalar_lea.vmem %s4861_s0, %s3697_s8  ;;  %v3771_v47 = vld [vmem:[%s4862_s1 + $0xa8] sm:$0xff]   ;;  %v3778_v50 = vld [vmem:[%s4862_s1 + $0xf0] sm:$0xff]   ;;  %v3782_v53 = vld [vmem:[%s4862_s1 + $0xf8] sm:$0xff]  }
  0x12   : > { %v3740_v11 = vld [vmem:[%s4105_s19 + $0x4] ss:$36 sps:$4 sm:$0xff]   ;;  %v3750_v25 = vld [vmem:[%s4105_s19 + $0x4c] ss:$36 sps:$4 sm:$0xff]   ;;  %v3762_v35 = vld [vmem:[%s4105_s19 + $0x94] ss:$36 sps:$4 sm:$0xff]  }
  0x13   : > { %v3743_v12 = vld [vmem:[%s4105_s19 + $0x364] ss:$36 sps:$4 sm:$0xff]   ;;  %1797 = vmatprep.mubr.bf16.mxu0 %v3740_v11  ;;  %v3752_v26 = vld [vmem:[%s4105_s19 + $0x3ac] ss:$36 sps:$4 sm:$0xff]   ;;  %v3764_v36 = vld [vmem:[%s4105_s19 + $0x3f4] ss:$36 sps:$4 sm:$0xff]  }
  0x14   : > { %3168 = vmatpush3.bf16.msra.mxu0 %v3729_v7  ;;  %3692 = vmatpush3.bf16.msra.mxu1 %v3729_v7  ;;  %v3738_v19 = vld [vmem:[%s4105_s19] ss:$36 sps:$4 sm:$0xff]   ;;  %v3754_v30 = vld [vmem:[%s4105_s19 + $0x48] ss:$36 sps:$4 sm:$0xff]   ;;  %v3766_v39 = vld [vmem:[%s4105_s19 + $0x90] ss:$36 sps:$4 sm:$0xff]  }
  0x15   : > { %3169 = vmatprep.subr.bf16.mxu0 %v3730_v8  ;;  %3685 = vmatprep.subr.bf16.mxu1 %v3730_v8  ;;  %v3741_v20 = vld [vmem:[%s4105_s19 + $0x360] ss:$36 sps:$4 sm:$0xff]   ;;  %v3755_v31 = vld [vmem:[%s4105_s19 + $0x3a8] ss:$36 sps:$4 sm:$0xff]   ;;  %v3767_v40 = vld [vmem:[%s4105_s19 + $0x3f0] ss:$36 sps:$4 sm:$0xff]  }
  0x16   : > { %1893 = vmatprep.mubr.bf16.mxu1 %v3743_v12  ;;  %v3772_v45 = vld [vmem:[%s4105_s19 + $0xdc] ss:$36 sps:$4 sm:$0xff]   ;;  %v3780_v51 = vld [vmem:[%s4862_s1 + $0xb0] sm:$0xff]   ;;  %v3784_v52 = vld [vmem:[%s4105_s19 + $0x124] ss:$36 sps:$4 sm:$0xff]  }
  0x17   : > { %v3774_v46 = vld [vmem:[%s4105_s19 + $0x43c] ss:$36 sps:$4 sm:$0xff]   ;;  %v3788_v56 = vld [vmem:[%s4105_s19 + $0xc] ss:$36 sps:$4 sm:$0xff]   ;;  %v3796_v0 = vld [vmem:[%s4105_s19 + $0x54] ss:$36 sps:$4 sm:$0xff]  }
  0x18   : > { %3170 = vmatpush3.bf16.msra.mxu0 %v3731_v9  ;;  %3693 = vmatpush3.bf16.msra.mxu1 %v3731_v9  ;;  %v3776_v48 = vld [vmem:[%s4105_s19 + $0xd8] ss:$36 sps:$4 sm:$0xff]   ;;  %v3786_v58 = vld [vmem:[%s4105_s19 + $0x8] ss:$36 sps:$4 sm:$0xff]   ;;  %v3789_v59 = vld [vmem:[%s4105_s19 + $0x120] ss:$36 sps:$4 sm:$0xff]  }
  0x19   : > { %3171 = vmatprep.subr.bf16.mxu0 %v3732_v10  ;;  %3686 = vmatprep.subr.bf16.mxu1 %v3732_v10  ;;  %v3777_v49 = vld [vmem:[%s4105_s19 + $0x438] ss:$36 sps:$4 sm:$0xff]   ;;  %v3790_v60 = vld [vmem:[%s4862_s1 + $0x1c0] sm:$0xff]   ;;  %v3794_v62 = vld [vmem:[%s4105_s19 + $0x16c] ss:$36 sps:$4 sm:$0xff]  }
  0x1a   : > { %v3792_v54 = vld [vmem:[%s4862_s1 + $0x158] sm:$0xff]   ;;  %v3791_v61 = vld [vmem:[%s4862_s1 + $0x180] sm:$0xff]   ;;  %v3807_v2 = vld [vmem:[%s4862_s1 + $0x1c8] sm:$0xff]  }
  0x1b   : > { %v3793_v55 = vld [vmem:[%s4862_s1 + $0x118] sm:$0xff]   ;;  %v3806_v63 = vld [vmem:[%s4862_s1 + $0x160] sm:$0xff]   ;;  %v3809_v3 = vld [vmem:[%s4862_s1 + $0x188] sm:$0xff]  }
  0x1c   : > { %3172 = vmatpush3.bf16.msra.mxu0 %v3733_v13  ;;  %3694 = vmatpush3.bf16.msra.mxu1 %v3733_v13  ;;  %v3783_v57 = vld [vmem:[%s4862_s1 + $0xb8] sm:$0xff]   ;;  %v3808_v1 = vld [vmem:[%s4862_s1 + $0x120] sm:$0xff]   ;;  %v3798_v4 = vld [vmem:[%s4105_s19 + $0x168] ss:$36 sps:$4 sm:$0xff]  }
  0x1d   : > { %3173 = vmatprep.subr.bf16.mxu0 %v3734_v14  ;;  %3687 = vmatprep.subr.bf16.mxu1 %v3734_v14  ;;  %v3816_v5 = vld [vmem:[%s4862_s1 + $0x168] sm:$0xff]   ;;  %v3799_v7 = vld [vmem:[%s4105_s19 + $0x50] ss:$36 sps:$4 sm:$0xff]   ;;  %v3802_v9 = vld [vmem:[%s4105_s19 + $0x9c] ss:$36 sps:$4 sm:$0xff]  }
  0x1e   : > { %v3817_v6 = vld [vmem:[%s4862_s1 + $0x128] sm:$0xff]   ;;  %v3800_v8 = vld [vmem:[%s4105_s19 + $0x1b4] ss:$36 sps:$4 sm:$0xff]   ;;  %v3810_v14 = vld [vmem:[%s4105_s19 + $0x1fc] ss:$36 sps:$4 sm:$0xff]  }
  0x1f   : > { %v3824_v10 = vld [vmem:[%s4862_s1 + $0x1d0] sm:$0xff]   ;;  %v3805_v13 = vld [vmem:[%s4105_s19 + $0x98] ss:$36 sps:$4 sm:$0xff]  }
  0x20   : > { %3174 = vmatpush3.bf16.msra.mxu0 %v3735_v15  ;;  %3695 = vmatpush3.bf16.msra.mxu1 %v3735_v15  ;;  %v3825_v11 = vld [vmem:[%s4862_s1 + $0x190] sm:$0xff]  }
  0x21   : > { %3175 = vmatprep.subr.bf16.mxu0 %v3736_v16  ;;  %3688 = vmatprep.subr.bf16.mxu1 %v3736_v16  ;;  %v3804_v12 = vld [vmem:[%s4105_s19 + $0x1b0] ss:$36 sps:$4 sm:$0xff]  }
  0x22   : > { %v3832_v15 = vld [vmem:[%s4862_s1 + $0x170] sm:$0xff]  }
  0x23   : > { %v3833_v16 = vld [vmem:[%s4862_s1 + $0x130] sm:$0xff]  }
  0x24   : > { %3176 = vmatpush3.bf16.msra.mxu0 %v3737_v17  ;;  %3696 = vmatpush3.bf16.msra.mxu1 %v3737_v17  ;;  %v3812_v17 = vld [vmem:[%s4105_s19 + $0xe4] ss:$36 sps:$4 sm:$0xff]  }
  0x25   : > { %3273 = vmatprep.subr.bf16.mxu1 %v3744_v18  ;;  %3385 = vmatprep.subr.bf16.mxu0 %v3745_v21  ;;  %v3840_v18 = vld [vmem:[%s4862_s1 + $0x1d8] sm:$0xff]  }
  0x26   : > { %v3842_v21 = vld [vmem:[%s4862_s1 + $0x178] sm:$0xff]  }
  0x27   : > { %1798 = vmatmul.mubr.bf16.vlgmr.msra.gmra.mrb[0].mxu0 %v3738_v19  ;;  %1894 = vmatmul.mubr.bf16.vlgmr.msra.gmra.mrb[0].mxu1 %v3741_v20  ;;  %v3841_v19 = vld [vmem:[%s4862_s1 + $0x198] sm:$0xff]  }
  0x28   : > { %3274 = vmatpush3.bf16.msra.mxu1 %v3746_v22  ;;  %3386 = vmatpush3.bf16.msra.mxu0 %v3747_v23  ;;  %v3814_v20 = vld [vmem:[%s4105_s19 + $0x1f8] ss:$36 sps:$4 sm:$0xff]   ;;  %v3815_v23 = vld [vmem:[%s4105_s19 + $0xe0] ss:$36 sps:$4 sm:$0xff]  }
  0x29   : > { %3275 = vmatprep.subr.bf16.mxu1 %v3748_v24  ;;  %1805 = vmatprep.mubr.bf16.mxu0 %v3750_v25  ;;  %v3843_v22 = vld [vmem:[%s4862_s1 + $0x138] sm:$0xff]   ;;  %v3818_v24 = vld [vmem:[%s4105_s19 + $0x244] ss:$36 sps:$4 sm:$0xff]   ;;  %v3820_v25 = vld [vmem:[%s4105_s19 + $0x12c] ss:$36 sps:$4 sm:$0xff]  }
  0x2a   : > { %1901 = vmatprep.mubr.bf16.mxu1 %v3752_v26  ;;  %3387 = vmatprep.subr.bf16.mxu0 %v3759_v27  ;;  %v3856_v26 = vld [vmem:[%s4862_s1 + $0x1e0] sm:$0xff]  }
  0x2b   : > { %v3822_v27 = vld [vmem:[%s4105_s19 + $0x240] ss:$36 sps:$4 sm:$0xff]  }
  0x2c   : > { %3276 = vmatpush3.bf16.msra.mxu1 %v3749_v28  ;;  %3388 = vmatpush3.bf16.msra.mxu0 %v3761_v29  ;;  %v3857_v28 = vld [vmem:[%s4862_s1 + $0x200] sm:$0xff]  }
  0x2d   : > { %3277 = vmatprep.subr.bf16.mxu1 %v3756_v32  ;;  %3389 = vmatprep.subr.bf16.mxu0 %v3779_v41  ;;  %v3858_v29 = vld [vmem:[%s4862_s1 + $0x1a0] sm:$0xff]   ;;  %v3828_v32 = vld [vmem:[%s4105_s19 + $0x174] ss:$36 sps:$4 sm:$0xff]  }
  0x2e   : > { %v3886_v41 = vld [vmem:[%s4862_s1 + $0x1f0] sm:$0xff]  }
  0x2f   : > { %1806 = vmatmul.mubr.bf16.gmra.mrb[4].mxu0 %v3754_v30  ;;  %1902 = vmatmul.mubr.bf16.gmra.mrb[4].mxu1 %v3755_v31  ;;  %v3823_v30 = vld [vmem:[%s4105_s19 + $0x128] ss:$36 sps:$4 sm:$0xff]  }
  0x30   : > { %3278 = vmatpush3.bf16.msra.mxu1 %v3757_v33  ;;  %1813 = vmatprep.mubr.bf16.mxu0 %v3762_v35  ;;  %v3826_v31 = vld [vmem:[%s4105_s19 + $0x28c] ss:$36 sps:$4 sm:$0xff]  }
  0x31   : > { %3279 = vmatprep.subr.bf16.mxu1 %v3758_v34  ;;  %1909 = vmatprep.mubr.bf16.mxu1 %v3764_v36  ;;  %v3871_v33 = vld [vmem:[%s4862_s1 + $0x1e8] sm:$0xff]   ;;  %v3831_v35 = vld [vmem:[%s4105_s19 + $0x170] ss:$36 sps:$4 sm:$0xff]  }
  0x32   : > { %3390 = vmatpush3.bf16.msra.mxu0 %v3781_v44  ;;  %v3830_v34 = vld [vmem:[%s4105_s19 + $0x288] ss:$36 sps:$4 sm:$0xff]  }
  0x33   : > { %3391 = vmatprep.subr.bf16.mxu0 %v3792_v54  ;;  %v3873_v36 = vld [vmem:[%s4862_s1 + $0x1a8] sm:$0xff]   ;;  %v3861_v54 = vld [vmem:[%s4105_s19 + $0x5c] ss:$36 sps:$4 sm:$0xff]  }
  0x34   : > { %3280 = vmatpush3.bf16.msra.mxu1 %v3760_v37  ;;  %v3834_v37 = vld [vmem:[%s4105_s19 + $0x2d4] ss:$36 sps:$4 sm:$0xff]   ;;  %v3846_v44 = vld [vmem:[%s4105_s19 + $0x204] ss:$36 sps:$4 sm:$0xff]  }
  0x35   : > { %3281 = vmatprep.subr.bf16.mxu1 %v3768_v38  ;;  %v3836_v38 = vld [vmem:[%s4105_s19 + $0x1bc] ss:$36 sps:$4 sm:$0xff]  }
  0x36   : > { %3392 = vmatpush3.bf16.msra.mxu0 %v3793_v55  ;;  %v3872_v55 = vld [vmem:[%s4862_s1 + $0x208] sm:$0xff]  }
  0x37   : > { %1814 = vmatmul.mubr.bf16.gmra.mrb[8].mxu0 %v3766_v39  ;;  %1910 = vmatmul.mubr.bf16.gmra.mrb[8].mxu1 %v3767_v40  ;;  %v3838_v39 = vld [vmem:[%s4105_s19 + $0x2d0] ss:$36 sps:$4 sm:$0xff]   ;;  %v3839_v40 = vld [vmem:[%s4105_s19 + $0x1b8] ss:$36 sps:$4 sm:$0xff]  }
  0x38   : > { %3282 = vmatpush3.bf16.msra.mxu1 %v3769_v42  ;;  %1821 = vmatprep.mubr.bf16.mxu0 %v3772_v45  ;;  %v3844_v42 = vld [vmem:[%s4105_s19 + $0x31c] ss:$36 sps:$4 sm:$0xff]  }
  0x39   : > { %3283 = vmatprep.subr.bf16.mxu1 %v3770_v43  ;;  %1917 = vmatprep.mubr.bf16.mxu1 %v3774_v46  ;;  %v3888_v43 = vld [vmem:[%s4862_s1 + $0x1b0] sm:$0xff]   ;;  %v3848_v45 = vld [vmem:[%s4105_s19 + $0x318] ss:$36 sps:$4 sm:$0xff]   ;;  %v3849_v46 = vld [vmem:[%s4105_s19 + $0x200] ss:$36 sps:$4 sm:$0xff]  }
  0x3a   : > { %3393 = vmatprep.subr.bf16.mxu0 %v3806_v63  ;;  %v3869_v63 = vld [vmem:[%s4105_s19 + $0x2d8] ss:$36 sps:$4 sm:$0xff]  }
  0x3b   : > { %3394 = vmatpush3.bf16.msra.mxu0 %v3808_v1  ;;  %v3874_v1 = vld [vmem:[%s4105_s19 + $0x324] ss:$36 sps:$4 sm:$0xff]  }
  0x3c   : > { %3284 = vmatpush3.bf16.msra.mxu1 %v3771_v47  ;;  %3395 = vmatprep.subr.bf16.mxu0 %v3816_v5  ;;  %v3901_v47 = vld [vmem:[%s4862_s1 + $0x1f8] sm:$0xff]   ;;  %v3879_v5 = vld [vmem:[%s4105_s19 + $0xe8] ss:$36 sps:$4 sm:$0xff]  }
  0x3d   : > { %3285 = vmatprep.subr.bf16.mxu1 %v3778_v50  ;;  %v3854_v50 = vld [vmem:[%s4105_s19 + $0x14] ss:$36 sps:$4 sm:$0xff]  }
  0x3f   : > { %1822 = vmatmul.mubr.bf16.gmra.mrb[12].mxu0 %v3776_v48  ;;  %1918 = vmatmul.mubr.bf16.gmra.mrb[12].mxu1 %v3777_v49  ;;  %v3850_v48 = vld [vmem:[%s4105_s19 + $0x24c] ss:$36 sps:$4 sm:$0xff]   ;;  %v3903_v49 = vld [vmem:[%s4862_s1 + $0x1b8] sm:$0xff]  }
  0x40   : > { %3286 = vmatpush3.bf16.msra.mxu1 %v3780_v51  ;;  %1829 = vmatprep.mubr.bf16.mxu0 %v3784_v52  ;;  %v3852_v51 = vld [vmem:[%s4105_s19 + $0x10] ss:$36 sps:$4 sm:$0xff]   ;;  %v3855_v52 = vld [vmem:[%s4105_s19 + $0x248] ss:$36 sps:$4 sm:$0xff]  }
  0x41   : > { %3287 = vmatprep.subr.bf16.mxu1 %v3782_v53  ;;  %1958 = vmatprep.mubr.bf16.mxu1 %v3788_v56  ;;  %v3859_v53 = vld [vmem:[%s4105_s19 + $0x294] ss:$36 sps:$4 sm:$0xff]  }
  0x42   : > { %3396 = vmatpush3.bf16.msra.mxu0 %v3817_v6  ;;  %v3887_v56 = vld [vmem:[%s4862_s1 + $0x210] sm:$0xff]  }
  0x43   : > { %3397 = vmatprep.subr.bf16.mxu0 %v3832_v15  ;;  %v3942_v6 = vld [vmem:[%s4862_s1 + $0x230] sm:$0xff]   ;;  %v3894_v15 = vld [vmem:[%s4105_s19 + $0x178] ss:$36 sps:$4 sm:$0xff]  }
  0x44   : > { %3288 = vmatpush3.bf16.msra.mxu1 %v3783_v57  ;;  %v3863_v57 = vld [vmem:[%s4105_s19 + $0x290] ss:$36 sps:$4 sm:$0xff]  }
  0x45   : > { %3497 = vmatprep.subr.bf16.mxu1 %v3790_v60  ;;  %v3867_v60 = vld [vmem:[%s4105_s19 + $0xa4] ss:$36 sps:$4 sm:$0xff]  }
  0x46   : > { %3398 = vmatpush3.bf16.msra.mxu0 %v3833_v16  ;;  %v3895_v16 = vld [vmem:[%s4105_s19 + $0x3fc] ss:$36 sps:$4 sm:$0xff]  }
  0x47   : > { %1830 = vmatmul.mubr.bf16.gmra.mrb[16].mxu0 %v3789_v59  ;;  %1959 = vmatmul.mubr.bf16.vlgmr.msra.gmra.mrb[16].mxu1 %v3786_v58  ;;  %v3864_v58 = vld [vmem:[%s4105_s19 + $0x58] ss:$36 sps:$4 sm:$0xff]  }
  0x48   : > { %3498 = vmatpush3.bf16.msra.mxu1 %v3791_v61  ;;  %1837 = vmatprep.mubr.bf16.mxu0 %v3794_v62  ;;  %v3865_v59 = vld [vmem:[%s4105_s19 + $0x2dc] ss:$36 sps:$4 sm:$0xff]  }
  0x49   : > { %1966 = vmatprep.mubr.bf16.mxu1 %v3796_v0  ;;  %3499 = vmatprep.subr.bf16.mxu1 %v3807_v2  ;;  %v3902_v61 = vld [vmem:[%s4862_s1 + $0x218] sm:$0xff]   ;;  %v3916_v62 = vld [vmem:[%s4862_s1 + $0x220] sm:$0xff]   ;;  %v3876_v2 = vld [vmem:[%s4105_s19 + $0xec] ss:$36 sps:$4 sm:$0xff]  }
  0x4a   : > { %3399 = vmatprep.subr.bf16.mxu0 %v3842_v21  ;;  %v3870_v0 = vld [vmem:[%s4105_s19 + $0xa0] ss:$36 sps:$4 sm:$0xff]   ;;  %v3906_v21 = vld [vmem:[%s4105_s19 + $0x20c] ss:$36 sps:$4 sm:$0xff]  }
  0x4b   : > { %3400 = vmatpush3.bf16.msra.mxu0 %v3843_v22  ;;  %v3908_v22 = vld [vmem:[%s4105_s19 + $0x440] ss:$36 sps:$4 sm:$0xff]  }
  0x4c   : > { %3500 = vmatpush3.bf16.msra.mxu1 %v3809_v3  ;;  %3633 = vmatprep.subr.bf16.mxu0 %v3857_v28  ;;  %v3929_v3 = vld [vmem:[%s4862_s1 + $0x228] sm:$0xff]  }
  0x4d   : > { %3501 = vmatprep.subr.bf16.mxu1 %v3824_v10  ;;  %v3884_v10 = vld [vmem:[%s4105_s19 + $0x368] ss:$36 sps:$4 sm:$0xff]  }
  0x4f   : > { %1838 = vmatmul.mubr.bf16.gmra.mrb[20].mxu0 %v3798_v4  ;;  %1967 = vmatmul.mubr.bf16.gmra.mrb[20].mxu1 %v3799_v7  ;;  %v3878_v4 = vld [vmem:[%s4105_s19 + $0x320] ss:$36 sps:$4 sm:$0xff]   ;;  %v3880_v7 = vld [vmem:[%s4105_s19 + $0x36c] ss:$36 sps:$4 sm:$0xff]  }
  0x50   : > { %1845 = vmatprep.mubr.bf16.mxu0 %v3800_v8  ;;  %1974 = vmatprep.mubr.bf16.mxu1 %v3802_v9  ;;  %v3882_v8 = vld [vmem:[%s4105_s19 + $0x134] ss:$36 sps:$4 sm:$0xff]  }
  0x51   : > { %3502 = vmatpush3.bf16.msra.mxu1 %v3825_v11  ;;  %v3955_v9 = vld [vmem:[%s4862_s1 + $0x238] sm:$0xff]   ;;  %v3885_v11 = vld [vmem:[%s4105_s19 + $0x130] ss:$36 sps:$4 sm:$0xff]  }
  0x52   : > { %3503 = vmatprep.subr.bf16.mxu1 %v3840_v18  ;;  %v3899_v18 = vld [vmem:[%s4105_s19 + $0x3f8] ss:$36 sps:$4 sm:$0xff]  }
  0x55   : > { %3504 = vmatpush3.bf16.msra.mxu1 %v3841_v19  ;;  %v3900_v19 = vld [vmem:[%s4105_s19 + $0x1c0] ss:$36 sps:$4 sm:$0xff]  }
  0x56   : > { %3505 = vmatprep.subr.bf16.mxu1 %v3856_v26  ;;  %v3912_v26 = vld [vmem:[%s4105_s19 + $0x18] ss:$36 sps:$4 sm:$0xff]  }
  0x57   : > { %1846 = vmatmul.mubr.bf16.gmra.mrb[24].mxu0 %v3804_v12  ;;  %1975 = vmatmul.mubr.bf16.gmra.mrb[24].mxu1 %v3805_v13  ;;  %v3889_v12 = vld [vmem:[%s4105_s19 + $0x3b4] ss:$36 sps:$4 sm:$0xff]   ;;  %v3891_v13 = vld [vmem:[%s4105_s19 + $0x17c] ss:$36 sps:$4 sm:$0xff]  }
  0x58   : > { %1853 = vmatprep.mubr.bf16.mxu0 %v3810_v14  ;;  %1982 = vmatprep.mubr.bf16.mxu1 %v3812_v17  ;;  %v3893_v14 = vld [vmem:[%s4105_s19 + $0x3b0] ss:$36 sps:$4 sm:$0xff]   ;;  %v3897_v17 = vld [vmem:[%s4105_s19 + $0x1c4] ss:$36 sps:$4 sm:$0xff]  }
  0x59   : > { %3506 = vmatpush3.bf16.msra.mxu1 %v3858_v29  ;;  %v3919_v29 = vld [vmem:[%s4105_s19 + $0x64] ss:$36 sps:$4 sm:$0xff]  }
  0x5a   : > { %3507 = vmatprep.subr.bf16.mxu1 %v3871_v33  ;;  %v3925_v33 = vld [vmem:[%s4105_s19 + $0xac] ss:$36 sps:$4 sm:$0xff]  }
  0x5d   : > { %3508 = vmatpush3.bf16.msra.mxu1 %v3873_v36  ;;  %v3930_v36 = vld [vmem:[%s4105_s19 + $0x32c] ss:$36 sps:$4 sm:$0xff]  }
  0x5e   : > { %3509 = vmatprep.subr.bf16.mxu1 %v3886_v41  ;;  %v3938_v41 = vld [vmem:[%s4105_s19 + $0x13c] ss:$36 sps:$4 sm:$0xff]  }
  0x5f   : > { %1854 = vmatmul.mubr.bf16.gmra.mrb[28].mxu0 %v3814_v20  ;;  %1983 = vmatmul.mubr.bf16.gmra.mrb[28].mxu1 %v3815_v23  ;;  %v3904_v20 = vld [vmem:[%s4105_s19 + $0x444] ss:$36 sps:$4 sm:$0xff]  }
  0x60   : > { %1861 = vmatprep.mubr.bf16.mxu0 %v3818_v24  ;;  %1990 = vmatprep.mubr.bf16.mxu1 %v3820_v25  ;;  %v3909_v23 = vld [vmem:[%s4105_s19 + $0x208] ss:$36 sps:$4 sm:$0xff]   ;;  %v3910_v24 = vld [vmem:[%s4105_s19 + $0x254] ss:$36 sps:$4 sm:$0xff]   ;;  %v3914_v25 = vld [vmem:[%s4105_s19 + $0x1c] ss:$36 sps:$4 sm:$0xff]  }
  0x61   : > { %3510 = vmatpush3.bf16.msra.mxu1 %v3888_v43  ;;  %v3941_v43 = vld [vmem:[%s4105_s19 + $0x138] ss:$36 sps:$4 sm:$0xff]  }
  0x62   : > { %3511 = vmatprep.subr.bf16.mxu1 %v3901_v47  ;;  %v3948_v47 = vld [vmem:[%s4105_s19 + $0x180] ss:$36 sps:$4 sm:$0xff]  }
  0x65   : > { %3512 = vmatpush3.bf16.msra.mxu1 %v3903_v49  ;;  %v3951_v49 = vld [vmem:[%s4105_s19 + $0x1cc] ss:$36 sps:$4 sm:$0xff]  }
  0x67   : > { %1862 = vmatmul.mubr.bf16.gmra.mrb[32].mxu0 %v3822_v27  ;;  %1991 = vmatmul.mubr.bf16.gmra.mrb[32].mxu1 %v3823_v30  ;;  %v3915_v27 = vld [vmem:[%s4105_s19 + $0x250] ss:$36 sps:$4 sm:$0xff]   ;;  %v3921_v30 = vld [vmem:[%s4105_s19 + $0x298] ss:$36 sps:$4 sm:$0xff]  }
  0x68   : > { %1869 = vmatprep.mubr.bf16.mxu0 %v3826_v31  ;;  %1998 = vmatprep.mubr.bf16.mxu1 %v3828_v32  ;;  %v3922_v31 = vld [vmem:[%s4105_s19 + $0x60] ss:$36 sps:$4 sm:$0xff]  }
  0x69   : > { %v3923_v32 = vld [vmem:[%s4105_s19 + $0x2e4] ss:$36 sps:$4 sm:$0xff]  }
  0x6f   : > { %1870 = vmatmul.mubr.bf16.gmra.mrb[36].mxu0 %v3830_v34  ;;  %1999 = vmatmul.mubr.bf16.gmra.mrb[36].mxu1 %v3831_v35  ;;  %v3927_v34 = vld [vmem:[%s4105_s19 + $0x2e0] ss:$36 sps:$4 sm:$0xff]   ;;  %v3928_v35 = vld [vmem:[%s4105_s19 + $0xa8] ss:$36 sps:$4 sm:$0xff]  }
  0x70   : > { %1877 = vmatprep.mubr.bf16.mxu0 %v3834_v37  ;;  %2006 = vmatprep.mubr.bf16.mxu1 %v3836_v38  ;;  %v3932_v37 = vld [vmem:[%s4105_s19 + $0xf4] ss:$36 sps:$4 sm:$0xff]   ;;  %v3934_v38 = vld [vmem:[%s4105_s19 + $0x328] ss:$36 sps:$4 sm:$0xff]  }
  0x77   : > { %1878 = vmatmul.mubr.bf16.gmra.mrb[40].mxu0 %v3838_v39  ;;  %2007 = vmatmul.mubr.bf16.gmra.mrb[40].mxu1 %v3839_v40  ;;  %v3935_v39 = vld [vmem:[%s4105_s19 + $0xf0] ss:$36 sps:$4 sm:$0xff]  }
  0x78   : > { %1885 = vmatprep.mubr.bf16.mxu0 %v3844_v42  ;;  %2014 = vmatprep.mubr.bf16.mxu1 %v3846_v44  ;;  %v3936_v40 = vld [vmem:[%s4105_s19 + $0x374] ss:$36 sps:$4 sm:$0xff]   ;;  %v3943_v44 = vld [vmem:[%s4105_s19 + $0x3bc] ss:$36 sps:$4 sm:$0xff]  }
  0x79   : > { %v3940_v42 = vld [vmem:[%s4105_s19 + $0x370] ss:$36 sps:$4 sm:$0xff]  }
  0x7f   : > { %1886 = vmatmul.mubr.bf16.gmra.mrb[44].mxu0 %v3848_v45  ;;  %2015 = vmatmul.mubr.bf16.gmra.mrb[44].mxu1 %v3849_v46  ;;  %v3945_v45 = vld [vmem:[%s4105_s19 + $0x184] ss:$36 sps:$4 sm:$0xff]   ;;  %v3947_v46 = vld [vmem:[%s4105_s19 + $0x3b8] ss:$36 sps:$4 sm:$0xff]  }
  0x80   : > { %2022 = vmatprep.mubr.bf16.mxu1 %v3850_v48  ;;  %2119 = vmatprep.mubr.bf16.mxu0 %v3854_v50  ;;  %v3949_v48 = vld [vmem:[%s4105_s19 + $0x404] ss:$36 sps:$4 sm:$0xff]  }
  0x81   : > { %v3953_v50 = vld [vmem:[%s4105_s19 + $0x400] ss:$36 sps:$4 sm:$0xff]  }
  0x87   : > { %2023 = vmatmul.mubr.bf16.gmra.mrb[48].mxu1 %v3855_v52  ;;  %2120 = vmatmul.mubr.bf16.vlgmr.msra.gmra.mrb[48].mxu0 %v3852_v51  ;;  %v3954_v51 = vld [vmem:[%s4105_s19 + $0x1c8] ss:$36 sps:$4 sm:$0xff]  }
  0x88   : > { %3634 = vmatpush3.bf16.msra.mxu0 %v3857_v28  ;;  %2030 = vmatprep.mubr.bf16.mxu1 %v3859_v53  ;;  %v3917_v28 = vld [vmem:[%s4105_s19 + $0x29c] ss:$36 sps:$4 sm:$0xff]   ;;  %v3956_v52 = vld [vmem:[%s4105_s19 + $0x44c] ss:$36 sps:$4 sm:$0xff]   ;;  %v3958_v53 = vld [vmem:[%s4105_s19 + $0x214] ss:$36 sps:$4 sm:$0xff]  }
  0x89   : > { %2127 = vmatprep.mubr.bf16.mxu0 %v3861_v54  ;;  %3635 = vmatprep.subr.bf16.mxu0 %v3872_v55 }
  0x8c   : > { %3636 = vmatpush3.bf16.msra.mxu0 %v3872_v55 }
  0x8d   : > { %3637 = vmatprep.subr.bf16.mxu0 %v3887_v56 }
  0x8f   : > { %2031 = vmatmul.mubr.bf16.gmra.mrb[52].mxu1 %v3863_v57  ;;  %2128 = vmatmul.mubr.bf16.gmra.mrb[52].mxu0 %v3864_v58  ;;  %v3960_v58 = vld [vmem:[%s4105_s19 + $0x448] ss:$36 sps:$4 sm:$0xff]  }
  0x90   : > { %2038 = vmatprep.mubr.bf16.mxu1 %v3865_v59  ;;  %2135 = vmatprep.mubr.bf16.mxu0 %v3867_v60  ;;  %v3961_v59 = vld [vmem:[%s4105_s19 + $0x210] ss:$36 sps:$4 sm:$0xff]  }
  0x91   : > { %3638 = vmatpush3.bf16.msra.mxu0 %v3887_v56 }
  0x92   : > { %3639 = vmatprep.subr.bf16.mxu0 %v3902_v61 }
  0x95   : > { %3640 = vmatpush3.bf16.msra.mxu0 %v3902_v61 }
  0x96   : > { %3641 = vmatprep.subr.bf16.mxu0 %v3916_v62 }
  0x97   : > { %2039 = vmatmul.mubr.bf16.gmra.mrb[56].mxu1 %v3869_v63  ;;  %2136 = vmatmul.mubr.bf16.gmra.mrb[56].mxu0 %v3870_v0  ;;  %v3962_v0 = vld [vmem:[%s4105_s19 + $0x25c] ss:$36 sps:$4 sm:$0xff]  }
  0x98   : > { %2046 = vmatprep.mubr.bf16.mxu1 %v3874_v1  ;;  %2143 = vmatprep.mubr.bf16.mxu0 %v3876_v2  ;;  %v3964_v1 = vld [vmem:[%s4105_s19 + $0x20] ss:$36 sps:$4 sm:$0xff]  }
  0x99   : > { %3642 = vmatpush3.bf16.msra.mxu0 %v3916_v62 }
  0x9a   : > { %3643 = vmatprep.subr.bf16.mxu0 %v3929_v3 }
  0x9d   : > { %3644 = vmatpush3.bf16.msra.mxu0 %v3929_v3 }
  0x9e   : > { %3645 = vmatprep.subr.bf16.mxu0 %v3942_v6 }
  0x9f   : > { %2047 = vmatmul.mubr.bf16.gmra.mrb[60].mxu1 %v3878_v4  ;;  %2144 = vmatmul.mubr.bf16.gmra.mrb[60].mxu0 %v3879_v5 }
  0xa0   : > { %2054 = vmatprep.mubr.bf16.mxu1 %v3880_v7  ;;  %2151 = vmatprep.mubr.bf16.mxu0 %v3882_v8 }
  0xa1   : > { %3646 = vmatpush3.bf16.msra.mxu0 %v3942_v6 }
  0xa2   : > { %3647 = vmatprep.subr.bf16.mxu0 %v3955_v9 }
  0xa5   : > { %3648 = vmatpush3.bf16.msra.mxu0 %v3955_v9 }
  0xa7   : > { %2055 = vmatmul.mubr.bf16.gmra.mrb[64].mxu1 %v3884_v10  ;;  %2152 = vmatmul.mubr.bf16.gmra.mrb[64].mxu0 %v3885_v11  ;;  %v3965_v10 = vld [vmem:[%s4105_s19 + $0x258] ss:$36 sps:$4 sm:$0xff]   ;;  %v3966_v11 = vld [vmem:[%s4105_s19 + $0x68] ss:$36 sps:$4 sm:$0xff]  }
  0xa8   : > { %2062 = vmatprep.mubr.bf16.mxu1 %v3889_v12  ;;  %2159 = vmatprep.mubr.bf16.mxu0 %v3891_v13 }
  0xaf   : > { %2063 = vmatmul.mubr.bf16.gmra.mrb[68].mxu1 %v3893_v14  ;;  %2160 = vmatmul.mubr.bf16.gmra.mrb[68].mxu0 %v3894_v15 }
  0xb0   : > { %2070 = vmatprep.mubr.bf16.mxu1 %v3895_v16  ;;  %2167 = vmatprep.mubr.bf16.mxu0 %v3897_v17  ;;  %v3967_v16 = vld [vmem:[%s4105_s19 + $0x2a4] ss:$36 sps:$4 sm:$0xff]   ;;  %v3969_v17 = vld [vmem:[%s4105_s19 + $0xb0] ss:$36 sps:$4 sm:$0xff]  }
  0xb7   : > { %2071 = vmatmul.mubr.bf16.gmra.mrb[72].mxu1 %v3899_v18  ;;  %2168 = vmatmul.mubr.bf16.gmra.mrb[72].mxu0 %v3900_v19 }
  0xb8   : > { %2078 = vmatprep.mubr.bf16.mxu1 %v3904_v20  ;;  %2175 = vmatprep.mubr.bf16.mxu0 %v3906_v21 }
  0xbf   : > { %2079 = vmatmul.mubr.bf16.gmra.mrb[76].mxu1 %v3908_v22  ;;  %2176 = vmatmul.mubr.bf16.gmra.mrb[76].mxu0 %v3909_v23 }
  0xc0   : > { %2183 = vmatprep.mubr.bf16.mxu0 %v3910_v24  ;;  %2280 = vmatprep.mubr.bf16.mxu1 %v3914_v25 }
  0xc7   : > { %2184 = vmatmul.mubr.bf16.gmra.mrb[80].mxu0 %v3915_v27  ;;  %2281 = vmatmul.mubr.bf16.vlgmr.msra.gmra.mrb[80].mxu1 %v3912_v26  ;;  %v3970_v26 = vld [vmem:[%s4105_s19 + $0x2a0] ss:$36 sps:$4 sm:$0xff]   ;;  %v3971_v27 = vld [vmem:[%s4105_s19 + $0xf8] ss:$36 sps:$4 sm:$0xff]  }
  0xc8   : > { %2191 = vmatprep.mubr.bf16.mxu0 %v3917_v28  ;;  %2288 = vmatprep.mubr.bf16.mxu1 %v3919_v29 }
  0xcf   : > { %2192 = vmatmul.mubr.bf16.gmra.mrb[84].mxu0 %v3921_v30  ;;  %2289 = vmatmul.mubr.bf16.gmra.mrb[84].mxu1 %v3922_v31 }
  0xd0   : > { %2199 = vmatprep.mubr.bf16.mxu0 %v3923_v32  ;;  %2296 = vmatprep.mubr.bf16.mxu1 %v3925_v33  ;;  %v3972_v32 = vld [vmem:[%s4105_s19 + $0x2ec] ss:$36 sps:$4 sm:$0xff]   ;;  %v3974_v33 = vld [vmem:[%s4105_s19 + $0x140] ss:$36 sps:$4 sm:$0xff]  }
  0xd7   : > { %2200 = vmatmul.mubr.bf16.gmra.mrb[88].mxu0 %v3927_v34  ;;  %2297 = vmatmul.mubr.bf16.gmra.mrb[88].mxu1 %v3928_v35 }
  0xd8   : > { %2207 = vmatprep.mubr.bf16.mxu0 %v3930_v36  ;;  %2304 = vmatprep.mubr.bf16.mxu1 %v3932_v37 }
  0xdf   : > { %2208 = vmatmul.mubr.bf16.gmra.mrb[92].mxu0 %v3934_v38  ;;  %2305 = vmatmul.mubr.bf16.gmra.mrb[92].mxu1 %v3935_v39 }
  0xe0   : > { %2215 = vmatprep.mubr.bf16.mxu0 %v3936_v40  ;;  %2312 = vmatprep.mubr.bf16.mxu1 %v3938_v41 }
  0xe7   : > { %2216 = vmatmul.mubr.bf16.gmra.mrb[96].mxu0 %v3940_v42  ;;  %2313 = vmatmul.mubr.bf16.gmra.mrb[96].mxu1 %v3941_v43  ;;  %v3975_v42 = vld [vmem:[%s4105_s19 + $0x2e8] ss:$36 sps:$4 sm:$0xff]  }
  0xe8   : > { %2223 = vmatprep.mubr.bf16.mxu0 %v3943_v44  ;;  %2320 = vmatprep.mubr.bf16.mxu1 %v3945_v45  ;;  %v3976_v43 = vld [vmem:[%s4105_s19 + $0x188] ss:$36 sps:$4 sm:$0xff]  }
  0xef   : > { %2224 = vmatmul.mubr.bf16.gmra.mrb[100].mxu0 %v3947_v46  ;;  %2321 = vmatmul.mubr.bf16.gmra.mrb[100].mxu1 %v3948_v47 }
  0xf0   : > { %2231 = vmatprep.mubr.bf16.mxu0 %v3949_v48  ;;  %2328 = vmatprep.mubr.bf16.mxu1 %v3951_v49  ;;  %v3977_v48 = vld [vmem:[%s4105_s19 + $0x334] ss:$36 sps:$4 sm:$0xff]  }
  0xf1   : > { %v3979_v49 = vld [vmem:[%s4105_s19 + $0x1d0] ss:$36 sps:$4 sm:$0xff]  }
  0xf7   : > { %2232 = vmatmul.mubr.bf16.gmra.mrb[104].mxu0 %v3953_v50  ;;  %2329 = vmatmul.mubr.bf16.gmra.mrb[104].mxu1 %v3954_v51 }
  0xf8   : > { %2239 = vmatprep.mubr.bf16.mxu0 %v3956_v52  ;;  %2336 = vmatprep.mubr.bf16.mxu1 %v3958_v53 }
  0xfa   : > { %v3177_v54 = vpop.f32.mrb[0].mxu0  ;;  %v3249_v55 = vpop.f32.mrb[0].mxu1 }
  0xfb   : > { %v3178_v56 = vpop.f32.mrb[1].mxu0  ;;  %v3250_v57 = vpop.f32.mrb[1].mxu1 }
  0xfc   : > { %v4408_v60 = vadd.f32 %v3178_v56, %v3177_v54  ;;  %v4410_v61 = vadd.f32 %v3250_v57, %v3249_v55  ;;  %v3180_v62 = vpop.f32.mrb[2].mxu0  ;;  %v3252_v63 = vpop.f32.mrb[2].mxu1  ;;  %v4457_v54 = vld [vmem:[%s4863_s2] ss:$0 sm:$0xff] }
  0xfd   : > { %v3181_v2 = vpop.f32.mrb[3].mxu0  ;;  %v3253_v3 = vpop.f32.mrb[3].mxu1 }
  0xfe   : > { %v4414_v4 = vadd.f32 %v3181_v2, %v3180_v62  ;;  %v4416_v5 = vadd.f32 %v3253_v3, %v3252_v63  ;;  %v3981_v62 = vld [vmem:[%s4105_s19 + $0x218] ss:$36 sps:$4 sm:$0xff]   ;;  %v1800_v63 = vadd.f32 %v4408_v60, %v4457_v54 }
  0xff   : > { %2240 = vmatmul.mubr.bf16.gmra.mrb[108].mxu0 %v3960_v58  ;;  %2337 = vmatmul.mubr.bf16.gmra.mrb[108].mxu1 %v3961_v59  ;;  %v3980_v59 = vld [vmem:[%s4105_s19 + $0x330] ss:$36 sps:$4 sm:$0xff]  }
 0x100   : > { %2344 = vmatprep.mubr.bf16.mxu1 %v3962_v0  ;;  %3649 = vmatprep.mubr.bf16.mxu0 %v3964_v1 }
 0x102   : > { %v3183_v6 = vpop.f32.mrb[4].mxu0  ;;  %v3255_v7 = vpop.f32.mrb[4].mxu1 }
 0x103   : > { %v3184_v8 = vpop.f32.mrb[5].mxu0  ;;  %v3256_v9 = vpop.f32.mrb[5].mxu1 }
 0x104   : > { %v4420_v12 = vadd.f32 %v3184_v8, %v3183_v6  ;;  %v4422_v13 = vadd.f32 %v3256_v9, %v3255_v7  ;;  %v3186_v14 = vpop.f32.mrb[6].mxu0  ;;  %v3258_v15 = vpop.f32.mrb[6].mxu1  ;;  %v3982_v6 = vld [vmem:[%s4105_s19 + $0x37c] ss:$36 sps:$4 sm:$0xff]  }
 0x105   : > { %v3187_v18 = vpop.f32.mrb[7].mxu0  ;;  %v3259_v19 = vpop.f32.mrb[7].mxu1  ;;  %v3984_v7 = vld [vmem:[%s4105_s19 + $0x260] ss:$36 sps:$4 sm:$0xff]  }
 0x106   : > { %v4426_v20 = vadd.f32 %v3187_v18, %v3186_v14  ;;  %v4428_v21 = vadd.f32 %v3259_v19, %v3258_v15 }
 0x107   : > { %2345 = vmatmul.mubr.bf16.gmra.mrb[112].mxu1 %v3965_v10  ;;  %3650 = vmatmul.mubr.bf16.vlgmr.msra.gmra.mrb[112].mxu0 %v3966_v11  ;;  %v1803_v10 = vadd.f32 %v4414_v4, %v4457_v54  ;;  %v1808_v4 = vadd.f32 %v4420_v12, %v4457_v54 }
 0x108   : > { %2352 = vmatprep.mubr.bf16.mxu1 %v3967_v16  ;;  %3653 = vmatprep.mubr.bf16.mxu0 %v3969_v17 }
 0x10a   : > { %v3189_v22 = vpop.f32.mrb[8].mxu0  ;;  %v3261_v23 = vpop.f32.mrb[8].mxu1 }
 0x10b   : > { %v3190_v24 = vpop.f32.mrb[9].mxu0  ;;  %v3262_v25 = vpop.f32.mrb[9].mxu1 }
 0x10c   : > { %v4432_v28 = vadd.f32 %v3190_v24, %v3189_v22  ;;  %v4434_v29 = vadd.f32 %v3262_v25, %v3261_v23  ;;  %v3192_v30 = vpop.f32.mrb[10].mxu0  ;;  %v3264_v31 = vpop.f32.mrb[10].mxu1  ;;  %v3985_v22 = vld [vmem:[%s4105_s19 + $0x378] ss:$36 sps:$4 sm:$0xff]   ;;  %v3986_v23 = vld [vmem:[%s4105_s19 + $0x2a8] ss:$36 sps:$4 sm:$0xff]  }
 0x10d   : > { %v3193_v34 = vpop.f32.mrb[11].mxu0  ;;  %v3265_v35 = vpop.f32.mrb[11].mxu1 }
 0x10e   : > { %v4438_v36 = vadd.f32 %v3193_v34, %v3192_v30  ;;  %v4440_v37 = vadd.f32 %v3265_v35, %v3264_v31  ;;  %v3987_v30 = vld [vmem:[%s4105_s19 + $0x3c4] ss:$36 sps:$4 sm:$0xff]   ;;  %v3989_v31 = vld [vmem:[%s4105_s19 + $0x2f0] ss:$36 sps:$4 sm:$0xff]   ;;  %v1811_v34 = vadd.f32 %v4426_v20, %v4457_v54  ;;  %v1816_v20 = vadd.f32 %v4432_v28, %v4457_v54 }
 0x10f   : > { %2353 = vmatmul.mubr.bf16.gmra.mrb[116].mxu1 %v3970_v26  ;;  %3654 = vmatmul.mubr.bf16.gmra.mrb[116].mxu0 %v3971_v27 }
 0x110   : > { %2360 = vmatprep.mubr.bf16.mxu1 %v3972_v32  ;;  %3657 = vmatprep.mubr.bf16.mxu0 %v3974_v33 }
 0x112   : > { %v3195_v38 = vpop.f32.mrb[12].mxu0  ;;  %v3267_v39 = vpop.f32.mrb[12].mxu1 }
 0x113   : > { %v3196_v40 = vpop.f32.mrb[13].mxu0  ;;  %v3268_v41 = vpop.f32.mrb[13].mxu1 }
 0x114   : > { %v4444_v44 = vadd.f32 %v3196_v40, %v3195_v38  ;;  %v4446_v45 = vadd.f32 %v3268_v41, %v3267_v39  ;;  %v3198_v46 = vpop.f32.mrb[14].mxu0  ;;  %v3270_v47 = vpop.f32.mrb[14].mxu1 }
 0x115   : > { %v3199_v50 = vpop.f32.mrb[15].mxu0  ;;  %v3271_v51 = vpop.f32.mrb[15].mxu1 }
 0x116   : > { %v4450_v52 = vadd.f32 %v3199_v50, %v3198_v46  ;;  %v4452_v53 = vadd.f32 %v3271_v51, %v3270_v47  ;;  %v3990_v46 = vld [vmem:[%s4105_s19 + $0x3c0] ss:$36 sps:$4 sm:$0xff]   ;;  %v3991_v47 = vld [vmem:[%s4105_s19 + $0x338] ss:$36 sps:$4 sm:$0xff]  }
 0x117   : > { %2361 = vmatmul.mubr.bf16.gmra.mrb[120].mxu1 %v3975_v42  ;;  %3658 = vmatmul.mubr.bf16.gmra.mrb[120].mxu0 %v3976_v43 }
 0x118   : > { %2368 = vmatprep.mubr.bf16.mxu1 %v3977_v48  ;;  %3661 = vmatprep.mubr.bf16.mxu0 %v3979_v49 }
 0x11a   : > { %v3201_v55 = vpop.f32.mrb[16].mxu0  ;;  %v3289_v56 = vpop.f32.mrb[16].mxu1 }
 0x11b   : > { %v3202_v57 = vpop.f32.mrb[17].mxu0  ;;  %v3290_v58 = vpop.f32.mrb[17].mxu1 }
 0x11c   : > { %v4463_v0 = vadd.f32 %v3202_v57, %v3201_v55  ;;  %v3291_v1 = vadd.f32 %v3290_v58, %v3289_v56  ;;  %v3204_v2 = vpop.f32.mrb[18].mxu0  ;;  %v3292_v3 = vpop.f32.mrb[18].mxu1  ;;  %v3992_v55 = vld [vmem:[%s4105_s19 + $0x40c] ss:$36 sps:$4 sm:$0xff]   ;;  %v3994_v56 = vld [vmem:[%s4105_s19 + $0x380] ss:$36 sps:$4 sm:$0xff]  }
 0x11d   : > { %v3205_v8 = vpop.f32.mrb[19].mxu0  ;;  %v3293_v9 = vpop.f32.mrb[19].mxu1 }
 0x11e   : > { %v4469_v11 = vadd.f32 %v3291_v1, %v1800_v63  ;;  %v4471_v14 = vadd.f32 %v3205_v8, %v3204_v2  ;;  %v3294_v15 = vadd.f32 %v3293_v9, %v3292_v3  ;;  %v3995_v8 = vld [vmem:[%s4105_s19 + $0x408] ss:$36 sps:$4 sm:$0xff]  }
 0x11f   : > { %2369 = vmatmul.mubr.bf16.gmra.mrb[124].mxu1 %v3980_v59  ;;  %3662 = vmatmul.mubr.bf16.gmra.mrb[124].mxu0 %v3981_v62  ;;  %v1819_v59 = vadd.f32 %v4438_v36, %v4457_v54  ;;  %v3996_v9 = vld [vmem:[%s4105_s19 + $0x3c8] ss:$36 sps:$4 sm:$0xff]   ;;  %v1824_v36 = vadd.f32 %v4444_v44, %v4457_v54 }
 0x120   : > { %v4473_v60 = vadd.f32 %v3294_v15, %v1803_v10  ;;  %2376 = vmatprep.mubr.bf16.mxu1 %v3982_v6  ;;  %3665 = vmatprep.mubr.bf16.mxu0 %v3984_v7 }
 0x122   : > { %v3207_v16 = vpop.f32.mrb[20].mxu0  ;;  %v3295_v17 = vpop.f32.mrb[20].mxu1 }
 0x123   : > { %v3208_v18 = vpop.f32.mrb[21].mxu0  ;;  %v3296_v19 = vpop.f32.mrb[21].mxu1 }
 0x124   : > { %v4479_v24 = vadd.f32 %v3208_v18, %v3207_v16  ;;  %v3297_v25 = vadd.f32 %v3296_v19, %v3295_v17  ;;  %v3210_v26 = vpop.f32.mrb[22].mxu0  ;;  %v3298_v27 = vpop.f32.mrb[22].mxu1  ;;  %v3997_v18 = vld [vmem:[%s4105_s19 + $0x454] ss:$36 sps:$4 sm:$0xff]  }
 0x125   : > { %v3211_v32 = vpop.f32.mrb[23].mxu0  ;;  %v3299_v33 = vpop.f32.mrb[23].mxu1  ;;  %v3999_v19 = vld [vmem:[%s4105_s19 + $0x410] ss:$36 sps:$4 sm:$0xff]  }
 0x126   : > { %v4485_v35 = vadd.f32 %v3297_v25, %v1808_v4  ;;  %v4487_v38 = vadd.f32 %v3211_v32, %v3210_v26  ;;  %v3300_v39 = vadd.f32 %v3299_v33, %v3298_v27  ;;  %v1827_v4 = vadd.f32 %v4450_v52, %v4457_v54 }
 0x127   : > { %2377 = vmatmul.mubr.bf16.gmra.mrb[128].mxu1 %v3985_v22  ;;  %3666 = vmatmul.mubr.bf16.gmra.mrb[128].mxu0 %v3986_v23  ;;  %v1832_v52 = vadd.f32 %v4463_v0, %v4457_v54 }
 0x128   : > { %v4489_v12 = vadd.f32 %v3300_v39, %v1811_v34  ;;  %2384 = vmatprep.mubr.bf16.mxu1 %v3987_v30  ;;  %3669 = vmatprep.mubr.bf16.mxu0 %v3989_v31  ;;  %v4000_v34 = vld [vmem:[%s4105_s19 + $0x450] ss:$36 sps:$4 sm:$0xff]   ;;  %v4001_v39 = vld [vmem:[%s4105_s19 + $0x458] ss:$36 sps:$4 sm:$0xff]   ;;  %s2861_s19 = sshll.u32 %s4871_s21, 2  ;;  %s2862_s21 = sshll.u32 %s4873_s15, 3 }
 0x129   : > { %s4767_s5 = scalar_lea.vmem %s4864_s3, %s2861_s19  ;;  %s284_s8 = scalar_lea.vmem %s4865_s4, %s2862_s21 }
 0x12a   : > { %v3213_v40 = vpop.f32.mrb[24].mxu0  ;;  %v3301_v41 = vpop.f32.mrb[24].mxu1 }
 0x12b   : > { %v3214_v42 = vpop.f32.mrb[25].mxu0  ;;  %v3302_v43 = vpop.f32.mrb[25].mxu1 }
 0x12c   : > { %v4495_v48 = vadd.f32 %v3214_v42, %v3213_v40  ;;  %v3303_v49 = vadd.f32 %v3302_v43, %v3301_v41  ;;  %v3216_v50 = vpop.f32.mrb[26].mxu0  ;;  %v3304_v51 = vpop.f32.mrb[26].mxu1 }
 0x12d   : > { %v3217_v57 = vpop.f32.mrb[27].mxu0  ;;  %v3305_v58 = vpop.f32.mrb[27].mxu1 }
 0x12e   : > { %v4501_v62 = vadd.f32 %v3303_v49, %v1816_v20  ;;  %v4503_v63 = vadd.f32 %v3217_v57, %v3216_v50  ;;  %v3306_v1 = vadd.f32 %v3305_v58, %v3304_v51  ;;  %v1835_v20 = vadd.f32 %v4471_v14, %v4457_v54 }
 0x12f   : > { %2385 = vmatmul.mubr.bf16.gmra.mrb[132].mxu1 %v3990_v46  ;;  %3670 = vmatmul.mubr.bf16.gmra.mrb[132].mxu0 %v3991_v47 }
 0x130   : > { %v4505_v28 = vadd.f32 %v3306_v1, %v1819_v59  ;;  %2392 = vmatprep.mubr.bf16.mxu1 %v3992_v55  ;;  %3673 = vmatprep.mubr.bf16.mxu0 %v3994_v56  ;;  %v1840_v59 = vadd.f32 %v4479_v24, %v4457_v54 }
 0x132   : > { %v3219_v2 = vpop.f32.mrb[28].mxu0  ;;  %v3307_v3 = vpop.f32.mrb[28].mxu1 }
 0x133   : > { %v3220_v6 = vpop.f32.mrb[29].mxu0  ;;  %v3308_v7 = vpop.f32.mrb[29].mxu1 }
 0x134   : > { %v4511_v10 = vadd.f32 %v3220_v6, %v3219_v2  ;;  %v3309_v15 = vadd.f32 %v3308_v7, %v3307_v3  ;;  %v3222_v16 = vpop.f32.mrb[30].mxu0  ;;  %v3310_v17 = vpop.f32.mrb[30].mxu1 }
 0x135   : > { %v3223_v22 = vpop.f32.mrb[31].mxu0  ;;  %v3311_v23 = vpop.f32.mrb[31].mxu1 }
 0x136   : > { %v4517_v25 = vadd.f32 %v3309_v15, %v1824_v36  ;;  %v4519_v26 = vadd.f32 %v3223_v22, %v3222_v16  ;;  %v3312_v27 = vadd.f32 %v3311_v23, %v3310_v17  ;;  %v1848_v22 = vadd.f32 %v4495_v48, %v4457_v54 }
 0x137   : > { %2393 = vmatmul.mubr.bf16.gmra.mrb[136].mxu1 %v3995_v8  ;;  %3674 = vmatmul.mubr.bf16.gmra.mrb[136].mxu0 %v3996_v9  ;;  %v1843_v8 = vadd.f32 %v4487_v38, %v4457_v54 }
 0x138   : > { %v4521_v44 = vadd.f32 %v3312_v27, %v1827_v4  ;;  %2400 = vmatprep.mubr.bf16.mxu1 %v3997_v18  ;;  %3677 = vmatprep.mubr.bf16.mxu0 %v3999_v19 }
 0x13a   : > { %v3225_v30 = vpop.f32.mrb[32].mxu0  ;;  %v3313_v31 = vpop.f32.mrb[32].mxu1 }
 0x13b   : > { %v3226_v32 = vpop.f32.mrb[33].mxu0  ;;  %v3314_v33 = vpop.f32.mrb[33].mxu1 }
 0x13c   : > { %v4527_v40 = vadd.f32 %v3226_v32, %v3225_v30  ;;  %v3315_v41 = vadd.f32 %v3314_v33, %v3313_v31  ;;  %v3228_v42 = vpop.f32.mrb[34].mxu0  ;;  %v3316_v43 = vpop.f32.mrb[34].mxu1  ;;  %v1851_v32 = vadd.f32 %v4503_v63, %v4457_v54 }
 0x13d   : > { %v3229_v46 = vpop.f32.mrb[35].mxu0  ;;  %v3317_v47 = vpop.f32.mrb[35].mxu1 }
 0x13e   : > { %v4531_v49 = vadd.f32 %v3315_v41, %v1832_v52  ;;  %v3230_v50 = vadd.f32 %v3229_v46, %v3228_v42  ;;  %v3318_v51 = vadd.f32 %v3317_v47, %v3316_v43  ;;  %v1856_v46 = vadd.f32 %v4511_v10, %v4457_v54 }
 0x13f   : > { %2401 = vmatmul.mubr.bf16.gmra.mrb[140].mxu1 %v4000_v34  ;;  %3678 = vmatmul.mubr.bf16.gmra.mrb[140].mxu0 %v4001_v39 }
 0x140   : > { %v4533_v55 = vadd.f32 %v3318_v51, %v1835_v20 }
 0x142   : > { %v3231_v56 = vpop.f32.mrb[36].mxu0  ;;  %v3319_v0 = vpop.f32.mrb[36].mxu1 }
 0x143   : > { %v3232_v57 = vpop.f32.mrb[37].mxu0  ;;  %v3320_v58 = vpop.f32.mrb[37].mxu1 }
 0x144   : > { %v4537_v1 = vadd.f32 %v3232_v57, %v3231_v56  ;;  %v3321_v2 = vadd.f32 %v3320_v58, %v3319_v0  ;;  %v3234_v3 = vpop.f32.mrb[38].mxu0  ;;  %v3322_v14 = vpop.f32.mrb[38].mxu1  ;;  %v1859_v57 = vadd.f32 %v4519_v26, %v4457_v54  ;;  %v1867_v26 = vadd.f32 %v3230_v50, %v4457_v54 }
 0x145   : > { %v3235_v6 = vpop.f32.mrb[39].mxu0  ;;  %v3323_v7 = vpop.f32.mrb[39].mxu1 }
 0x146   : > { %v4541_v9 = vadd.f32 %v3321_v2, %v1840_v59  ;;  %v3236_v36 = vadd.f32 %v3235_v6, %v3234_v3  ;;  %v3324_v15 = vadd.f32 %v3323_v7, %v3322_v14  ;;  %v1872_v50 = vadd.f32 %v4537_v1, %v4457_v54 }
 0x148   : > { %v4543_v16 = vadd.f32 %v3324_v15, %v1843_v8  ;;  %v1864_v8 = vadd.f32 %v4527_v40, %v4457_v54 }
 0x14a   : > { %v3237_v17 = vpop.f32.mrb[40].mxu0  ;;  %v3325_v18 = vpop.f32.mrb[40].mxu1 }
 0x14b   : > { %v3238_v19 = vpop.f32.mrb[41].mxu0  ;;  %v3326_v24 = vpop.f32.mrb[41].mxu1 }
 0x14c   : > { %v4547_v23 = vadd.f32 %v3238_v19, %v3237_v17  ;;  %v3327_v4 = vadd.f32 %v3326_v24, %v3325_v18  ;;  %v3240_v27 = vpop.f32.mrb[42].mxu0  ;;  %v3328_v30 = vpop.f32.mrb[42].mxu1 }
 0x14d   : > { %v3241_v31 = vpop.f32.mrb[43].mxu0  ;;  %v3329_v38 = vpop.f32.mrb[43].mxu1 }
 0x14e   : > { %v4551_v33 = vadd.f32 %v3327_v4, %v1848_v22  ;;  %v4553_v34 = vadd.f32 %v3241_v31, %v3240_v27  ;;  %v3330_v39 = vadd.f32 %v3329_v38, %v3328_v30 }
 0x150   : > { %v4555_v52 = vadd.f32 %v3330_v39, %v1851_v32 }
 0x152   : > { %v3243_v41 = vpop.f32.mrb[44].mxu0  ;;  %v3331_v42 = vpop.f32.mrb[44].mxu1 }
 0x153   : > { %v3244_v48 = vpop.f32.mrb[45].mxu0  ;;  %v3332_v43 = vpop.f32.mrb[45].mxu1 }
 0x154   : > { %v4559_v47 = vadd.f32 %v3244_v48, %v3243_v41  ;;  %v3333_v20 = vadd.f32 %v3332_v43, %v3331_v42  ;;  %v3246_v51 = vpop.f32.mrb[46].mxu0  ;;  %v3334_v56 = vpop.f32.mrb[46].mxu1 }
 0x155   : > { %v3247_v63 = vpop.f32.mrb[47].mxu0  ;;  %v3335_v0 = vpop.f32.mrb[47].mxu1 }
 0x156   : > { %v4563_v58 = vadd.f32 %v3333_v20, %v1856_v46  ;;  %v4565_v59 = vadd.f32 %v3247_v63, %v3246_v51  ;;  %v3336_v2 = vadd.f32 %v3335_v0, %v3334_v56 }
 0x158   : > { %v4567_v3 = vadd.f32 %v3336_v2, %v1859_v57 }
 0x15a   : > { %v3337_v14 = vpop.f32.mrb[48].mxu1  ;;  %v3401_v6 = vpop.f32.mrb[48].mxu0 }
 0x15b   : > { %v3338_v10 = vpop.f32.mrb[49].mxu1  ;;  %v3402_v7 = vpop.f32.mrb[49].mxu0 }
 0x15c   : > { %v3339_v15 = vadd.f32 %v3338_v10, %v3337_v14  ;;  %v3403_v17 = vadd.f32 %v3402_v7, %v3401_v6  ;;  %v3340_v18 = vpop.f32.mrb[50].mxu1  ;;  %v3404_v19 = vpop.f32.mrb[50].mxu0 }
 0x15d   : > { %v3341_v24 = vpop.f32.mrb[51].mxu1  ;;  %v3405_v22 = vpop.f32.mrb[51].mxu0 }
 0x15e   : > { %v4572_v4 = vadd.f32 %v3339_v15, %v1864_v8  ;;  %v4575_v27 = vadd.f32 %v3403_v17, %v4469_v11  ;;  %v3342_v30 = vadd.f32 %v3341_v24, %v3340_v18  ;;  %v3406_v31 = vadd.f32 %v3405_v22, %v3404_v19 }
 0x15f   : > { %v1875_v11 = vadd.f32 %v3236_v36, %v4457_v54  ;;  %v1880_v36 = vadd.f32 %v4547_v23, %v4457_v54 }
 0x160   : > { %v4577_v38 = vadd.f32 %v3342_v30, %v1867_v26  ;;  %v4580_v32 = vadd.f32 %v3406_v31, %v4473_v60 }
 0x162   : > { %v3343_v40 = vpop.f32.mrb[52].mxu1  ;;  %v3407_v39 = vpop.f32.mrb[52].mxu0 }
 0x163   : > { %v3344_v41 = vpop.f32.mrb[53].mxu1  ;;  %v3408_v42 = vpop.f32.mrb[53].mxu0 }
 0x164   : > { %v3345_v48 = vadd.f32 %v3344_v41, %v3343_v40  ;;  %v3409_v43 = vadd.f32 %v3408_v42, %v3407_v39  ;;  %v3346_v46 = vpop.f32.mrb[54].mxu1  ;;  %v3410_v20 = vpop.f32.mrb[54].mxu0 }
 0x165   : > { %v3347_v51 = vpop.f32.mrb[55].mxu1  ;;  %v3411_v56 = vpop.f32.mrb[55].mxu0 }
 0x166   : > { %v4585_v63 = vadd.f32 %v3345_v48, %v1872_v50  ;;  %v4588_v60 = vadd.f32 %v3409_v43, %v4485_v35  ;;  %v3348_v0 = vadd.f32 %v3347_v51, %v3346_v46  ;;  %v3412_v57 = vadd.f32 %v3411_v56, %v3410_v20 }
 0x167   : > { %v1883_v35 = vadd.f32 %v4553_v34, %v4457_v54  ;;  %v1888_v34 = vadd.f32 %v4559_v47, %v4457_v54 }
 0x168   : > { %v4590_v2 = vadd.f32 %v3348_v0, %v1875_v11  ;;  %v4593_v14 = vadd.f32 %v3412_v57, %v4489_v12 }
 0x16a   : > { %v3349_v1 = vpop.f32.mrb[56].mxu1  ;;  %v3413_v6 = vpop.f32.mrb[56].mxu0 }
 0x16b   : > { %v3350_v10 = vpop.f32.mrb[57].mxu1  ;;  %v3414_v7 = vpop.f32.mrb[57].mxu0 }
 0x16c   : > { %v3351_v8 = vadd.f32 %v3350_v10, %v3349_v1  ;;  %v3415_v15 = vadd.f32 %v3414_v7, %v3413_v6  ;;  %v3352_v17 = vpop.f32.mrb[58].mxu1  ;;  %v3416_v18 = vpop.f32.mrb[58].mxu0 }
 0x16d   : > { %v3353_v19 = vpop.f32.mrb[59].mxu1  ;;  %v3417_v26 = vpop.f32.mrb[59].mxu0 }
 0x16e   : > { %v4599_v24 = vadd.f32 %v3351_v8, %v1880_v36  ;;  %v4602_v12 = vadd.f32 %v3415_v15, %v4501_v62  ;;  %v3354_v22 = vadd.f32 %v3353_v19, %v3352_v17  ;;  %v3418_v30 = vadd.f32 %v3417_v26, %v3416_v18 }
 0x16f   : > { %v1891_v62 = vadd.f32 %v4565_v59, %v4457_v54  ;;  %v1896_v59 = vadd.f32 %v4410_v61, %v4457_v54 }
 0x170   : > { %v4604_v31 = vadd.f32 %v3354_v22, %v1883_v35  ;;  %v4607_v23 = vadd.f32 %v3418_v30, %v4505_v28 }
 0x172   : > { %v3355_v40 = vpop.f32.mrb[60].mxu1  ;;  %v3419_v39 = vpop.f32.mrb[60].mxu0 }
 0x173   : > { %v3356_v41 = vpop.f32.mrb[61].mxu1  ;;  %v3420_v42 = vpop.f32.mrb[61].mxu0 }
 0x174   : > { %v3357_v50 = vadd.f32 %v3356_v41, %v3355_v40  ;;  %v3421_v48 = vadd.f32 %v3420_v42, %v3419_v39  ;;  %v3358_v43 = vpop.f32.mrb[62].mxu1  ;;  %v3422_v46 = vpop.f32.mrb[62].mxu0 }
 0x175   : > { %v3359_v20 = vpop.f32.mrb[63].mxu1  ;;  %v3423_v11 = vpop.f32.mrb[63].mxu0 }
 0x176   : > { %v4613_v51 = vadd.f32 %v3357_v50, %v1888_v34  ;;  %v4616_v28 = vadd.f32 %v3421_v48, %v4517_v25  ;;  %v3360_v56 = vadd.f32 %v3359_v20, %v3358_v43  ;;  %v3424_v0 = vadd.f32 %v3423_v11, %v3422_v46 }
 0x177   : > { %v1899_v25 = vadd.f32 %v4416_v5, %v4457_v54  ;;  %v1904_v5 = vadd.f32 %v4422_v13, %v4457_v54 }
 0x178   : > { %v4618_v57 = vadd.f32 %v3360_v56, %v1891_v62  ;;  %v4621_v47 = vadd.f32 %v3424_v0, %v4521_v44 }
 0x17a   : > { %v3361_v1 = vpop.f32.mrb[64].mxu1  ;;  %v3425_v6 = vpop.f32.mrb[64].mxu0 }
 0x17b   : > { %v3362_v10 = vpop.f32.mrb[65].mxu1  ;;  %v3426_v7 = vpop.f32.mrb[65].mxu0 }
 0x17c   : > { %v3363_v36 = vadd.f32 %v3362_v10, %v3361_v1  ;;  %v3427_v8 = vadd.f32 %v3426_v7, %v3425_v6  ;;  %v3364_v15 = vpop.f32.mrb[66].mxu1  ;;  %v3428_v17 = vpop.f32.mrb[66].mxu0 }
 0x17d   : > { %v3365_v18 = vpop.f32.mrb[67].mxu1  ;;  %v3429_v35 = vpop.f32.mrb[67].mxu0 }
 0x17e   : > { %v4627_v19 = vadd.f32 %v3363_v36, %v1896_v59  ;;  %v4630_v44 = vadd.f32 %v3427_v8, %v4531_v49  ;;  %v3366_v26 = vadd.f32 %v3365_v18, %v3364_v15  ;;  %v3430_v22 = vadd.f32 %v3429_v35, %v3428_v17 }
 0x17f   : > { %v1907_v49 = vadd.f32 %v4428_v21, %v4457_v54  ;;  %v1912_v21 = vadd.f32 %v4434_v29, %v4457_v54 }
 0x180   : > { %v4632_v30 = vadd.f32 %v3366_v26, %v1899_v25  ;;  %v4635_v61 = vadd.f32 %v3430_v22, %v4533_v55 }
 0x182   : > { %v3367_v40 = vpop.f32.mrb[68].mxu1  ;;  %v3431_v39 = vpop.f32.mrb[68].mxu0 }
 0x183   : > { %v3368_v41 = vpop.f32.mrb[69].mxu1  ;;  %v3432_v42 = vpop.f32.mrb[69].mxu0 }
 0x184   : > { %v3369_v34 = vadd.f32 %v3368_v41, %v3367_v40  ;;  %v3433_v50 = vadd.f32 %v3432_v42, %v3431_v39  ;;  %v3370_v48 = vpop.f32.mrb[70].mxu1  ;;  %v3434_v43 = vpop.f32.mrb[70].mxu0 }
 0x185   : > { %v3371_v46 = vpop.f32.mrb[71].mxu1  ;;  %v3435_v62 = vpop.f32.mrb[71].mxu0 }
 0x186   : > { %v4641_v20 = vadd.f32 %v3369_v34, %v1904_v5  ;;  %v4644_v55 = vadd.f32 %v3433_v50, %v4541_v9  ;;  %v3372_v11 = vadd.f32 %v3371_v46, %v3370_v48  ;;  %v3436_v56 = vadd.f32 %v3435_v62, %v3434_v43 }
 0x187   : > { %v1915_v9 = vadd.f32 %v4440_v37, %v4457_v54  ;;  %v1920_v37 = vadd.f32 %v4446_v45, %v4457_v54 }
 0x188   : > { %v4646_v0 = vadd.f32 %v3372_v11, %v1907_v49  ;;  %v4649_v13 = vadd.f32 %v3436_v56, %v4543_v16 }
 0x18a   : > { %v3373_v1 = vpop.f32.mrb[72].mxu1  ;;  %v3437_v6 = vpop.f32.mrb[72].mxu0 }
 0x18b   : > { %v3374_v10 = vpop.f32.mrb[73].mxu1  ;;  %v3438_v7 = vpop.f32.mrb[73].mxu0 }
 0x18c   : > { %v3375_v59 = vadd.f32 %v3374_v10, %v3373_v1  ;;  %v3439_v36 = vadd.f32 %v3438_v7, %v3437_v6  ;;  %v3376_v8 = vpop.f32.mrb[74].mxu1  ;;  %v3440_v15 = vpop.f32.mrb[74].mxu0 }
 0x18d   : > { %v3377_v17 = vpop.f32.mrb[75].mxu1  ;;  %v3441_v25 = vpop.f32.mrb[75].mxu0 }
 0x18e   : > { %v4655_v18 = vadd.f32 %v3375_v59, %v1912_v21  ;;  %v4658_v16 = vadd.f32 %v3439_v36, %v4551_v33  ;;  %v3378_v35 = vadd.f32 %v3377_v17, %v3376_v8  ;;  %v3442_v26 = vadd.f32 %v3441_v25, %v3440_v15 }
 0x18f   : > { %v1923_v33 = vadd.f32 %v4452_v53, %v4457_v54 }
 0x190   : > { %v4660_v22 = vadd.f32 %v3378_v35, %v1915_v9  ;;  %v4663_v29 = vadd.f32 %v3442_v26, %v4555_v52 }
 0x192   : > { %v3379_v40 = vpop.f32.mrb[76].mxu1  ;;  %v3443_v39 = vpop.f32.mrb[76].mxu0 }
 0x193   : > { %v3380_v41 = vpop.f32.mrb[77].mxu1  ;;  %v3444_v42 = vpop.f32.mrb[77].mxu0 }
 0x194   : > { %v3381_v5 = vadd.f32 %v3380_v41, %v3379_v40  ;;  %v3445_v34 = vadd.f32 %v3444_v42, %v3443_v39  ;;  %v3382_v50 = vpop.f32.mrb[78].mxu1  ;;  %v3446_v48 = vpop.f32.mrb[78].mxu0 }
 0x195   : > { %v3383_v43 = vpop.f32.mrb[79].mxu1  ;;  %v3447_v49 = vpop.f32.mrb[79].mxu0 }
 0x196   : > { %v4669_v46 = vadd.f32 %v3381_v5, %v1920_v37  ;;  %v4672_v52 = vadd.f32 %v3445_v34, %v4563_v58  ;;  %v3384_v62 = vadd.f32 %v3383_v43, %v3382_v50  ;;  %v3448_v11 = vadd.f32 %v3447_v49, %v3446_v48 }
 0x198   : > { %v4674_v56 = vadd.f32 %v3384_v62, %v1923_v33  ;;  %v4677_v45 = vadd.f32 %v3448_v11, %v4567_v3 }
 0x19a   : > { %v3449_v1 = vpop.f32.mrb[80].mxu0  ;;  %v3513_v6 = vpop.f32.mrb[80].mxu1 }
 0x19b   : > { %v3450_v10 = vpop.f32.mrb[81].mxu0  ;;  %v3514_v7 = vpop.f32.mrb[81].mxu1 }
 0x19c   : > { %v3451_v21 = vadd.f32 %v3450_v10, %v3449_v1  ;;  %v3515_v53 = vadd.f32 %v3514_v7, %v3513_v6  ;;  %v3452_v54 = vpop.f32.mrb[82].mxu0  ;;  %v3516_v59 = vpop.f32.mrb[82].mxu1 }
 0x19d   : > { %v3453_v36 = vpop.f32.mrb[83].mxu0  ;;  %v3517_v8 = vpop.f32.mrb[83].mxu1 }
 0x19e   : > { %v4680_v58 = vadd.f32 %v3451_v21, %v4572_v4  ;;  %v3454_v15 = vadd.f32 %v3453_v36, %v3452_v54  ;;  %v3518_v9 = vadd.f32 %v3517_v8, %v3516_v59  ;;  %v4683_v17 = vadd.f32 %v3515_v53, %v4575_v27 }
 0x1a0   : > { %v4686_v3 = vadd.f32 %v3454_v15, %v4577_v38  ;;  %v4689_v25 = vadd.f32 %v3518_v9, %v4580_v32 }
 0x1a2   : > { %v3455_v35 = vpop.f32.mrb[84].mxu0  ;;  %v3519_v26 = vpop.f32.mrb[84].mxu1 }
 0x1a3   : > { %v3456_v40 = vpop.f32.mrb[85].mxu0  ;;  %v3520_v39 = vpop.f32.mrb[85].mxu1 }
 0x1a4   : > { %v3457_v41 = vadd.f32 %v3456_v40, %v3455_v35  ;;  %v3521_v42 = vadd.f32 %v3520_v39, %v3519_v26  ;;  %v3458_v37 = vpop.f32.mrb[86].mxu0  ;;  %v3522_v4 = vpop.f32.mrb[86].mxu1 }
 0x1a5   : > { %v3459_v5 = vpop.f32.mrb[87].mxu0  ;;  %v3523_v34 = vpop.f32.mrb[87].mxu1 }
 0x1a6   : > { %v4692_v50 = vadd.f32 %v3457_v41, %v4585_v63  ;;  %v3460_v27 = vadd.f32 %v3459_v5, %v3458_v37  ;;  %v3524_v48 = vadd.f32 %v3523_v34, %v3522_v4  ;;  %v4695_v38 = vadd.f32 %v3521_v42, %v4588_v60 }
 0x1a8   : > { %v4698_v32 = vadd.f32 %v3460_v27, %v4590_v2  ;;  %v4701_v33 = vadd.f32 %v3524_v48, %v4593_v14 }
 0x1aa   : > { %v3461_v43 = vpop.f32.mrb[88].mxu0  ;;  %v3525_v49 = vpop.f32.mrb[88].mxu1 }
 0x1ab   : > { %v3462_v62 = vpop.f32.mrb[89].mxu0  ;;  %v3526_v11 = vpop.f32.mrb[89].mxu1 }
 0x1ac   : > { %v3463_v1 = vadd.f32 %v3462_v62, %v3461_v43  ;;  %v3527_v6 = vadd.f32 %v3526_v11, %v3525_v49  ;;  %v3464_v10 = vpop.f32.mrb[90].mxu0  ;;  %v3528_v63 = vpop.f32.mrb[90].mxu1 }
 0x1ad   : > { %v3465_v7 = vpop.f32.mrb[91].mxu0  ;;  %v3529_v21 = vpop.f32.mrb[91].mxu1 }
 0x1ae   : > { %v4704_v53 = vadd.f32 %v3463_v1, %v4599_v24  ;;  %v3466_v60 = vadd.f32 %v3465_v7, %v3464_v10  ;;  %v3530_v54 = vadd.f32 %v3529_v21, %v3528_v63  ;;  %v4707_v2 = vadd.f32 %v3527_v6, %v4602_v12 }
 0x1b0   : > { %v4710_v14 = vadd.f32 %v3466_v60, %v4604_v31  ;;  %v4713_v59 = vadd.f32 %v3530_v54, %v4607_v23 }
 0x1b2   : > { %v3467_v36 = vpop.f32.mrb[92].mxu0  ;;  %v3531_v8 = vpop.f32.mrb[92].mxu1 }
 0x1b3   : > { %v3468_v15 = vpop.f32.mrb[93].mxu0  ;;  %v3532_v9 = vpop.f32.mrb[93].mxu1 }
 0x1b4   : > { %v3469_v35 = vadd.f32 %v3468_v15, %v3467_v36  ;;  %v3533_v26 = vadd.f32 %v3532_v9, %v3531_v8  ;;  %v3470_v40 = vpop.f32.mrb[94].mxu0  ;;  %v3534_v24 = vpop.f32.mrb[94].mxu1 }
 0x1b5   : > { %v3471_v39 = vpop.f32.mrb[95].mxu0  ;;  %v3535_v41 = vpop.f32.mrb[95].mxu1 }
 0x1b6   : > { %v4716_v42 = vadd.f32 %v3469_v35, %v4613_v51  ;;  %v3472_v12 = vadd.f32 %v3471_v39, %v3470_v40  ;;  %v3536_v37 = vadd.f32 %v3535_v41, %v3534_v24  ;;  %v4719_v31 = vadd.f32 %v3533_v26, %v4616_v28 }
 0x1b8   : > { %v4722_v23 = vadd.f32 %v3472_v12, %v4618_v57  ;;  %v4725_v4 = vadd.f32 %v3536_v37, %v4621_v47 }
 0x1ba   : > { %v3473_v5 = vpop.f32.mrb[96].mxu0  ;;  %v3537_v34 = vpop.f32.mrb[96].mxu1 }
 0x1bb   : > { %v3474_v27 = vpop.f32.mrb[97].mxu0  ;;  %v3538_v48 = vpop.f32.mrb[97].mxu1 }
 0x1bc   : > { %v3475_v43 = vadd.f32 %v3474_v27, %v3473_v5  ;;  %v3539_v49 = vadd.f32 %v3538_v48, %v3537_v34  ;;  %v3476_v62 = vpop.f32.mrb[98].mxu0  ;;  %v3540_v51 = vpop.f32.mrb[98].mxu1 }
 0x1bd   : > { %v3477_v11 = vpop.f32.mrb[99].mxu0  ;;  %v3541_v1 = vpop.f32.mrb[99].mxu1 }
 0x1be   : > { %v4728_v6 = vadd.f32 %v3475_v43, %v4627_v19  ;;  %v3478_v28 = vadd.f32 %v3477_v11, %v3476_v62  ;;  %v3542_v10 = vadd.f32 %v3541_v1, %v3540_v51  ;;  %v4731_v57 = vadd.f32 %v3539_v49, %v4630_v44 }
 0x1c0   : > { %v4734_v47 = vadd.f32 %v3478_v28, %v4632_v30  ;;  %v4737_v63 = vadd.f32 %v3542_v10, %v4635_v61 }
 0x1c2   : > { %v3479_v7 = vpop.f32.mrb[100].mxu0  ;;  %v3543_v21 = vpop.f32.mrb[100].mxu1 }
 0x1c3   : > { %v3480_v60 = vpop.f32.mrb[101].mxu0  ;;  %v3544_v54 = vpop.f32.mrb[101].mxu1 }
 0x1c4   : > { %v3481_v36 = vadd.f32 %v3480_v60, %v3479_v7  ;;  %v3545_v8 = vadd.f32 %v3544_v54, %v3543_v21  ;;  %v3482_v15 = vpop.f32.mrb[102].mxu0  ;;  %v3546_v19 = vpop.f32.mrb[102].mxu1 }
 0x1c5   : > { %v3483_v9 = vpop.f32.mrb[103].mxu0  ;;  %v3547_v35 = vpop.f32.mrb[103].mxu1 }
 0x1c6   : > { %v4740_v26 = vadd.f32 %v3481_v36, %v4641_v20  ;;  %v3484_v44 = vadd.f32 %v3483_v9, %v3482_v15  ;;  %v3548_v40 = vadd.f32 %v3547_v35, %v3546_v19  ;;  %v4743_v30 = vadd.f32 %v3545_v8, %v4644_v55  ;;  %v3083_v15 = vld [vmem:[%s4767_s5] sm:$0xff]   ;;  %v3146_v35 = vld [vmem:[%s4767_s5 + $0x8] sm:$0xff]  }
 0x1c8   : > { %v4746_v61 = vadd.f32 %v3484_v44, %v4646_v0  ;;  %v4749_v24 = vadd.f32 %v3548_v40, %v4649_v13 }
 0x1ca   : > { %v3485_v39 = vpop.f32.mrb[104].mxu0  ;;  %v3549_v41 = vpop.f32.mrb[104].mxu1 }
 0x1cb   : > { %v3486_v12 = vpop.f32.mrb[105].mxu0  ;;  %v3550_v37 = vpop.f32.mrb[105].mxu1 }
 0x1cc   : > { %v3487_v5 = vadd.f32 %v3486_v12, %v3485_v39  ;;  %v3551_v34 = vadd.f32 %v3550_v37, %v3549_v41  ;;  %v3488_v20 = vpop.f32.mrb[106].mxu0  ;;  %v3552_v27 = vpop.f32.mrb[106].mxu1  ;;  %v3084_v39 = vunpack.c.l.bf16 %v3083_v15  ;;  %v3088_v37 = vunpack.c.l.bf16 %v3146_v35 }
 0x1cd   : > { %v3489_v48 = vpop.f32.mrb[107].mxu0  ;;  %v3553_v43 = vpop.f32.mrb[107].mxu1 }
 0x1ce   : > { %v4752_v55 = vadd.f32 %v3487_v5, %v4655_v18  ;;  %v3490_v49 = vadd.f32 %v3489_v48, %v3488_v20  ;;  %v3554_v0 = vadd.f32 %v3553_v43, %v3552_v27  ;;  %v4755_v62 = vadd.f32 %v3551_v34, %v4658_v16 }
 0x1cf   : > { %v3085_v20 = vunpack.c.h.bf16 %v3083_v15  ;;  %v3089_v27 = vunpack.c.h.bf16 %v3146_v35 }
 0x1d0   : > { %v4758_v13 = vadd.f32 %v3490_v49, %v4660_v22  ;;  %v4761_v51 = vadd.f32 %v3554_v0, %v4663_v29 }
 0x1d2   : > { %v3491_v11 = vpop.f32.mrb[108].mxu0  ;;  %v3555_v1 = vpop.f32.mrb[108].mxu1 }
 0x1d3   : > { %v3492_v28 = vpop.f32.mrb[109].mxu0  ;;  %v3556_v10 = vpop.f32.mrb[109].mxu1 }
 0x1d4   : > { %v3493_v7 = vadd.f32 %v3492_v28, %v3491_v11  ;;  %v3557_v21 = vadd.f32 %v3556_v10, %v3555_v1  ;;  %v3494_v18 = vpop.f32.mrb[110].mxu0  ;;  %v3558_v60 = vpop.f32.mrb[110].mxu1  ;;  %v3147_v1 = vld [vmem:[%s4767_s5 + $0x10] sm:$0xff]  }
 0x1d5   : > { %v3495_v16 = vpop.f32.mrb[111].mxu0  ;;  %v3559_v22 = vpop.f32.mrb[111].mxu1 }
 0x1d6   : > { %v4770_v29 = vadd.f32 %v3493_v7, %v4669_v46  ;;  %v3496_v54 = vadd.f32 %v3495_v16, %v3494_v18  ;;  %v3560_v36 = vadd.f32 %v3559_v22, %v3558_v60  ;;  %v4773_v8 = vadd.f32 %v3557_v21, %v4672_v52  ;;  %v3148_v7 = vld [vmem:[%s4767_s5 + $0x18] sm:$0xff]  }
 0x1d7   : > { %v3092_v22 = vunpack.c.l.bf16 %v3147_v1 }
 0x1d8   : > { %v4777_v19 = vadd.f32 %v3496_v54, %v4674_v56  ;;  %v4780_v9 = vadd.f32 %v3560_v36, %v4677_v45  ;;  %v3096_v36 = vunpack.c.l.bf16 %v3148_v7 }
 0x1da   : > { %v3561_v44 = vpop.f32.mrb[112].mxu1  ;;  %v3651_v40 = vpop.f32.mrb[112].mxu0 }
 0x1db   : > { %v2452_v41 = vadd.f32 %v3651_v40, %v4695_v38  ;;  %v3562_v46 = vpop.f32.mrb[113].mxu1  ;;  %v2443_v12 = vpop.f32.mrb[113].mxu0 }
 0x1dc   : > { %v3563_v5 = vadd.f32 %v3562_v46, %v3561_v44  ;;  %v2444_v52 = vadd.f32 %v2443_v12, %v4683_v17  ;;  %v3564_v34 = vpop.f32.mrb[114].mxu1  ;;  %v3652_v56 = vpop.f32.mrb[114].mxu0 }
 0x1dd   : > { %v2455_v45 = vadd.f32 %v3652_v56, %v4701_v33  ;;  %v3565_v48 = vpop.f32.mrb[115].mxu1  ;;  %v2446_v43 = vpop.f32.mrb[115].mxu0  ;;  %v2636_v28 = vadd.f32 %v3088_v37, %v2452_v41  ;;  %v3097_v37 = vunpack.c.h.bf16 %v3148_v7 }
 0x1de   : > { %v2634_v49 = vadd.f32 %v3084_v39, %v2444_v52  ;;  %v3566_v0 = vadd.f32 %v3565_v48, %v3564_v34  ;;  %v2447_v38 = vadd.f32 %v2446_v43, %v4689_v25  ;;  %v4788_v11 = vadd.f32 %v3563_v5, %v4680_v58 }
 0x1df   : > { %v2637_v21 = vadd.f32 %v3089_v27, %v2455_v45  ;;  %v3093_v58 = vunpack.c.h.bf16 %v3147_v1  ;;  %v2668_v35 = vmax.f32 %v2636_v28, 0.0  ;;  %v3149_v27 = vld [vmem:[%s4767_s5 + $0x20] sm:$0xff]  }
 0x1e0   : > { %v2635_v10 = vadd.f32 %v3085_v20, %v2447_v38  ;;  %v4793_v17 = vadd.f32 %v3566_v0, %v4686_v3  ;;  %v2666_v18 = vmax.f32 %v2634_v49, 0.0  ;;  %v3150_v0 = vld [vmem:[%s4767_s5 + $0x28] sm:$0xff]  }
 0x1e1   : > { %v2669_v46 = vmax.f32 %v2637_v21, 0.0  ;;  %v3100_v21 = vunpack.c.l.bf16 %v3149_v27 }
 0x1e2   : > { %v2667_v33 = vmax.f32 %v2635_v10, 0.0  ;;  %v3567_v60 = vpop.f32.mrb[116].mxu1  ;;  %v3655_v16 = vpop.f32.mrb[116].mxu0 }
 0x1e3   : > { %v2468_v54 = vadd.f32 %v3655_v16, %v4719_v31  ;;  %v3568_v25 = vpop.f32.mrb[117].mxu1  ;;  %v2459_v15 = vpop.f32.mrb[117].mxu0 }
 0x1e4   : > { %v2698_v44 = vadd.f32 %v2667_v33, %v2666_v18  ;;  %v3569_v40 = vadd.f32 %v3568_v25, %v3567_v60  ;;  %v2460_v39 = vadd.f32 %v2459_v15, %v4707_v2  ;;  %v3570_v3 = vpop.f32.mrb[118].mxu1  ;;  %v3656_v41 = vpop.f32.mrb[118].mxu0  ;;  %v3104_v18 = vunpack.c.l.bf16 %v3150_v0 }
 0x1e5   : > { %v2471_v12 = vadd.f32 %v3656_v41, %v4725_v4  ;;  %v3571_v5 = vpop.f32.mrb[119].mxu1  ;;  %v2462_v52 = vpop.f32.mrb[119].mxu0  ;;  %v2640_v45 = vadd.f32 %v3096_v36, %v2468_v54 }
 0x1e6   : > { %v2699_v31 = vadd.f32 %v2698_v44, %v2668_v35  ;;  %v2638_v34 = vadd.f32 %v3092_v22, %v2460_v39  ;;  %v3572_v56 = vadd.f32 %v3571_v5, %v3570_v3  ;;  %v2463_v20 = vadd.f32 %v2462_v52, %v4713_v59 }
 0x1e7   : > { %v4801_v48 = vadd.f32 %v3569_v40, %v4692_v50  ;;  %v2641_v4 = vadd.f32 %v3097_v37, %v2471_v12  ;;  %v3101_v50 = vunpack.c.h.bf16 %v3149_v27  ;;  %v2672_v16 = vmax.f32 %v2640_v45, 0.0  ;;  %v3151_v12 = vld [vmem:[%s4767_s5 + $0x30] sm:$0xff]  }
 0x1e8   : > { %v2670_v2 = vmax.f32 %v2638_v34, 0.0  ;;  %v2700_v43 = vadd.f32 %v2699_v31, %v2669_v46  ;;  %v2639_v49 = vadd.f32 %v3093_v58, %v2463_v20  ;;  %v4805_v38 = vadd.f32 %v3572_v56, %v4698_v32  ;;  %v3152_v31 = vld [vmem:[%s4767_s5 + $0x38] sm:$0xff]  }
 0x1e9   : > { %v2673_v15 = vmax.f32 %v2641_v4, 0.0  ;;  %v3105_v35 = vunpack.c.h.bf16 %v3150_v0 }
 0x1ea   : > { %v2701_v1 = vadd.f32 %v2700_v43, %v2670_v2  ;;  %v2671_v28 = vmax.f32 %v2639_v49, 0.0  ;;  %v3573_v10 = vpop.f32.mrb[120].mxu1  ;;  %v3659_v7 = vpop.f32.mrb[120].mxu0  ;;  %v3108_v2 = vunpack.c.l.bf16 %v3151_v12  ;;  %v3112_v43 = vunpack.c.l.bf16 %v3152_v31 }
 0x1eb   : > { %v2484_v59 = vadd.f32 %v3659_v7, %v4743_v30  ;;  %v3574_v33 = vpop.f32.mrb[121].mxu1  ;;  %v2475_v60 = vpop.f32.mrb[121].mxu0 }
 0x1ec   : > { %v2702_v22 = vadd.f32 %v2701_v1, %v2671_v28  ;;  %v3575_v54 = vadd.f32 %v3574_v33, %v3573_v10  ;;  %v2476_v36 = vadd.f32 %v2475_v60, %v4731_v57  ;;  %v3576_v32 = vpop.f32.mrb[122].mxu1  ;;  %v3660_v25 = vpop.f32.mrb[122].mxu0 }
 0x1ed   : > { %v2487_v58 = vadd.f32 %v3660_v25, %v4749_v24  ;;  %v3577_v44 = vpop.f32.mrb[123].mxu1  ;;  %v2478_v40 = vpop.f32.mrb[123].mxu0  ;;  %v2644_v46 = vadd.f32 %v3104_v18, %v2484_v59  ;;  %v3113_v18 = vunpack.c.h.bf16 %v3152_v31 }
 0x1ee   : > { %v2703_v30 = vadd.f32 %v2702_v22, %v2672_v16  ;;  %v2642_v39 = vadd.f32 %v3100_v21, %v2476_v36  ;;  %v3578_v3 = vadd.f32 %v3577_v44, %v3576_v32  ;;  %v2479_v41 = vadd.f32 %v2478_v40, %v4737_v63  ;;  %v3153_v36 = vld [vmem:[%s4767_s5 + $0x40] sm:$0xff]  }
 0x1ef   : > { %v4813_v37 = vadd.f32 %v3575_v54, %v4704_v53  ;;  %v2645_v24 = vadd.f32 %v3105_v35, %v2487_v58  ;;  %v3109_v53 = vunpack.c.h.bf16 %v3151_v12  ;;  %v2676_v4 = vmax.f32 %v2644_v46, 0.0  ;;  %v3154_v58 = vld [vmem:[%s4767_s5 + $0x48] sm:$0xff]  }
 0x1f0   : > { %v2674_v57 = vmax.f32 %v2642_v39, 0.0  ;;  %v2704_v5 = vadd.f32 %v2703_v30, %v2673_v15  ;;  %v2643_v52 = vadd.f32 %v3101_v50, %v2479_v41  ;;  %v4817_v34 = vadd.f32 %v3578_v3, %v4710_v14 }
 0x1f1   : > { %v2677_v21 = vmax.f32 %v2645_v24, 0.0  ;;  %v3116_v3 = vunpack.c.l.bf16 %v3153_v36  ;;  %v3120_v46 = vunpack.c.l.bf16 %v3154_v58 }
 0x1f2   : > { %v2705_v56 = vadd.f32 %v2704_v5, %v2674_v57  ;;  %v2675_v20 = vmax.f32 %v2643_v52, 0.0  ;;  %v3579_v45 = vpop.f32.mrb[124].mxu1  ;;  %v3663_v27 = vpop.f32.mrb[124].mxu0  ;;  %v3117_v57 = vunpack.c.h.bf16 %v3153_v36 }
 0x1f3   : > { %v2500_v63 = vadd.f32 %v3663_v27, %v4773_v8  ;;  %v3580_v49 = vpop.f32.mrb[125].mxu1  ;;  %v2491_v0 = vpop.f32.mrb[125].mxu0 }
 0x1f4   : > { %v2706_v1 = vadd.f32 %v2705_v56, %v2675_v20  ;;  %v3581_v28 = vadd.f32 %v3580_v49, %v3579_v45  ;;  %v2492_v10 = vadd.f32 %v2491_v0, %v4755_v62  ;;  %v3582_v14 = vpop.f32.mrb[126].mxu1  ;;  %v3664_v7 = vpop.f32.mrb[126].mxu0  ;;  %v3121_v45 = vunpack.c.h.bf16 %v3154_v58 }
 0x1f5   : > { %v2503_v59 = vadd.f32 %v3664_v7, %v4780_v9  ;;  %v3583_v33 = vpop.f32.mrb[127].mxu1  ;;  %v2494_v60 = vpop.f32.mrb[127].mxu0  ;;  %v2648_v54 = vadd.f32 %v3112_v43, %v2500_v63 }
 0x1f6   : > { %v2707_v8 = vadd.f32 %v2706_v1, %v2676_v4  ;;  %v2646_v50 = vadd.f32 %v3108_v2, %v2492_v10  ;;  %v3584_v16 = vadd.f32 %v3583_v33, %v3582_v14  ;;  %v2495_v22 = vadd.f32 %v2494_v60, %v4761_v51  ;;  %v3156_v10 = vld [vmem:[%s4767_s5 + $0x58] sm:$0xff]  }
 0x1f7   : > { %v2371_v32 = vadd.f32 %v3581_v28, %v4716_v42  ;;  %v2649_v44 = vadd.f32 %v3113_v18, %v2503_v59  ;;  %v2680_v5 = vmax.f32 %v2648_v54, 0.0  ;;  %v3129_v58 = vunpack.c.h.bf16 %v3156_v10 }
 0x1f8   : > { %v2678_v25 = vmax.f32 %v2646_v50, 0.0  ;;  %v2708_v62 = vadd.f32 %v2707_v8, %v2677_v21  ;;  %v2647_v15 = vadd.f32 %v3109_v53, %v2495_v22  ;;  %v2374_v35 = vadd.f32 %v3584_v16, %v4722_v23  ;;  %v3155_v53 = vld [vmem:[%s4767_s5 + $0x50] sm:$0xff]  }
 0x1f9   : > { %v2681_v56 = vmax.f32 %v2649_v44, 0.0  ;;  %v3124_v33 = vunpack.c.l.bf16 %v3155_v53  ;;  %v3128_v8 = vunpack.c.l.bf16 %v3156_v10  ;;  %v3125_v16 = vunpack.c.h.bf16 %v3155_v53 }
 0x1fa   : > { %v2709_v9 = vadd.f32 %v2708_v62, %v2678_v25  ;;  %v2679_v40 = vmax.f32 %v2647_v15, 0.0  ;;  %v3585_v30 = vpop.f32.mrb[128].mxu1  ;;  %v3667_v39 = vpop.f32.mrb[128].mxu0 }
 0x1fb   : > { %v2516_v41 = vadd.f32 %v3667_v39, %v4801_v48  ;;  %v3586_v51 = vpop.f32.mrb[129].mxu1  ;;  %v2507_v12 = vpop.f32.mrb[129].mxu0 }
 0x1fc   : > { %v2710_v42 = vadd.f32 %v2709_v9, %v2679_v40  ;;  %v3587_v52 = vadd.f32 %v3586_v51, %v3585_v30  ;;  %v2508_v31 = vadd.f32 %v2507_v12, %v4788_v11  ;;  %v3588_v24 = vpop.f32.mrb[130].mxu1  ;;  %v3668_v23 = vpop.f32.mrb[130].mxu0 }
 0x1fd   : > { %v2519_v20 = vadd.f32 %v3668_v23, %v4805_v38  ;;  %v3589_v27 = vpop.f32.mrb[131].mxu1  ;;  %v2510_v2 = vpop.f32.mrb[131].mxu0  ;;  %v2652_v0 = vadd.f32 %v3120_v46, %v2516_v41  ;;  %v3157_v46 = vld [vmem:[%s4767_s5 + $0x60] sm:$0xff]  }
 0x1fe   : > { %v2711_v48 = vadd.f32 %v2710_v42, %v2680_v5  ;;  %v2650_v63 = vadd.f32 %v3116_v3, %v2508_v31  ;;  %v3590_v43 = vadd.f32 %v3589_v27, %v3588_v24  ;;  %v2511_v49 = vadd.f32 %v2510_v2, %v4793_v17 }
 0x1ff   : > { %v2379_v4 = vadd.f32 %v3587_v52, %v4728_v6  ;;  %v2653_v7 = vadd.f32 %v3121_v45, %v2519_v20  ;;  %v2684_v22 = vmax.f32 %v2652_v0, 0.0  ;;  %v3132_v23 = vunpack.c.l.bf16 %v3157_v46 }
 0x200   : > { %v2682_v1 = vmax.f32 %v2650_v63, 0.0  ;;  %v2712_v11 = vadd.f32 %v2711_v48, %v2681_v56  ;;  %v2651_v28 = vadd.f32 %v3117_v57, %v2511_v49  ;;  %v2382_v14 = vadd.f32 %v3590_v43, %v4734_v47  ;;  %v3158_v57 = vld [vmem:[%s4767_s5 + $0x68] sm:$0xff]  }
 0x201   : > { %v2685_v47 = vmax.f32 %v2653_v7, 0.0  ;;  %v3136_v20 = vunpack.c.l.bf16 %v3158_v57  ;;  %v3133_v27 = vunpack.c.h.bf16 %v3157_v46  ;;  %v3137_v53 = vunpack.c.h.bf16 %v3158_v57 }
 0x202   : > { %v2713_v38 = vadd.f32 %v2712_v11, %v2682_v1  ;;  %v2683_v21 = vmax.f32 %v2651_v28, 0.0  ;;  %v3591_v59 = vpop.f32.mrb[132].mxu1  ;;  %v3671_v18 = vpop.f32.mrb[132].mxu0 }
 0x203   : > { %v2532_v60 = vadd.f32 %v3671_v18, %v2371_v32  ;;  %v3592_v50 = vpop.f32.mrb[133].mxu1  ;;  %v2523_v17 = vpop.f32.mrb[133].mxu0  ;;  %v3159_v18 = vld [vmem:[%s4767_s5 + $0x70] sm:$0xff]  }
 0x204   : > { %v2714_v54 = vadd.f32 %v2713_v38, %v2683_v21  ;;  %v3593_v6 = vadd.f32 %v3592_v50, %v3591_v59  ;;  %v2524_v36 = vadd.f32 %v2523_v17, %v4813_v37  ;;  %v3594_v25 = vpop.f32.mrb[134].mxu1  ;;  %v3672_v62 = vpop.f32.mrb[134].mxu0 }
 0x205   : > { %v2535_v15 = vadd.f32 %v3672_v62, %v2374_v35  ;;  %v3595_v44 = vpop.f32.mrb[135].mxu1  ;;  %v2526_v9 = vpop.f32.mrb[135].mxu0  ;;  %v2656_v3 = vadd.f32 %v3128_v8, %v2532_v60 }
 0x206   : > { %v2715_v40 = vadd.f32 %v2714_v54, %v2684_v22  ;;  %v2654_v32 = vadd.f32 %v3124_v33, %v2524_v36  ;;  %v3596_v30 = vadd.f32 %v3595_v44, %v3594_v25  ;;  %v2527_v39 = vadd.f32 %v2526_v9, %v4817_v34 }
 0x207   : > { %v2387_v41 = vadd.f32 %v3593_v6, %v4740_v26  ;;  %v2657_v42 = vadd.f32 %v3129_v58, %v2535_v15  ;;  %v2688_v2 = vmax.f32 %v2656_v3, 0.0  ;;  %v3160_v6 = vld [vmem:[%s4767_s5 + $0x78] sm:$0xff]   ;;  %v3140_v36 = vunpack.c.l.bf16 %v3159_v18 }
 0x208   : > { %v2686_v51 = vmax.f32 %v2654_v32, 0.0  ;;  %v2716_v12 = vadd.f32 %v2715_v40, %v2685_v47  ;;  %v2655_v37 = vadd.f32 %v3125_v16, %v2527_v39  ;;  %v2390_v5 = vadd.f32 %v3596_v30, %v4746_v61 }
 0x209   : > { %v2689_v0 = vmax.f32 %v2657_v42, 0.0  ;;  %v3144_v40 = vunpack.c.l.bf16 %v3160_v6 }
 0x20a   : > { %v2717_v35 = vadd.f32 %v2716_v12, %v2686_v51  ;;  %v2687_v52 = vmax.f32 %v2655_v37, 0.0  ;;  %v3597_v31 = vpop.f32.mrb[136].mxu1  ;;  %v3675_v24 = vpop.f32.mrb[136].mxu0  ;;  %v3145_v51 = vunpack.c.h.bf16 %v3160_v6 }
 0x20b   : > { %v2548_v56 = vadd.f32 %v3675_v24, %v2387_v41  ;;  %v3598_v45 = vpop.f32.mrb[137].mxu1  ;;  %v2539_v34 = vpop.f32.mrb[137].mxu0 }
 0x20c   : > { %v2718_v26 = vadd.f32 %v2717_v35, %v2687_v52  ;;  %v3599_v48 = vadd.f32 %v3598_v45, %v3597_v31  ;;  %v2540_v63 = vadd.f32 %v2539_v34, %v2379_v4  ;;  %v3600_v43 = vpop.f32.mrb[138].mxu1  ;;  %v3676_v49 = vpop.f32.mrb[138].mxu0 }
 0x20d   : > { %v2551_v61 = vadd.f32 %v3676_v49, %v2390_v5  ;;  %v3601_v1 = vpop.f32.mrb[139].mxu1  ;;  %v2542_v11 = vpop.f32.mrb[139].mxu0  ;;  %v2660_v21 = vadd.f32 %v3136_v20, %v2548_v56 }
 0x20e   : > { %v2719_v28 = vadd.f32 %v2718_v26, %v2688_v2  ;;  %v2658_v10 = vadd.f32 %v3132_v23, %v2540_v63  ;;  %v3602_v7 = vadd.f32 %v3601_v1, %v3600_v43  ;;  %v2543_v38 = vadd.f32 %v2542_v11, %v2382_v14 }
 0x20f   : > { %v2395_v59 = vadd.f32 %v3599_v48, %v4752_v55  ;;  %v2661_v50 = vadd.f32 %v3137_v53, %v2551_v61  ;;  %v2692_v47 = vmax.f32 %v2660_v21, 0.0 }
 0x210   : > { %v2690_v33 = vmax.f32 %v2658_v10, 0.0  ;;  %v2720_v60 = vadd.f32 %v2719_v28, %v2689_v0  ;;  %v2659_v8 = vadd.f32 %v3133_v27, %v2543_v38  ;;  %v2398_v4 = vadd.f32 %v3602_v7, %v4758_v13 }
 0x211   : > { %v2693_v9 = vmax.f32 %v2661_v50, 0.0  ;;  %v3141_v13 = vunpack.c.h.bf16 %v3159_v18 }
 0x212   : > { %v2721_v17 = vadd.f32 %v2720_v60, %v2690_v33  ;;  %v2691_v16 = vmax.f32 %v2659_v8, 0.0  ;;  %v3603_v22 = vpop.f32.mrb[140].mxu1  ;;  %v3679_v54 = vpop.f32.mrb[140].mxu0 }
 0x213   : > { %v3604_v25 = vpop.f32.mrb[141].mxu1  ;;  %v2555_v62 = vpop.f32.mrb[141].mxu0 }
 0x214   : > { %v2722_v14 = vadd.f32 %v2721_v17, %v2691_v16  ;;  %v3605_v15 = vadd.f32 %v3604_v25, %v3603_v22  ;;  %v2556_v58 = vadd.f32 %v2555_v62, %v2395_v59  ;;  %v3606_v55 = vpop.f32.mrb[142].mxu1  ;;  %v3680_v44 = vpop.f32.mrb[142].mxu0 }
 0x215   : > { %v3607_v32 = vpop.f32.mrb[143].mxu1  ;;  %v2558_v30 = vpop.f32.mrb[143].mxu0 }
 0x216   : > { %v2723_v39 = vadd.f32 %v2722_v14, %v2692_v47  ;;  %v2403_v3 = vadd.f32 %v3605_v15, %v4770_v29  ;;  %v2662_v41 = vadd.f32 %v3140_v36, %v2556_v58  ;;  %v3608_v46 = vadd.f32 %v3607_v32, %v3606_v55 }
 0x217   : > { %v2559_v12 = vadd.f32 %v2558_v30, %v2398_v4 }
 0x218   : > { %v2564_v37 = vadd.f32 %v3679_v54, %v2403_v3  ;;  %v2694_v57 = vmax.f32 %v2662_v41, 0.0  ;;  %v2724_v5 = vadd.f32 %v2723_v39, %v2693_v9  ;;  %v2406_v42 = vadd.f32 %v3608_v46, %v4777_v19 }
 0x219   : > { %v2663_v35 = vadd.f32 %v3141_v13, %v2559_v12 }
 0x21a   : > { %v2664_v52 = vadd.f32 %v3144_v40, %v2564_v37  ;;  %v2725_v31 = vadd.f32 %v2724_v5, %v2694_v57  ;;  %v2567_v24 = vadd.f32 %v3680_v44, %v2406_v42 }
 0x21b   : > { %v2695_v23 = vmax.f32 %v2663_v35, 0.0 }
 0x21c   : > { %v2696_v56 = vmax.f32 %v2664_v52, 0.0  ;;  %v2665_v20 = vadd.f32 %v3145_v51, %v2567_v24 }
 0x21d   : > { %v2726_v45 = vadd.f32 %v2725_v31, %v2695_v23 }
 0x21e   : > { %v2697_v29 = vmax.f32 %v2665_v20, 0.0 }
 0x21f   : > { %v2727_v34 = vadd.f32 %v2726_v45, %v2696_v56 }
 0x221   : > { %v2728_v27 = vadd.f32 %v2727_v34, %v2697_v29 }
 0x223   : > { %v2729_v2 = vrot.slane %v2728_v27, 4 }
 0x225   : > { %v2730_v26 = vadd.f32 %v2729_v2, %v2728_v27 }
 0x227   : > { %v2731_v48 = vrot.slane %v2730_v26, 2 }
 0x229   : > { %v2732_v63 = vadd.f32 %v2731_v48, %v2730_v26 }
 0x22b   : > { %v2733_v43 = vrot.slane %v2732_v63, 1 }
 0x22d   : > { %v2734_v19 = vadd.f32 %v2733_v43, %v2732_v63 }
 0x22f   : > { %v2735_v49 = vmul.f32 0.00390625, %v2734_v19 }
 0x231   : > { %2736 = vst [vmem:[%s284_s8] sm:$0xff] %v2735_v49 }
 0x232 PF: > { %s14_s17 = sadd.s32 1, %s4024_s17   ;;  %s4866_s15 = smov %s4020_s16 }
 0x233   : > { %p11_p6 = scmp.ge.s32.totalorder %s14_s17, 4   ;;  %s4867_s16 = smov %s4869_s18 }
 0x235   :  { %13 = sbr.rel (!%p11_p6) target bundleno = 2 (0x2), region = 75 }

</bundles_post_ra>
